<compile_context>
chip_gen: v7x
topology: tpu7x:2x2x1
jax: 0.10.0
libtpu: 0.0.40
codegen_flags: <defaults>
</compile_context>

<pallas_src>
import functools

import jax
import jax.numpy as jnp
from jax.experimental import pallas as pl
from jax.experimental.pallas import tpu as pltpu

H = W = 28          # spatial size implied by fc sizes (320 = 20*4*4, 90 = 10*3*3)
HW = H * W

_PARALLEL1 = pltpu.CompilerParams(dimension_semantics=("parallel",))


def _round_up(x, d):
    return ((x + d - 1) // d) * d


def _pad_rows(x, mp):
    m = x.shape[0]
    return x if mp == m else jnp.pad(x, ((0, mp - m), (0, 0)))


# ----------------------------------------------------------------------------- kernels

def _matmul_bias_kernel(x_ref, w_ref, b_ref, o_ref, *, relu):
    acc = jnp.dot(x_ref[...], w_ref[...], preferred_element_type=jnp.float32)
    acc = acc + b_ref[...]
    if relu:
        acc = jnp.maximum(acc, 0.0)
    o_ref[...] = acc


def _mlp2_kernel(x_ref, w1_ref, b1_ref, w2_ref, b2_ref, o_ref, *, log_softmax):
    # Linear -> ReLU -> Linear (-> log_softmax), fused.
    h = jnp.dot(x_ref[...], w1_ref[...], preferred_element_type=jnp.float32) + b1_ref[...]
    h = jnp.maximum(h, 0.0)
    z = jnp.dot(h, w2_ref[...], preferred_element_type=jnp.float32) + b2_ref[...]
    if log_softmax:
        m = jnp.max(z, axis=-1, keepdims=True)
        e = jnp.exp(z - m)
        z = z - m - jnp.log(jnp.sum(e, axis=-1, keepdims=True))
    o_ref[...] = z


def _max4_relu_kernel(a_ref, b_ref, c_ref, d_ref, o_ref):
    m = jnp.maximum(jnp.maximum(a_ref[...], b_ref[...]),
                    jnp.maximum(c_ref[...], d_ref[...]))
    o_ref[...] = jnp.maximum(m, 0.0)


def _grid_sample_kernel(theta_ref, img_ref, out_ref):
    # theta_ref: SMEM (N, 6) scalar-prefetch.
    # img_ref:   (1, W, H) block — x-major image, img_ref[0][x, y] = img[y, x].
    # out_ref:   (1, 1, HW) block — lane-dense sampled row.
    b = pl.program_id(0)
    t00 = theta_ref[b, 0]; t01 = theta_ref[b, 1]; t02 = theta_ref[b, 2]
    t10 = theta_ref[b, 3]; t11 = theta_ref[b, 4]; t12 = theta_ref[b, 5]

    # output pixel index p = oy*W + ox, generated in-kernel (no coordinate DMAs)
    p = jax.lax.broadcasted_iota(jnp.int32, (1, HW), 1).astype(jnp.float32)
    oy = jnp.floor(p / W)
    ox = p - oy * W
    xn = (2.0 * ox + 1.0) / W - 1.0          # F.affine_grid, align_corners=False
    yn = (2.0 * oy + 1.0) / H - 1.0

    gx = t00 * xn + t01 * yn + t02
    gy = t10 * xn + t11 * yn + t12
    ix = jnp.clip((gx + 1.0) * (W * 0.5) - 0.5, 0.0, float(W - 1))   # border padding
    iy = jnp.clip((gy + 1.0) * (H * 0.5) - 0.5, 0.0, float(H - 1))

    x0f = jnp.floor(ix); y0f = jnp.floor(iy)
    wx1 = ix - x0f; wx0 = 1.0 - wx1
    wy1 = iy - y0f; wy0 = 1.0 - wy1
    x0 = x0f.astype(jnp.int32); y0 = y0f.astype(jnp.int32)
    x1 = jnp.minimum(x0 + 1, W - 1); y1 = jnp.minimum(y0 + 1, H - 1)

    # Separable bilinear: out[p] = sum_{y,x} img[y,x] * U[y,p] * V[x,p].
    yq = jax.lax.broadcasted_iota(jnp.int32, (H, HW), 0)
    xq = jax.lax.broadcasted_iota(jnp.int32, (W, HW), 0)
    U = jnp.where(yq == y0, wy0, 0.0) + jnp.where(yq == y1, wy1, 0.0)   # (H, HW)
    V = jnp.where(xq == x0, wx0, 0.0) + jnp.where(xq == x1, wx1, 0.0)   # (W, HW)

    img_xy = img_ref[0]                                                  # (W, H)
    tmp = jnp.dot(img_xy, U, preferred_element_type=jnp.float32)         # (W, HW)
    out = jnp.sum(tmp * V, axis=0, keepdims=True)                        # (1, HW)
    out_ref[...] = out.reshape(1, 1, HW)


# ----------------------------------------------------------------------------- wrappers

def matmul_bias(x, w, b, *, relu=False, tm=512):
    # Row-tiled GEMM + bias (+ ReLU).  M tiled (<=512 rows, v7x-safe VMEM),
    # K and N whole, bias untiled; row-tile axis is "parallel".
    m, k = x.shape
    n = w.shape[1]
    tm = min(tm, _round_up(m, 8))
    mp = _round_up(m, tm)
    out = pl.pallas_call(
        functools.partial(_matmul_bias_kernel, relu=relu),
        out_shape=jax.ShapeDtypeStruct((mp, n), jnp.float32),
        grid=(mp // tm,),
        in_specs=[pl.BlockSpec((tm, k), lambda i: (i, 0)),
                  pl.BlockSpec((k, n), lambda i: (0, 0)),
                  pl.BlockSpec((1, n), lambda i: (0, 0))],
        out_specs=pl.BlockSpec((tm, n), lambda i: (i, 0)),
        compiler_params=_PARALLEL1,
    )(_pad_rows(x, mp), w, b.reshape(1, n))
    return out[:m] if mp != m else out


def mlp2(x, w1, b1, w2, b2, *, log_softmax, tm=512):
    # Fused Linear -> ReLU -> Linear (-> log_softmax) in one kernel launch.
    m, k1 = x.shape
    n1 = w1.shape[1]
    n2 = w2.shape[1]
    tm = min(tm, _round_up(m, 8))
    mp = _round_up(m, tm)
    out = pl.pallas_call(
        functools.partial(_mlp2_kernel, log_softmax=log_softmax),
        out_shape=jax.ShapeDtypeStruct((mp, n2), jnp.float32),
        grid=(mp // tm,),
        in_specs=[pl.BlockSpec((tm, k1), lambda i: (i, 0)),
                  pl.BlockSpec((k1, n1), lambda i: (0, 0)),
                  pl.BlockSpec((1, n1), lambda i: (0, 0)),
                  pl.BlockSpec((n1, n2), lambda i: (0, 0)),
                  pl.BlockSpec((1, n2), lambda i: (0, 0))],
        out_specs=pl.BlockSpec((tm, n2), lambda i: (i, 0)),
        compiler_params=_PARALLEL1,
    )(_pad_rows(x, mp), w1, b1.reshape(1, n1), w2, b2.reshape(1, n2))
    return out[:m] if mp != m else out


def maxpool2_relu(x, *, tm=256):
    # x: [N, H, W, C] NHWC; MaxPool2d(2, stride=2) then ReLU.
    # TODO(synk): fuse this (and im2col) into the preceding conv GEMM epilogue to
    # avoid the 4 strided XLA slices / extra launch; kept separate for robustness.
    n, h, w, c = x.shape
    hh, wh = h // 2, w // 2
    cols = hh * wh * c
    tm = min(tm, _round_up(n, 8))
    mp = _round_up(n, tm)
    sl = lambda r, s: _pad_rows(x[:, r:2 * hh:2, s:2 * wh:2, :].reshape(n, cols), mp)
    out = pl.pallas_call(
        _max4_relu_kernel,
        out_shape=jax.ShapeDtypeStruct((mp, cols), jnp.float32),
        grid=(mp // tm,),
        in_specs=[pl.BlockSpec((tm, cols), lambda i: (i, 0))] * 4,
        out_specs=pl.BlockSpec((tm, cols), lambda i: (i, 0)),
        compiler_params=_PARALLEL1,
    )(sl(0, 0), sl(0, 1), sl(1, 0), sl(1, 1))
    out = out[:n] if mp != n else out
    return out.reshape(n, hh, wh, c)


def grid_sample(img_nhwc, theta):
    # img_nhwc: [N, 28, 28, 1]; theta: [N, 6].
    n = img_nhwc.shape[0]
    img_xy = jnp.transpose(img_nhwc.reshape(n, H, W), (0, 2, 1))   # (N, W, H)
    grid_spec = pltpu.PrefetchScalarGridSpec(
        num_scalar_prefetch=1,
        grid=(n,),
        in_specs=[pl.BlockSpec((1, W, H), lambda i, th: (i, 0, 0))],
        out_specs=pl.BlockSpec((1, 1, HW), lambda i, th: (i, 0, 0)),
    )
    out = pl.pallas_call(
        _grid_sample_kernel,
        out_shape=jax.ShapeDtypeStruct((n, 1, HW), jnp.float32),
        grid_spec=grid_spec,
        compiler_params=_PARALLEL1,          # no vmem_limit override (v7x-safe)
    )(theta, img_xy)
    return out.reshape(n, H, W, 1)


def im2col(x, k):
    # x: [N, H, W, C] -> [N, Ho, Wo, k*k*C] in (kh, kw, Cin) order (matches HWIO weights).
    n, h, w, c = x.shape
    ho, wo = h - k + 1, w - k + 1
    cols = []
    for di in range(k):
        for dj in range(k):
            cols.append(x[:, di:di + ho, dj:dj + wo, :])
    return jnp.concatenate(cols, axis=-1)


# ----------------------------------------------------------------------------- model

def init_params(key):
    ks = jax.random.split(key, 12)
    rnd = lambda k, shape, s=0.1: s * jax.random.normal(k, shape, jnp.float32)

    def conv_w(k, cout, cin, ksz):
        w = rnd(k, (cout, cin, ksz, ksz))                        # PyTorch OIHW
        return jnp.transpose(w, (2, 3, 1, 0)).reshape(ksz * ksz * cin, cout)

    p = {}
    p['wl1'] = conv_w(ks[0], 8, 1, 7);   p['bl1'] = rnd(ks[1], (8,))
    p['wl2'] = conv_w(ks[2], 10, 8, 5);  p['bl2'] = rnd(ks[3], (10,))
    p['wfl1'] = rnd(ks[4], (90, 32));    p['bfl1'] = rnd(ks[5], (32,))
    # fc_loc[2]: init_mode='id' -> weight zeros, bias = identity transform
    p['wfl2'] = jnp.zeros((32, 6), jnp.float32)
    p['bfl2'] = jnp.array([1., 0., 0., 0., 1., 0.], jnp.float32)
    p['w1'] = conv_w(ks[6], 10, 1, 5);   p['b1'] = rnd(ks[7], (10,))
    p['w2'] = conv_w(ks[8], 20, 10, 5);  p['b2'] = rnd(ks[9], (20,))
    p['wfc1'] = rnd(ks[10], (640, 50));  p['bfc1'] = jnp.zeros((50,), jnp.float32)
    p['wfc2'] = rnd(ks[11], (50, 19));   p['bfc2'] = jnp.zeros((19,), jnp.float32)
    return p


def stn(x, p):
    # x: [N, 28, 28, 1] NHWC (N = stacked batch of both inputs)
    n = x.shape[0]
    # localization: Conv(1->8,k7) -> MaxPool2 -> ReLU -> Conv(8->10,k5) -> MaxPool2 -> ReLU
    h = matmul_bias(im2col(x, 7).reshape(n * 22 * 22, 49), p['wl1'], p['bl1'])
    h = maxpool2_relu(h.reshape(n, 22, 22, 8))                   # [N,11,11,8]
    h = matmul_bias(im2col(h, 5).reshape(n * 7 * 7, 200), p['wl2'], p['bl2'])
    h = maxpool2_relu(h.reshape(n, 7, 7, 10))                    # [N,3,3,10]
    xs = jnp.transpose(h, (0, 3, 1, 2)).reshape(n, 90)           # NCHW flatten order
    # fc_loc: Linear(90,32) -> ReLU -> Linear(32,6), fused single kernel
    theta = mlp2(xs, p['wfl1'], p['bfl1'], p['wfl2'], p['bfl2'], log_softmax=False)
    return grid_sample(x, theta)


def branch(x, p):
    n = x.shape[0]
    h = matmul_bias(im2col(x, 5).reshape(n * 24 * 24, 25), p['w1'], p['b1'])
    h = maxpool2_relu(h.reshape(n, 24, 24, 10))                  # [N,12,12,10]
    h = matmul_bias(im2col(h, 5).reshape(n * 8 * 8, 250), p['w2'], p['b2'])
    # conv2_drop (Dropout2d): identity in eval mode
    h = maxpool2_relu(h.reshape(n, 8, 8, 20))                    # [N,4,4,20]
    return jnp.transpose(h, (0, 3, 1, 2)).reshape(n, 320)        # NCHW flatten order


@jax.jit
def forward(x1_nhwc, x2_nhwc, p):
    b = x1_nhwc.shape[0]
    # stack x1/x2 along batch so the shared STN + conv-branch path runs once
    x = jnp.concatenate([x1_nhwc, x2_nhwc], axis=0)              # [2B,28,28,1]
    xt = stn(x, p)
    feat = branch(xt, p)                                         # [2B,320]
    f = jnp.concatenate([feat[:b], feat[b:]], axis=1)            # [B,640]
    # fc1 -> ReLU -> (dropout: identity, eval) -> fc2 -> log_softmax, fused
    return mlp2(f, p['wfc1'], p['bfc1'], p['wfc2'], p['bfc2'], log_softmax=True)


if __name__ == "__main__":
    key = jax.random.PRNGKey(0)
    k1, k2, kp = jax.random.split(key, 3)
    B = 2
    # inputs in PyTorch NCHW convention, like the module expects
    x1 = jax.random.normal(k1, (B, 1, H, W), jnp.float32)
    x2 = jax.random.normal(k2, (B, 1, H, W), jnp.float32)
    params = init_params(kp)

    x1_nhwc = jnp.transpose(x1, (0, 2, 3, 1))
    x2_nhwc = jnp.transpose(x2, (0, 2, 3, 1))

    out = jax.block_until_ready(forward(x1_nhwc, x2_nhwc, params))
    assert out.shape == (B, 19) and out.dtype == jnp.float32
    # log_softmax rows must exponentiate-sum to 1
    assert float(jnp.max(jnp.abs(jnp.sum(jnp.exp(out), axis=1) - 1.0))) < 1e-3

    # sanity: identity theta (what fc_loc produces with zero weight / id bias)
    # makes grid_sample reproduce its input (align_corners=False, border).
    ident = jnp.tile(jnp.array([[1., 0., 0., 0., 1., 0.]], jnp.float32), (2 * B, 1))
    x_all = jnp.concatenate([x1_nhwc, x2_nhwc], axis=0)
    xt = jax.block_until_ready(grid_sample(x_all, ident))
    assert float(jnp.max(jnp.abs(xt - x_all))) < 1e-3

    print("KERNEL_OK")
</pallas_src>

<mosaic_0001>
module attributes {stable_mosaic.version = 11 : i64} {
  func.func @_matmul_bias_kernel(%arg0: i32, %arg1: memref<512x49xf32, #tpu.memory_space<vmem>>, %arg2: memref<49x8xf32, #tpu.memory_space<vmem>>, %arg3: memref<1x8xf32, #tpu.memory_space<vmem>>, %arg4: memref<512x8xf32, #tpu.memory_space<vmem>>) attributes {dimension_semantics = [#tpu.dimension_semantics<parallel>], iteration_bounds = array<i64: 4>, scalar_prefetch = 0 : i64, scratch_operands = 0 : i64, tpu.core_type = #tpu.core_type<tc>, window_params = [{transform_indices = @transform_0, window_bounds = array<i64: 512, 49>}, {pipeline_mode = #tpu.pipeline_mode<synchronous>, transform_indices = @transform_1, window_bounds = array<i64: 49, 8>}, {pipeline_mode = #tpu.pipeline_mode<synchronous>, transform_indices = @transform_2, window_bounds = array<i64: 1, 8>}, {transform_indices = @transform_3, window_bounds = array<i64: 512, 8>}]} {
    %c0 = arith.constant 0 : index
    %c0_0 = arith.constant 0 : index
    %0 = vector.load %arg1[%c0, %c0_0] : memref<512x49xf32, #tpu.memory_space<vmem>>, vector<512x49xf32>
    %c0_1 = arith.constant 0 : index
    %c0_2 = arith.constant 0 : index
    %1 = vector.load %arg2[%c0_1, %c0_2] : memref<49x8xf32, #tpu.memory_space<vmem>>, vector<49x8xf32>
    %cst = arith.constant dense<0.000000e+00> : vector<512x8xf32>
    %2 = tpu.matmul %0, %1, %cst {dimension_numbers = #tpu.dot_dimension_numbers<[1], [0], [0], [1], [0, 0, 1, 1], [], []>} : vector<512x49xf32>, vector<49x8xf32>, vector<512x8xf32> -> vector<512x8xf32>
    %c0_3 = arith.constant 0 : index
    %c0_4 = arith.constant 0 : index
    %3 = vector.load %arg3[%c0_3, %c0_4] : memref<1x8xf32, #tpu.memory_space<vmem>>, vector<1x8xf32>
    %4 = vector.broadcast %3 : vector<1x8xf32> to vector<512x8xf32>
    %5 = arith.addf %2, %4 : vector<512x8xf32>
    %c0_5 = arith.constant 0 : index
    %c0_6 = arith.constant 0 : index
    %6 = vector.load %arg4[%c0_5, %c0_6] : memref<512x8xf32, #tpu.memory_space<vmem>>, vector<512x8xf32>
    tpu.vector_store %arg4[%c0_5, %c0_6], %5 {strides = array<i32>} : memref<512x8xf32, #tpu.memory_space<vmem>>, vector<512x8xf32>,
    return
  }
  func.func @transform_0(%arg0: i32) -> (i32, i32) {
    %c0_i32 = arith.constant 0 : i32
    %c0_i32_0 = arith.constant 0 : i32
    return %arg0, %c0_i32 : i32, i32
  }
  func.func @transform_1(%arg0: i32) -> (i32, i32) {
    %c0_i32 = arith.constant 0 : i32
    %c0_i32_0 = arith.constant 0 : i32
    %c0_i32_1 = arith.constant 0 : i32
    return %c0_i32, %c0_i32_0 : i32, i32
  }
  func.func @transform_2(%arg0: i32) -> (i32, i32) {
    %c0_i32 = arith.constant 0 : i32
    %c0_i32_0 = arith.constant 0 : i32
    %c0_i32_1 = arith.constant 0 : i32
    return %c0_i32, %c0_i32_0 : i32, i32
  }
  func.func @transform_3(%arg0: i32) -> (i32, i32) {
    %c0_i32 = arith.constant 0 : i32
    %c0_i32_0 = arith.constant 0 : i32
    return %arg0, %c0_i32 : i32, i32
  }
}

module attributes {stable_mosaic.version = 11 : i64} {
  func.func @_max4_relu_kernel(%arg0: i32, %arg1: memref<8x968xf32, #tpu.memory_space<vmem>>, %arg2: memref<8x968xf32, #tpu.memory_space<vmem>>, %arg3: memref<8x968xf32, #tpu.memory_space<vmem>>, %arg4: memref<8x968xf32, #tpu.memory_space<vmem>>, %arg5: memref<8x968xf32, #tpu.memory_space<vmem>>) attributes {dimension_semantics = [#tpu.dimension_semantics<parallel>], iteration_bounds = array<i64: 1>, scalar_prefetch = 0 : i64, scratch_operands = 0 : i64, tpu.core_type = #tpu.core_type<tc>, window_params = [{transform_indices = @transform_0, window_bounds = array<i64: 8, 968>}, {transform_indices = @transform_1, window_bounds = array<i64: 8, 968>}, {transform_indices = @transform_2, window_bounds = array<i64: 8, 968>}, {transform_indices = @transform_3, window_bounds = array<i64: 8, 968>}, {transform_indices = @transform_4, window_bounds = array<i64: 8, 968>}]} {
    %c0 = arith.constant 0 : index
    %c0_0 = arith.constant 0 : index
    %0 = vector.load %arg1[%c0, %c0_0] : memref<8x968xf32, #tpu.memory_space<vmem>>, vector<8x968xf32>
    %c0_1 = arith.constant 0 : index
    %c0_2 = arith.constant 0 : index
    %1 = vector.load %arg2[%c0_1, %c0_2] : memref<8x968xf32, #tpu.memory_space<vmem>>, vector<8x968xf32>
    %2 = arith.maximumf %0, %1 : vector<8x968xf32>
    %c0_3 = arith.constant 0 : index
    %c0_4 = arith.constant 0 : index
    %3 = vector.load %arg3[%c0_3, %c0_4] : memref<8x968xf32, #tpu.memory_space<vmem>>, vector<8x968xf32>
    %c0_5 = arith.constant 0 : index
    %c0_6 = arith.constant 0 : index
    %4 = vector.load %arg4[%c0_5, %c0_6] : memref<8x968xf32, #tpu.memory_space<vmem>>, vector<8x968xf32>
    %5 = arith.maximumf %3, %4 : vector<8x968xf32>
    %6 = arith.maximumf %2, %5 : vector<8x968xf32>
    %cst = arith.constant 0.000000e+00 : f32
    %7 = vector.broadcast %cst : f32 to vector<8x968xf32>
    %8 = arith.maximumf %6, %7 : vector<8x968xf32>
    %c0_7 = arith.constant 0 : index
    %c0_8 = arith.constant 0 : index
    %9 = vector.load %arg5[%c0_7, %c0_8] : memref<8x968xf32, #tpu.memory_space<vmem>>, vector<8x968xf32>
    tpu.vector_store %arg5[%c0_7, %c0_8], %8 {strides = array<i32>} : memref<8x968xf32, #tpu.memory_space<vmem>>, vector<8x968xf32>,
    return
  }
  func.func @transform_0(%arg0: i32) -> (i32, i32) {
    %c0_i32 = arith.constant 0 : i32
    %c0_i32_0 = arith.constant 0 : i32
    return %arg0, %c0_i32 : i32, i32
  }
  func.func @transform_1(%arg0: i32) -> (i32, i32) {
    %c0_i32 = arith.constant 0 : i32
    %c0_i32_0 = arith.constant 0 : i32
    return %arg0, %c0_i32 : i32, i32
  }
  func.func @transform_2(%arg0: i32) -> (i32, i32) {
    %c0_i32 = arith.constant 0 : i32
    %c0_i32_0 = arith.constant 0 : i32
    return %arg0, %c0_i32 : i32, i32
  }
  func.func @transform_3(%arg0: i32) -> (i32, i32) {
    %c0_i32 = arith.constant 0 : i32
    %c0_i32_0 = arith.constant 0 : i32
    return %arg0, %c0_i32 : i32, i32
  }
  func.func @transform_4(%arg0: i32) -> (i32, i32) {
    %c0_i32 = arith.constant 0 : i32
    %c0_i32_0 = arith.constant 0 : i32
    return %arg0, %c0_i32 : i32, i32
  }
}

module attributes {stable_mosaic.version = 11 : i64} {
  func.func @_matmul_bias_kernel(%arg0: i32, %arg1: memref<200x200xf32, #tpu.memory_space<vmem>>, %arg2: memref<200x10xf32, #tpu.memory_space<vmem>>, %arg3: memref<1x10xf32, #tpu.memory_space<vmem>>, %arg4: memref<200x10xf32, #tpu.memory_space<vmem>>) attributes {dimension_semantics = [#tpu.dimension_semantics<parallel>], iteration_bounds = array<i64: 1>, scalar_prefetch = 0 : i64, scratch_operands = 0 : i64, tpu.core_type = #tpu.core_type<tc>, window_params = [{transform_indices = @transform_0, window_bounds = array<i64: 200, 200>}, {pipeline_mode = #tpu.pipeline_mode<synchronous>, transform_indices = @transform_1, window_bounds = array<i64: 200, 10>}, {pipeline_mode = #tpu.pipeline_mode<synchronous>, transform_indices = @transform_2, window_bounds = array<i64: 1, 10>}, {transform_indices = @transform_3, window_bounds = array<i64: 200, 10>}]} {
    %c0 = arith.constant 0 : index
    %c0_0 = arith.constant 0 : index
    %0 = vector.load %arg1[%c0, %c0_0] : memref<200x200xf32, #tpu.memory_space<vmem>>, vector<200x200xf32>
    %c0_1 = arith.constant 0 : index
    %c0_2 = arith.constant 0 : index
    %1 = vector.load %arg2[%c0_1, %c0_2] : memref<200x10xf32, #tpu.memory_space<vmem>>, vector<200x10xf32>
    %cst = arith.constant dense<0.000000e+00> : vector<200x10xf32>
    %2 = tpu.matmul %0, %1, %cst {dimension_numbers = #tpu.dot_dimension_numbers<[1], [0], [0], [1], [0, 0, 1, 1], [], []>} : vector<200x200xf32>, vector<200x10xf32>, vector<200x10xf32> -> vector<200x10xf32>
    %c0_3 = arith.constant 0 : index
    %c0_4 = arith.constant 0 : index
    %3 = vector.load %arg3[%c0_3, %c0_4] : memref<1x10xf32, #tpu.memory_space<vmem>>, vector<1x10xf32>
    %4 = vector.broadcast %3 : vector<1x10xf32> to vector<200x10xf32>
    %5 = arith.addf %2, %4 : vector<200x10xf32>
    %c0_5 = arith.constant 0 : index
    %c0_6 = arith.constant 0 : index
    %6 = vector.load %arg4[%c0_5, %c0_6] : memref<200x10xf32, #tpu.memory_space<vmem>>, vector<200x10xf32>
    tpu.vector_store %arg4[%c0_5, %c0_6], %5 {strides = array<i32>} : memref<200x10xf32, #tpu.memory_space<vmem>>, vector<200x10xf32>,
    return
  }
  func.func @transform_0(%arg0: i32) -> (i32, i32) {
    %c0_i32 = arith.constant 0 : i32
    %c0_i32_0 = arith.constant 0 : i32
    return %arg0, %c0_i32 : i32, i32
  }
  func.func @transform_1(%arg0: i32) -> (i32, i32) {
    %c0_i32 = arith.constant 0 : i32
    %c0_i32_0 = arith.constant 0 : i32
    %c0_i32_1 = arith.constant 0 : i32
    return %c0_i32, %c0_i32_0 : i32, i32
  }
  func.func @transform_2(%arg0: i32) -> (i32, i32) {
    %c0_i32 = arith.constant 0 : i32
    %c0_i32_0 = arith.constant 0 : i32
    %c0_i32_1 = arith.constant 0 : i32
    return %c0_i32, %c0_i32_0 : i32, i32
  }
  func.func @transform_3(%arg0: i32) -> (i32, i32) {
    %c0_i32 = arith.constant 0 : i32
    %c0_i32_0 = arith.constant 0 : i32
    return %arg0, %c0_i32 : i32, i32
  }
}

module attributes {stable_mosaic.version = 11 : i64} {
  func.func @_max4_relu_kernel(%arg0: i32, %arg1: memref<8x90xf32, #tpu.memory_space<vmem>>, %arg2: memref<8x90xf32, #tpu.memory_space<vmem>>, %arg3: memref<8x90xf32, #tpu.memory_space<vmem>>, %arg4: memref<8x90xf32, #tpu.memory_space<vmem>>, %arg5: memref<8x90xf32, #tpu.memory_space<vmem>>) attributes {dimension_semantics = [#tpu.dimension_semantics<parallel>], iteration_bounds = array<i64: 1>, scalar_prefetch = 0 : i64, scratch_operands = 0 : i64, tpu.core_type = #tpu.core_type<tc>, window_params = [{transform_indices = @transform_0, window_bounds = array<i64: 8, 90>}, {transform_indices = @transform_1, window_bounds = array<i64: 8, 90>}, {transform_indices = @transform_2, window_bounds = array<i64: 8, 90>}, {transform_indices = @transform_3, window_bounds = array<i64: 8, 90>}, {transform_indices = @transform_4, window_bounds = array<i64: 8, 90>}]} {
    %c0 = arith.constant 0 : index
    %c0_0 = arith.constant 0 : index
    %0 = vector.load %arg1[%c0, %c0_0] : memref<8x90xf32, #tpu.memory_space<vmem>>, vector<8x90xf32>
    %c0_1 = arith.constant 0 : index
    %c0_2 = arith.constant 0 : index
    %1 = vector.load %arg2[%c0_1, %c0_2] : memref<8x90xf32, #tpu.memory_space<vmem>>, vector<8x90xf32>
    %2 = arith.maximumf %0, %1 : vector<8x90xf32>
    %c0_3 = arith.constant 0 : index
    %c0_4 = arith.constant 0 : index
    %3 = vector.load %arg3[%c0_3, %c0_4] : memref<8x90xf32, #tpu.memory_space<vmem>>, vector<8x90xf32>
    %c0_5 = arith.constant 0 : index
    %c0_6 = arith.constant 0 : index
    %4 = vector.load %arg4[%c0_5, %c0_6] : memref<8x90xf32, #tpu.memory_space<vmem>>, vector<8x90xf32>
    %5 = arith.maximumf %3, %4 : vector<8x90xf32>
    %6 = arith.maximumf %2, %5 : vector<8x90xf32>
    %cst = arith.constant 0.000000e+00 : f32
    %7 = vector.broadcast %cst : f32 to vector<8x90xf32>
    %8 = arith.maximumf %6, %7 : vector<8x90xf32>
    %c0_7 = arith.constant 0 : index
    %c0_8 = arith.constant 0 : index
    %9 = vector.load %arg5[%c0_7, %c0_8] : memref<8x90xf32, #tpu.memory_space<vmem>>, vector<8x90xf32>
    tpu.vector_store %arg5[%c0_7, %c0_8], %8 {strides = array<i32>} : memref<8x90xf32, #tpu.memory_space<vmem>>, vector<8x90xf32>,
    return
  }
  func.func @transform_0(%arg0: i32) -> (i32, i32) {
    %c0_i32 = arith.constant 0 : i32
    %c0_i32_0 = arith.constant 0 : i32
    return %arg0, %c0_i32 : i32, i32
  }
  func.func @transform_1(%arg0: i32) -> (i32, i32) {
    %c0_i32 = arith.constant 0 : i32
    %c0_i32_0 = arith.constant 0 : i32
    return %arg0, %c0_i32 : i32, i32
  }
  func.func @transform_2(%arg0: i32) -> (i32, i32) {
    %c0_i32 = arith.constant 0 : i32
    %c0_i32_0 = arith.constant 0 : i32
    return %arg0, %c0_i32 : i32, i32
  }
  func.func @transform_3(%arg0: i32) -> (i32, i32) {
    %c0_i32 = arith.constant 0 : i32
    %c0_i32_0 = arith.constant 0 : i32
    return %arg0, %c0_i32 : i32, i32
  }
  func.func @transform_4(%arg0: i32) -> (i32, i32) {
    %c0_i32 = arith.constant 0 : i32
    %c0_i32_0 = arith.constant 0 : i32
    return %arg0, %c0_i32 : i32, i32
  }
}

module attributes {stable_mosaic.version = 11 : i64} {
  func.func @_mlp2_kernel(%arg0: i32, %arg1: memref<8x90xf32, #tpu.memory_space<vmem>>, %arg2: memref<90x32xf32, #tpu.memory_space<vmem>>, %arg3: memref<1x32xf32, #tpu.memory_space<vmem>>, %arg4: memref<32x6xf32, #tpu.memory_space<vmem>>, %arg5: memref<1x6xf32, #tpu.memory_space<vmem>>, %arg6: memref<8x6xf32, #tpu.memory_space<vmem>>) attributes {dimension_semantics = [#tpu.dimension_semantics<parallel>], iteration_bounds = array<i64: 1>, scalar_prefetch = 0 : i64, scratch_operands = 0 : i64, tpu.core_type = #tpu.core_type<tc>, window_params = [{transform_indices = @transform_0, window_bounds = array<i64: 8, 90>}, {pipeline_mode = #tpu.pipeline_mode<synchronous>, transform_indices = @transform_1, window_bounds = array<i64: 90, 32>}, {pipeline_mode = #tpu.pipeline_mode<synchronous>, transform_indices = @transform_2, window_bounds = array<i64: 1, 32>}, {pipeline_mode = #tpu.pipeline_mode<synchronous>, transform_indices = @transform_3, window_bounds = array<i64: 32, 6>}, {pipeline_mode = #tpu.pipeline_mode<synchronous>, transform_indices = @transform_4, window_bounds = array<i64: 1, 6>}, {transform_indices = @transform_5, window_bounds = array<i64: 8, 6>}]} {
    %c0 = arith.constant 0 : index
    %c0_0 = arith.constant 0 : index
    %0 = vector.load %arg1[%c0, %c0_0] : memref<8x90xf32, #tpu.memory_space<vmem>>, vector<8x90xf32>
    %c0_1 = arith.constant 0 : index
    %c0_2 = arith.constant 0 : index
    %1 = vector.load %arg2[%c0_1, %c0_2] : memref<90x32xf32, #tpu.memory_space<vmem>>, vector<90x32xf32>
    %cst = arith.constant dense<0.000000e+00> : vector<8x32xf32>
    %2 = tpu.matmul %0, %1, %cst {dimension_numbers = #tpu.dot_dimension_numbers<[1], [0], [0], [1], [0, 0, 1, 1], [], []>} : vector<8x90xf32>, vector<90x32xf32>, vector<8x32xf32> -> vector<8x32xf32>
    %c0_3 = arith.constant 0 : index
    %c0_4 = arith.constant 0 : index
    %3 = vector.load %arg3[%c0_3, %c0_4] : memref<1x32xf32, #tpu.memory_space<vmem>>, vector<1x32xf32>
    %4 = vector.broadcast %3 : vector<1x32xf32> to vector<8x32xf32>
    %5 = arith.addf %2, %4 : vector<8x32xf32>
    %cst_5 = arith.constant 0.000000e+00 : f32
    %6 = vector.broadcast %cst_5 : f32 to vector<8x32xf32>
    %7 = arith.maximumf %5, %6 : vector<8x32xf32>
    %c0_6 = arith.constant 0 : index
    %c0_7 = arith.constant 0 : index
    %8 = vector.load %arg4[%c0_6, %c0_7] : memref<32x6xf32, #tpu.memory_space<vmem>>, vector<32x6xf32>
    %cst_8 = arith.constant dense<0.000000e+00> : vector<8x6xf32>
    %9 = tpu.matmul %7, %8, %cst_8 {dimension_numbers = #tpu.dot_dimension_numbers<[1], [0], [0], [1], [0, 0, 1, 1], [], []>} : vector<8x32xf32>, vector<32x6xf32>, vector<8x6xf32> -> vector<8x6xf32>
    %c0_9 = arith.constant 0 : index
    %c0_10 = arith.constant 0 : index
    %10 = vector.load %arg5[%c0_9, %c0_10] : memref<1x6xf32, #tpu.memory_space<vmem>>, vector<1x6xf32>
    %11 = vector.broadcast %10 : vector<1x6xf32> to vector<8x6xf32>
    %12 = arith.addf %9, %11 : vector<8x6xf32>
    %c0_11 = arith.constant 0 : index
    %c0_12 = arith.constant 0 : index
    %13 = vector.load %arg6[%c0_11, %c0_12] : memref<8x6xf32, #tpu.memory_space<vmem>>, vector<8x6xf32>
    tpu.vector_store %arg6[%c0_11, %c0_12], %12 {strides = array<i32>} : memref<8x6xf32, #tpu.memory_space<vmem>>, vector<8x6xf32>,
    return
  }
  func.func @transform_0(%arg0: i32) -> (i32, i32) {
    %c0_i32 = arith.constant 0 : i32
    %c0_i32_0 = arith.constant 0 : i32
    return %arg0, %c0_i32 : i32, i32
  }
  func.func @transform_1(%arg0: i32) -> (i32, i32) {
    %c0_i32 = arith.constant 0 : i32
    %c0_i32_0 = arith.constant 0 : i32
    %c0_i32_1 = arith.constant 0 : i32
    return %c0_i32, %c0_i32_0 : i32, i32
  }
  func.func @transform_2(%arg0: i32) -> (i32, i32) {
    %c0_i32 = arith.constant 0 : i32
    %c0_i32_0 = arith.constant 0 : i32
    %c0_i32_1 = arith.constant 0 : i32
    return %c0_i32, %c0_i32_0 : i32, i32
  }
  func.func @transform_3(%arg0: i32) -> (i32, i32) {
    %c0_i32 = arith.constant 0 : i32
    %c0_i32_0 = arith.constant 0 : i32
    %c0_i32_1 = arith.constant 0 : i32
    return %c0_i32, %c0_i32_0 : i32, i32
  }
  func.func @transform_4(%arg0: i32) -> (i32, i32) {
    %c0_i32 = arith.constant 0 : i32
    %c0_i32_0 = arith.constant 0 : i32
    %c0_i32_1 = arith.constant 0 : i32
    return %c0_i32, %c0_i32_0 : i32, i32
  }
  func.func @transform_5(%arg0: i32) -> (i32, i32) {
    %c0_i32 = arith.constant 0 : i32
    %c0_i32_0 = arith.constant 0 : i32
    return %arg0, %c0_i32 : i32, i32
  }
}

module attributes {stable_mosaic.version = 11 : i64} {
  func.func @_grid_sample_kernel(%arg0: i32, %arg1: memref<4x6xf32, #tpu.memory_space<smem>>, %arg2: memref<1x28x28xf32, #tpu.memory_space<vmem>>, %arg3: memref<1x1x784xf32, #tpu.memory_space<vmem>>) attributes {dimension_semantics = [#tpu.dimension_semantics<parallel>], iteration_bounds = array<i64: 4>, scalar_prefetch = 1 : i64, scratch_operands = 0 : i64, tpu.core_type = #tpu.core_type<tc>, window_params = [{transform_indices = @transform_0, window_bounds = array<i64: 1, 28, 28>}, {transform_indices = @transform_1, window_bounds = array<i64: 1, 1, 784>}]} {
    %0 = arith.index_cast %arg0 : i32 to index
    %c0 = arith.constant 0 : index
    %1 = memref.load %arg1[%0, %c0] : memref<4x6xf32, #tpu.memory_space<smem>>
    %2 = arith.index_cast %arg0 : i32 to index
    %c1 = arith.constant 1 : index
    %3 = memref.load %arg1[%2, %c1] : memref<4x6xf32, #tpu.memory_space<smem>>
    %4 = arith.index_cast %arg0 : i32 to index
    %c2 = arith.constant 2 : index
    %5 = memref.load %arg1[%4, %c2] : memref<4x6xf32, #tpu.memory_space<smem>>
    %6 = arith.index_cast %arg0 : i32 to index
    %c3 = arith.constant 3 : index
    %7 = memref.load %arg1[%6, %c3] : memref<4x6xf32, #tpu.memory_space<smem>>
    %8 = arith.index_cast %arg0 : i32 to index
    %c4 = arith.constant 4 : index
    %9 = memref.load %arg1[%8, %c4] : memref<4x6xf32, #tpu.memory_space<smem>>
    %10 = arith.index_cast %arg0 : i32 to index
    %c5 = arith.constant 5 : index
    %11 = memref.load %arg1[%10, %c5] : memref<4x6xf32, #tpu.memory_space<smem>>
    %12 = tpu.iota {dimensions = array<i32: 1>} : vector<1x784xi32>
    %13 = arith.sitofp %12 : vector<1x784xi32> to vector<1x784xf32>
    %cst = arith.constant 2.800000e+01 : f32
    %14 = vector.broadcast %cst : f32 to vector<1x784xf32>
    %15 = arith.divf %13, %14 : vector<1x784xf32>
    %16 = math.floor %15 : vector<1x784xf32>
    %cst_0 = arith.constant 2.800000e+01 : f32
    %17 = vector.broadcast %cst_0 : f32 to vector<1x784xf32>
    %18 = arith.mulf %16, %17 : vector<1x784xf32>
    %19 = arith.subf %13, %18 : vector<1x784xf32>
    %cst_1 = arith.constant 2.000000e+00 : f32
    %20 = vector.broadcast %cst_1 : f32 to vector<1x784xf32>
    %21 = arith.mulf %20, %19 : vector<1x784xf32>
    %cst_2 = arith.constant 1.000000e+00 : f32
    %22 = vector.broadcast %cst_2 : f32 to vector<1x784xf32>
    %23 = arith.addf %21, %22 : vector<1x784xf32>
    %cst_3 = arith.constant 2.800000e+01 : f32
    %24 = vector.broadcast %cst_3 : f32 to vector<1x784xf32>
    %25 = arith.divf %23, %24 : vector<1x784xf32>
    %cst_4 = arith.constant 1.000000e+00 : f32
    %26 = vector.broadcast %cst_4 : f32 to vector<1x784xf32>
    %27 = arith.subf %25, %26 : vector<1x784xf32>
    %cst_5 = arith.constant 2.000000e+00 : f32
    %28 = vector.broadcast %cst_5 : f32 to vector<1x784xf32>
    %29 = arith.mulf %28, %16 : vector<1x784xf32>
    %cst_6 = arith.constant 1.000000e+00 : f32
    %30 = vector.broadcast %cst_6 : f32 to vector<1x784xf32>
    %31 = arith.addf %29, %30 : vector<1x784xf32>
    %cst_7 = arith.constant 2.800000e+01 : f32
    %32 = vector.broadcast %cst_7 : f32 to vector<1x784xf32>
    %33 = arith.divf %31, %32 : vector<1x784xf32>
    %cst_8 = arith.constant 1.000000e+00 : f32
    %34 = vector.broadcast %cst_8 : f32 to vector<1x784xf32>
    %35 = arith.subf %33, %34 : vector<1x784xf32>
    %36 = vector.broadcast %1 : f32 to vector<1x784xf32>
    %37 = arith.mulf %36, %27 : vector<1x784xf32>
    %38 = vector.broadcast %3 : f32 to vector<1x784xf32>
    %39 = arith.mulf %38, %35 : vector<1x784xf32>
    %40 = arith.addf %37, %39 : vector<1x784xf32>
    %41 = vector.broadcast %5 : f32 to vector<1x784xf32>
    %42 = arith.addf %40, %41 : vector<1x784xf32>
    %43 = vector.broadcast %7 : f32 to vector<1x784xf32>
    %44 = arith.mulf %43, %27 : vector<1x784xf32>
    %45 = vector.broadcast %9 : f32 to vector<1x784xf32>
    %46 = arith.mulf %45, %35 : vector<1x784xf32>
    %47 = arith.addf %44, %46 : vector<1x784xf32>
    %48 = vector.broadcast %11 : f32 to vector<1x784xf32>
    %49 = arith.addf %47, %48 : vector<1x784xf32>
    %cst_9 = arith.constant 1.000000e+00 : f32
    %50 = vector.broadcast %cst_9 : f32 to vector<1x784xf32>
    %51 = arith.addf %42, %50 : vector<1x784xf32>
    %cst_10 = arith.constant 1.400000e+01 : f32
    %52 = vector.broadcast %cst_10 : f32 to vector<1x784xf32>
    %53 = arith.mulf %51, %52 : vector<1x784xf32>
    %cst_11 = arith.constant 5.000000e-01 : f32
    %54 = vector.broadcast %cst_11 : f32 to vector<1x784xf32>
    %55 = arith.subf %53, %54 : vector<1x784xf32>
    %cst_12 = arith.constant 0.000000e+00 : f32
    %cst_13 = arith.constant 2.700000e+01 : f32
    %56 = vector.broadcast %cst_12 : f32 to vector<1x784xf32>
    %57 = arith.maximumf %56, %55 : vector<1x784xf32>
    %58 = vector.broadcast %cst_13 : f32 to vector<1x784xf32>
    %59 = arith.minimumf %58, %57 : vector<1x784xf32>
    %cst_14 = arith.constant 1.000000e+00 : f32
    %60 = vector.broadcast %cst_14 : f32 to vector<1x784xf32>
    %61 = arith.addf %49, %60 : vector<1x784xf32>
    %cst_15 = arith.constant 1.400000e+01 : f32
    %62 = vector.broadcast %cst_15 : f32 to vector<1x784xf32>
    %63 = arith.mulf %61, %62 : vector<1x784xf32>
    %cst_16 = arith.constant 5.000000e-01 : f32
    %64 = vector.broadcast %cst_16 : f32 to vector<1x784xf32>
    %65 = arith.subf %63, %64 : vector<1x784xf32>
    %cst_17 = arith.constant 0.000000e+00 : f32
    %cst_18 = arith.constant 2.700000e+01 : f32
    %66 = vector.broadcast %cst_17 : f32 to vector<1x784xf32>
    %67 = arith.maximumf %66, %65 : vector<1x784xf32>
    %68 = vector.broadcast %cst_18 : f32 to vector<1x784xf32>
    %69 = arith.minimumf %68, %67 : vector<1x784xf32>
    %70 = math.floor %59 : vector<1x784xf32>
    %71 = math.floor %69 : vector<1x784xf32>
    %72 = arith.subf %59, %70 : vector<1x784xf32>
    %cst_19 = arith.constant 1.000000e+00 : f32
    %73 = vector.broadcast %cst_19 : f32 to vector<1x784xf32>
    %74 = arith.subf %73, %72 : vector<1x784xf32>
    %75 = arith.subf %69, %71 : vector<1x784xf32>
    %cst_20 = arith.constant 1.000000e+00 : f32
    %76 = vector.broadcast %cst_20 : f32 to vector<1x784xf32>
    %77 = arith.subf %76, %75 : vector<1x784xf32>
    %78 = arith.fptosi %70 : vector<1x784xf32> to vector<1x784xi32>
    %79 = arith.fptosi %71 : vector<1x784xf32> to vector<1x784xi32>
    %c1_i32 = arith.constant 1 : i32
    %80 = vector.broadcast %c1_i32 : i32 to vector<1x784xi32>
    %81 = arith.addi %78, %80 : vector<1x784xi32>
    %c27_i32 = arith.constant 27 : i32
    %82 = vector.broadcast %c27_i32 : i32 to vector<1x784xi32>
    %83 = arith.minsi %81, %82 : vector<1x784xi32>
    %c1_i32_21 = arith.constant 1 : i32
    %84 = vector.broadcast %c1_i32_21 : i32 to vector<1x784xi32>
    %85 = arith.addi %79, %84 : vector<1x784xi32>
    %c27_i32_22 = arith.constant 27 : i32
    %86 = vector.broadcast %c27_i32_22 : i32 to vector<1x784xi32>
    %87 = arith.minsi %85, %86 : vector<1x784xi32>
    %88 = tpu.iota {dimensions = array<i32: 0>} : vector<28x784xi32>
    %89 = tpu.iota {dimensions = array<i32: 0>} : vector<28x784xi32>
    %90 = vector.broadcast %79 : vector<1x784xi32> to vector<28x784xi32>
    %91 = arith.cmpi eq, %88, %90 : vector<28x784xi32>
    %cst_23 = arith.constant 0.000000e+00 : f32
    %92 = vector.shape_cast %77 : vector<1x784xf32> to vector<1x784xf32>
    %93 = vector.broadcast %92 : vector<1x784xf32> to vector<28x784xf32>
    %94 = vector.broadcast %cst_23 : f32 to vector<28x784xf32>
    %95 = arith.select %91, %93, %94 : vector<28x784xi1>, vector<28x784xf32>
    %96 = vector.broadcast %87 : vector<1x784xi32> to vector<28x784xi32>
    %97 = arith.cmpi eq, %88, %96 : vector<28x784xi32>
    %cst_24 = arith.constant 0.000000e+00 : f32
    %98 = vector.shape_cast %75 : vector<1x784xf32> to vector<1x784xf32>
    %99 = vector.broadcast %98 : vector<1x784xf32> to vector<28x784xf32>
    %100 = vector.broadcast %cst_24 : f32 to vector<28x784xf32>
    %101 = arith.select %97, %99, %100 : vector<28x784xi1>, vector<28x784xf32>
    %102 = arith.addf %95, %101 : vector<28x784xf32>
    %103 = vector.broadcast %78 : vector<1x784xi32> to vector<28x784xi32>
    %104 = arith.cmpi eq, %89, %103 : vector<28x784xi32>
    %cst_25 = arith.constant 0.000000e+00 : f32
    %105 = vector.shape_cast %74 : vector<1x784xf32> to vector<1x784xf32>
    %106 = vector.broadcast %105 : vector<1x784xf32> to vector<28x784xf32>
    %107 = vector.broadcast %cst_25 : f32 to vector<28x784xf32>
    %108 = arith.select %104, %106, %107 : vector<28x784xi1>, vector<28x784xf32>
    %109 = vector.broadcast %83 : vector<1x784xi32> to vector<28x784xi32>
    %110 = arith.cmpi eq, %89, %109 : vector<28x784xi32>
    %cst_26 = arith.constant 0.000000e+00 : f32
    %111 = vector.shape_cast %72 : vector<1x784xf32> to vector<1x784xf32>
    %112 = vector.broadcast %111 : vector<1x784xf32> to vector<28x784xf32>
    %113 = vector.broadcast %cst_26 : f32 to vector<28x784xf32>
    %114 = arith.select %110, %112, %113 : vector<28x784xi1>, vector<28x784xf32>
    %115 = arith.addf %108, %114 : vector<28x784xf32>
    %c0_27 = arith.constant 0 : index
    %c0_28 = arith.constant 0 : index
    %c0_29 = arith.constant 0 : index
    %116 = vector.load %arg2[%c0_27, %c0_28, %c0_29] : memref<1x28x28xf32, #tpu.memory_space<vmem>>, vector<1x28x28xf32>
    %117 = vector.shape_cast %116 : vector<1x28x28xf32> to vector<28x28xf32>
    %cst_30 = arith.constant dense<0.000000e+00> : vector<28x784xf32>
    %118 = tpu.matmul %117, %102, %cst_30 {dimension_numbers = #tpu.dot_dimension_numbers<[1], [0], [0], [1], [0, 0, 1, 1], [], []>} : vector<28x28xf32>, vector<28x784xf32>, vector<28x784xf32> -> vector<28x784xf32>
    %119 = arith.mulf %118, %115 : vector<28x784xf32>
    %cst_31 = arith.constant dense<0.000000e+00> : vector<784xf32>
    %120 = vector.multi_reduction <add>, %119, %cst_31 [0] : vector<28x784xf32> to vector<784xf32>
    %121 = vector.shape_cast %120 : vector<784xf32> to vector<1x784xf32>
    %122 = vector.shape_cast %121 : vector<1x784xf32> to vector<1x1x784xf32>
    %c0_32 = arith.constant 0 : index
    %c0_33 = arith.constant 0 : index
    %c0_34 = arith.constant 0 : index
    %123 = vector.load %arg3[%c0_32, %c0_33, %c0_34] : memref<1x1x784xf32, #tpu.memory_space<vmem>>, vector<1x1x784xf32>
    tpu.vector_store %arg3[%c0_32, %c0_33, %c0_34], %122 {strides = array<i32>} : memref<1x1x784xf32, #tpu.memory_space<vmem>>, vector<1x1x784xf32>,
    return
  }
  func.func @transform_0(%arg0: i32, %arg1: memref<4x6xf32, #tpu.memory_space<smem>>) -> (i32, i32, i32) {
    %c0_i32 = arith.constant 0 : i32
    %c0_i32_0 = arith.constant 0 : i32
    %c0_i32_1 = arith.constant 0 : i32
    return %arg0, %c0_i32, %c0_i32_0 : i32, i32, i32
  }
  func.func @transform_1(%arg0: i32, %arg1: memref<4x6xf32, #tpu.memory_space<smem>>) -> (i32, i32, i32) {
    %c0_i32 = arith.constant 0 : i32
    %c0_i32_0 = arith.constant 0 : i32
    %c0_i32_1 = arith.constant 0 : i32
    return %arg0, %c0_i32, %c0_i32_0 : i32, i32, i32
  }
}

module attributes {stable_mosaic.version = 11 : i64} {
  func.func @_matmul_bias_kernel(%arg0: i32, %arg1: memref<512x25xf32, #tpu.memory_space<vmem>>, %arg2: memref<25x10xf32, #tpu.memory_space<vmem>>, %arg3: memref<1x10xf32, #tpu.memory_space<vmem>>, %arg4: memref<512x10xf32, #tpu.memory_space<vmem>>) attributes {dimension_semantics = [#tpu.dimension_semantics<parallel>], iteration_bounds = array<i64: 5>, scalar_prefetch = 0 : i64, scratch_operands = 0 : i64, tpu.core_type = #tpu.core_type<tc>, window_params = [{transform_indices = @transform_0, window_bounds = array<i64: 512, 25>}, {pipeline_mode = #tpu.pipeline_mode<synchronous>, transform_indices = @transform_1, window_bounds = array<i64: 25, 10>}, {pipeline_mode = #tpu.pipeline_mode<synchronous>, transform_indices = @transform_2, window_bounds = array<i64: 1, 10>}, {transform_indices = @transform_3, window_bounds = array<i64: 512, 10>}]} {
    %c0 = arith.constant 0 : index
    %c0_0 = arith.constant 0 : index
    %0 = vector.load %arg1[%c0, %c0_0] : memref<512x25xf32, #tpu.memory_space<vmem>>, vector<512x25xf32>
    %c0_1 = arith.constant 0 : index
    %c0_2 = arith.constant 0 : index
    %1 = vector.load %arg2[%c0_1, %c0_2] : memref<25x10xf32, #tpu.memory_space<vmem>>, vector<25x10xf32>
    %cst = arith.constant dense<0.000000e+00> : vector<512x10xf32>
    %2 = tpu.matmul %0, %1, %cst {dimension_numbers = #tpu.dot_dimension_numbers<[1], [0], [0], [1], [0, 0, 1, 1], [], []>} : vector<512x25xf32>, vector<25x10xf32>, vector<512x10xf32> -> vector<512x10xf32>
    %c0_3 = arith.constant 0 : index
    %c0_4 = arith.constant 0 : index
    %3 = vector.load %arg3[%c0_3, %c0_4] : memref<1x10xf32, #tpu.memory_space<vmem>>, vector<1x10xf32>
    %4 = vector.broadcast %3 : vector<1x10xf32> to vector<512x10xf32>
    %5 = arith.addf %2, %4 : vector<512x10xf32>
    %c0_5 = arith.constant 0 : index
    %c0_6 = arith.constant 0 : index
    %6 = vector.load %arg4[%c0_5, %c0_6] : memref<512x10xf32, #tpu.memory_space<vmem>>, vector<512x10xf32>
    tpu.vector_store %arg4[%c0_5, %c0_6], %5 {strides = array<i32>} : memref<512x10xf32, #tpu.memory_space<vmem>>, vector<512x10xf32>,
    return
  }
  func.func @transform_0(%arg0: i32) -> (i32, i32) {
    %c0_i32 = arith.constant 0 : i32
    %c0_i32_0 = arith.constant 0 : i32
    return %arg0, %c0_i32 : i32, i32
  }
  func.func @transform_1(%arg0: i32) -> (i32, i32) {
    %c0_i32 = arith.constant 0 : i32
    %c0_i32_0 = arith.constant 0 : i32
    %c0_i32_1 = arith.constant 0 : i32
    return %c0_i32, %c0_i32_0 : i32, i32
  }
  func.func @transform_2(%arg0: i32) -> (i32, i32) {
    %c0_i32 = arith.constant 0 : i32
    %c0_i32_0 = arith.constant 0 : i32
    %c0_i32_1 = arith.constant 0 : i32
    return %c0_i32, %c0_i32_0 : i32, i32
  }
  func.func @transform_3(%arg0: i32) -> (i32, i32) {
    %c0_i32 = arith.constant 0 : i32
    %c0_i32_0 = arith.constant 0 : i32
    return %arg0, %c0_i32 : i32, i32
  }
}

module attributes {stable_mosaic.version = 11 : i64} {
  func.func @_max4_relu_kernel(%arg0: i32, %arg1: memref<8x1440xf32, #tpu.memory_space<vmem>>, %arg2: memref<8x1440xf32, #tpu.memory_space<vmem>>, %arg3: memref<8x1440xf32, #tpu.memory_space<vmem>>, %arg4: memref<8x1440xf32, #tpu.memory_space<vmem>>, %arg5: memref<8x1440xf32, #tpu.memory_space<vmem>>) attributes {dimension_semantics = [#tpu.dimension_semantics<parallel>], iteration_bounds = array<i64: 1>, scalar_prefetch = 0 : i64, scratch_operands = 0 : i64, tpu.core_type = #tpu.core_type<tc>, window_params = [{transform_indices = @transform_0, window_bounds = array<i64: 8, 1440>}, {transform_indices = @transform_1, window_bounds = array<i64: 8, 1440>}, {transform_indices = @transform_2, window_bounds = array<i64: 8, 1440>}, {transform_indices = @transform_3, window_bounds = array<i64: 8, 1440>}, {transform_indices = @transform_4, window_bounds = array<i64: 8, 1440>}]} {
    %c0 = arith.constant 0 : index
    %c0_0 = arith.constant 0 : index
    %0 = vector.load %arg1[%c0, %c0_0] : memref<8x1440xf32, #tpu.memory_space<vmem>>, vector<8x1440xf32>
    %c0_1 = arith.constant 0 : index
    %c0_2 = arith.constant 0 : index
    %1 = vector.load %arg2[%c0_1, %c0_2] : memref<8x1440xf32, #tpu.memory_space<vmem>>, vector<8x1440xf32>
    %2 = arith.maximumf %0, %1 : vector<8x1440xf32>
    %c0_3 = arith.constant 0 : index
    %c0_4 = arith.constant 0 : index
    %3 = vector.load %arg3[%c0_3, %c0_4] : memref<8x1440xf32, #tpu.memory_space<vmem>>, vector<8x1440xf32>
    %c0_5 = arith.constant 0 : index
    %c0_6 = arith.constant 0 : index
    %4 = vector.load %arg4[%c0_5, %c0_6] : memref<8x1440xf32, #tpu.memory_space<vmem>>, vector<8x1440xf32>
    %5 = arith.maximumf %3, %4 : vector<8x1440xf32>
    %6 = arith.maximumf %2, %5 : vector<8x1440xf32>
    %cst = arith.constant 0.000000e+00 : f32
    %7 = vector.broadcast %cst : f32 to vector<8x1440xf32>
    %8 = arith.maximumf %6, %7 : vector<8x1440xf32>
    %c0_7 = arith.constant 0 : index
    %c0_8 = arith.constant 0 : index
    %9 = vector.load %arg5[%c0_7, %c0_8] : memref<8x1440xf32, #tpu.memory_space<vmem>>, vector<8x1440xf32>
    tpu.vector_store %arg5[%c0_7, %c0_8], %8 {strides = array<i32>} : memref<8x1440xf32, #tpu.memory_space<vmem>>, vector<8x1440xf32>,
    return
  }
  func.func @transform_0(%arg0: i32) -> (i32, i32) {
    %c0_i32 = arith.constant 0 : i32
    %c0_i32_0 = arith.constant 0 : i32
    return %arg0, %c0_i32 : i32, i32
  }
  func.func @transform_1(%arg0: i32) -> (i32, i32) {
    %c0_i32 = arith.constant 0 : i32
    %c0_i32_0 = arith.constant 0 : i32
    return %arg0, %c0_i32 : i32, i32
  }
  func.func @transform_2(%arg0: i32) -> (i32, i32) {
    %c0_i32 = arith.constant 0 : i32
    %c0_i32_0 = arith.constant 0 : i32
    return %arg0, %c0_i32 : i32, i32
  }
  func.func @transform_3(%arg0: i32) -> (i32, i32) {
    %c0_i32 = arith.constant 0 : i32
    %c0_i32_0 = arith.constant 0 : i32
    return %arg0, %c0_i32 : i32, i32
  }
  func.func @transform_4(%arg0: i32) -> (i32, i32) {
    %c0_i32 = arith.constant 0 : i32
    %c0_i32_0 = arith.constant 0 : i32
    return %arg0, %c0_i32 : i32, i32
  }
}

module attributes {stable_mosaic.version = 11 : i64} {
  func.func @_matmul_bias_kernel(%arg0: i32, %arg1: memref<256x250xf32, #tpu.memory_space<vmem>>, %arg2: memref<250x20xf32, #tpu.memory_space<vmem>>, %arg3: memref<1x20xf32, #tpu.memory_space<vmem>>, %arg4: memref<256x20xf32, #tpu.memory_space<vmem>>) attributes {dimension_semantics = [#tpu.dimension_semantics<parallel>], iteration_bounds = array<i64: 1>, scalar_prefetch = 0 : i64, scratch_operands = 0 : i64, tpu.core_type = #tpu.core_type<tc>, window_params = [{transform_indices = @transform_0, window_bounds = array<i64: 256, 250>}, {pipeline_mode = #tpu.pipeline_mode<synchronous>, transform_indices = @transform_1, window_bounds = array<i64: 250, 20>}, {pipeline_mode = #tpu.pipeline_mode<synchronous>, transform_indices = @transform_2, window_bounds = array<i64: 1, 20>}, {transform_indices = @transform_3, window_bounds = array<i64: 256, 20>}]} {
    %c0 = arith.constant 0 : index
    %c0_0 = arith.constant 0 : index
    %0 = vector.load %arg1[%c0, %c0_0] : memref<256x250xf32, #tpu.memory_space<vmem>>, vector<256x250xf32>
    %c0_1 = arith.constant 0 : index
    %c0_2 = arith.constant 0 : index
    %1 = vector.load %arg2[%c0_1, %c0_2] : memref<250x20xf32, #tpu.memory_space<vmem>>, vector<250x20xf32>
    %cst = arith.constant dense<0.000000e+00> : vector<256x20xf32>
    %2 = tpu.matmul %0, %1, %cst {dimension_numbers = #tpu.dot_dimension_numbers<[1], [0], [0], [1], [0, 0, 1, 1], [], []>} : vector<256x250xf32>, vector<250x20xf32>, vector<256x20xf32> -> vector<256x20xf32>
    %c0_3 = arith.constant 0 : index
    %c0_4 = arith.constant 0 : index
    %3 = vector.load %arg3[%c0_3, %c0_4] : memref<1x20xf32, #tpu.memory_space<vmem>>, vector<1x20xf32>
    %4 = vector.broadcast %3 : vector<1x20xf32> to vector<256x20xf32>
    %5 = arith.addf %2, %4 : vector<256x20xf32>
    %c0_5 = arith.constant 0 : index
    %c0_6 = arith.constant 0 : index
    %6 = vector.load %arg4[%c0_5, %c0_6] : memref<256x20xf32, #tpu.memory_space<vmem>>, vector<256x20xf32>
    tpu.vector_store %arg4[%c0_5, %c0_6], %5 {strides = array<i32>} : memref<256x20xf32, #tpu.memory_space<vmem>>, vector<256x20xf32>,
    return
  }
  func.func @transform_0(%arg0: i32) -> (i32, i32) {
    %c0_i32 = arith.constant 0 : i32
    %c0_i32_0 = arith.constant 0 : i32
    return %arg0, %c0_i32 : i32, i32
  }
  func.func @transform_1(%arg0: i32) -> (i32, i32) {
    %c0_i32 = arith.constant 0 : i32
    %c0_i32_0 = arith.constant 0 : i32
    %c0_i32_1 = arith.constant 0 : i32
    return %c0_i32, %c0_i32_0 : i32, i32
  }
  func.func @transform_2(%arg0: i32) -> (i32, i32) {
    %c0_i32 = arith.constant 0 : i32
    %c0_i32_0 = arith.constant 0 : i32
    %c0_i32_1 = arith.constant 0 : i32
    return %c0_i32, %c0_i32_0 : i32, i32
  }
  func.func @transform_3(%arg0: i32) -> (i32, i32) {
    %c0_i32 = arith.constant 0 : i32
    %c0_i32_0 = arith.constant 0 : i32
    return %arg0, %c0_i32 : i32, i32
  }
}

module attributes {stable_mosaic.version = 11 : i64} {
  func.func @_max4_relu_kernel(%arg0: i32, %arg1: memref<8x320xf32, #tpu.memory_space<vmem>>, %arg2: memref<8x320xf32, #tpu.memory_space<vmem>>, %arg3: memref<8x320xf32, #tpu.memory_space<vmem>>, %arg4: memref<8x320xf32, #tpu.memory_space<vmem>>, %arg5: memref<8x320xf32, #tpu.memory_space<vmem>>) attributes {dimension_semantics = [#tpu.dimension_semantics<parallel>], iteration_bounds = array<i64: 1>, scalar_prefetch = 0 : i64, scratch_operands = 0 : i64, tpu.core_type = #tpu.core_type<tc>, window_params = [{transform_indices = @transform_0, window_bounds = array<i64: 8, 320>}, {transform_indices = @transform_1, window_bounds = array<i64: 8, 320>}, {transform_indices = @transform_2, window_bounds = array<i64: 8, 320>}, {transform_indices = @transform_3, window_bounds = array<i64: 8, 320>}, {transform_indices = @transform_4, window_bounds = array<i64: 8, 320>}]} {
    %c0 = arith.constant 0 : index
    %c0_0 = arith.constant 0 : index
    %0 = vector.load %arg1[%c0, %c0_0] : memref<8x320xf32, #tpu.memory_space<vmem>>, vector<8x320xf32>
    %c0_1 = arith.constant 0 : index
    %c0_2 = arith.constant 0 : index
    %1 = vector.load %arg2[%c0_1, %c0_2] : memref<8x320xf32, #tpu.memory_space<vmem>>, vector<8x320xf32>
    %2 = arith.maximumf %0, %1 : vector<8x320xf32>
    %c0_3 = arith.constant 0 : index
    %c0_4 = arith.constant 0 : index
    %3 = vector.load %arg3[%c0_3, %c0_4] : memref<8x320xf32, #tpu.memory_space<vmem>>, vector<8x320xf32>
    %c0_5 = arith.constant 0 : index
    %c0_6 = arith.constant 0 : index
    %4 = vector.load %arg4[%c0_5, %c0_6] : memref<8x320xf32, #tpu.memory_space<vmem>>, vector<8x320xf32>
    %5 = arith.maximumf %3, %4 : vector<8x320xf32>
    %6 = arith.maximumf %2, %5 : vector<8x320xf32>
    %cst = arith.constant 0.000000e+00 : f32
    %7 = vector.broadcast %cst : f32 to vector<8x320xf32>
    %8 = arith.maximumf %6, %7 : vector<8x320xf32>
    %c0_7 = arith.constant 0 : index
    %c0_8 = arith.constant 0 : index
    %9 = vector.load %arg5[%c0_7, %c0_8] : memref<8x320xf32, #tpu.memory_space<vmem>>, vector<8x320xf32>
    tpu.vector_store %arg5[%c0_7, %c0_8], %8 {strides = array<i32>} : memref<8x320xf32, #tpu.memory_space<vmem>>, vector<8x320xf32>,
    return
  }
  func.func @transform_0(%arg0: i32) -> (i32, i32) {
    %c0_i32 = arith.constant 0 : i32
    %c0_i32_0 = arith.constant 0 : i32
    return %arg0, %c0_i32 : i32, i32
  }
  func.func @transform_1(%arg0: i32) -> (i32, i32) {
    %c0_i32 = arith.constant 0 : i32
    %c0_i32_0 = arith.constant 0 : i32
    return %arg0, %c0_i32 : i32, i32
  }
  func.func @transform_2(%arg0: i32) -> (i32, i32) {
    %c0_i32 = arith.constant 0 : i32
    %c0_i32_0 = arith.constant 0 : i32
    return %arg0, %c0_i32 : i32, i32
  }
  func.func @transform_3(%arg0: i32) -> (i32, i32) {
    %c0_i32 = arith.constant 0 : i32
    %c0_i32_0 = arith.constant 0 : i32
    return %arg0, %c0_i32 : i32, i32
  }
  func.func @transform_4(%arg0: i32) -> (i32, i32) {
    %c0_i32 = arith.constant 0 : i32
    %c0_i32_0 = arith.constant 0 : i32
    return %arg0, %c0_i32 : i32, i32
  }
}

module attributes {stable_mosaic.version = 11 : i64} {
  func.func @_mlp2_kernel(%arg0: i32, %arg1: memref<8x640xf32, #tpu.memory_space<vmem>>, %arg2: memref<640x50xf32, #tpu.memory_space<vmem>>, %arg3: memref<1x50xf32, #tpu.memory_space<vmem>>, %arg4: memref<50x19xf32, #tpu.memory_space<vmem>>, %arg5: memref<1x19xf32, #tpu.memory_space<vmem>>, %arg6: memref<8x19xf32, #tpu.memory_space<vmem>>) attributes {dimension_semantics = [#tpu.dimension_semantics<parallel>], iteration_bounds = array<i64: 1>, scalar_prefetch = 0 : i64, scratch_operands = 0 : i64, tpu.core_type = #tpu.core_type<tc>, window_params = [{transform_indices = @transform_0, window_bounds = array<i64: 8, 640>}, {pipeline_mode = #tpu.pipeline_mode<synchronous>, transform_indices = @transform_1, window_bounds = array<i64: 640, 50>}, {pipeline_mode = #tpu.pipeline_mode<synchronous>, transform_indices = @transform_2, window_bounds = array<i64: 1, 50>}, {pipeline_mode = #tpu.pipeline_mode<synchronous>, transform_indices = @transform_3, window_bounds = array<i64: 50, 19>}, {pipeline_mode = #tpu.pipeline_mode<synchronous>, transform_indices = @transform_4, window_bounds = array<i64: 1, 19>}, {transform_indices = @transform_5, window_bounds = array<i64: 8, 19>}]} {
    %c0 = arith.constant 0 : index
    %c0_0 = arith.constant 0 : index
    %0 = vector.load %arg1[%c0, %c0_0] : memref<8x640xf32, #tpu.memory_space<vmem>>, vector<8x640xf32>
    %c0_1 = arith.constant 0 : index
    %c0_2 = arith.constant 0 : index
    %1 = vector.load %arg2[%c0_1, %c0_2] : memref<640x50xf32, #tpu.memory_space<vmem>>, vector<640x50xf32>
    %cst = arith.constant dense<0.000000e+00> : vector<8x50xf32>
    %2 = tpu.matmul %0, %1, %cst {dimension_numbers = #tpu.dot_dimension_numbers<[1], [0], [0], [1], [0, 0, 1, 1], [], []>} : vector<8x640xf32>, vector<640x50xf32>, vector<8x50xf32> -> vector<8x50xf32>
    %c0_3 = arith.constant 0 : index
    %c0_4 = arith.constant 0 : index
    %3 = vector.load %arg3[%c0_3, %c0_4] : memref<1x50xf32, #tpu.memory_space<vmem>>, vector<1x50xf32>
    %4 = vector.broadcast %3 : vector<1x50xf32> to vector<8x50xf32>
    %5 = arith.addf %2, %4 : vector<8x50xf32>
    %cst_5 = arith.constant 0.000000e+00 : f32
    %6 = vector.broadcast %cst_5 : f32 to vector<8x50xf32>
    %7 = arith.maximumf %5, %6 : vector<8x50xf32>
    %c0_6 = arith.constant 0 : index
    %c0_7 = arith.constant 0 : index
    %8 = vector.load %arg4[%c0_6, %c0_7] : memref<50x19xf32, #tpu.memory_space<vmem>>, vector<50x19xf32>
    %cst_8 = arith.constant dense<0.000000e+00> : vector<8x19xf32>
    %9 = tpu.matmul %7, %8, %cst_8 {dimension_numbers = #tpu.dot_dimension_numbers<[1], [0], [0], [1], [0, 0, 1, 1], [], []>} : vector<8x50xf32>, vector<50x19xf32>, vector<8x19xf32> -> vector<8x19xf32>
    %c0_9 = arith.constant 0 : index
    %c0_10 = arith.constant 0 : index
    %10 = vector.load %arg5[%c0_9, %c0_10] : memref<1x19xf32, #tpu.memory_space<vmem>>, vector<1x19xf32>
    %11 = vector.broadcast %10 : vector<1x19xf32> to vector<8x19xf32>
    %12 = arith.addf %9, %11 : vector<8x19xf32>
    %cst_11 = arith.constant dense<0xFF800000> : vector<8xf32>
    %13 = vector.multi_reduction <maximumf>, %12, %cst_11 [1] : vector<8x19xf32> to vector<8xf32>
    %14 = vector.shape_cast %13 : vector<8xf32> to vector<8x1xf32>
    %15 = vector.broadcast %14 : vector<8x1xf32> to vector<8x19xf32>
    %16 = arith.subf %12, %15 : vector<8x19xf32>
    %17 = math.exp %16 : vector<8x19xf32>
    %18 = vector.broadcast %14 : vector<8x1xf32> to vector<8x19xf32>
    %19 = arith.subf %12, %18 : vector<8x19xf32>
    %cst_12 = arith.constant dense<0.000000e+00> : vector<8xf32>
    %20 = vector.multi_reduction <add>, %17, %cst_12 [1] : vector<8x19xf32> to vector<8xf32>
    %21 = vector.shape_cast %20 : vector<8xf32> to vector<8x1xf32>
    %22 = math.log %21 : vector<8x1xf32>
    %23 = vector.broadcast %22 : vector<8x1xf32> to vector<8x19xf32>
    %24 = arith.subf %19, %23 : vector<8x19xf32>
    %c0_13 = arith.constant 0 : index
    %c0_14 = arith.constant 0 : index
    %25 = vector.load %arg6[%c0_13, %c0_14] : memref<8x19xf32, #tpu.memory_space<vmem>>, vector<8x19xf32>
    tpu.vector_store %arg6[%c0_13, %c0_14], %24 {strides = array<i32>} : memref<8x19xf32, #tpu.memory_space<vmem>>, vector<8x19xf32>,
    return
  }
  func.func @transform_0(%arg0: i32) -> (i32, i32) {
    %c0_i32 = arith.constant 0 : i32
    %c0_i32_0 = arith.constant 0 : i32
    return %arg0, %c0_i32 : i32, i32
  }
  func.func @transform_1(%arg0: i32) -> (i32, i32) {
    %c0_i32 = arith.constant 0 : i32
    %c0_i32_0 = arith.constant 0 : i32
    %c0_i32_1 = arith.constant 0 : i32
    return %c0_i32, %c0_i32_0 : i32, i32
  }
  func.func @transform_2(%arg0: i32) -> (i32, i32) {
    %c0_i32 = arith.constant 0 : i32
    %c0_i32_0 = arith.constant 0 : i32
    %c0_i32_1 = arith.constant 0 : i32
    return %c0_i32, %c0_i32_0 : i32, i32
  }
  func.func @transform_3(%arg0: i32) -> (i32, i32) {
    %c0_i32 = arith.constant 0 : i32
    %c0_i32_0 = arith.constant 0 : i32
    %c0_i32_1 = arith.constant 0 : i32
    return %c0_i32, %c0_i32_0 : i32, i32
  }
  func.func @transform_4(%arg0: i32) -> (i32, i32) {
    %c0_i32 = arith.constant 0 : i32
    %c0_i32_0 = arith.constant 0 : i32
    %c0_i32_1 = arith.constant 0 : i32
    return %c0_i32, %c0_i32_0 : i32, i32
  }
  func.func @transform_5(%arg0: i32) -> (i32, i32) {
    %c0_i32 = arith.constant 0 : i32
    %c0_i32_0 = arith.constant 0 : i32
    return %arg0, %c0_i32 : i32, i32
  }
}

</mosaic_0001>

<bundles_post_ra>
// kernel: forward.11
= control target key start
LH: loop header
LB: loop body
LE: loop exit
PB: predicated region body
PF: predicated region fallthrough
CT: control target
= control target key end

     0   :  { %s1269_s12 = smov 0   ;;  %s1643_s0 = inlined_call_operand.vmem [shape: f32[2048,49], index: 0, kind: input, shape index: {}]   ;;  %s1644_s1 = inlined_call_operand.vmem [shape: f32[49,8], index: 1, kind: input, shape index: {}]   ;;  %s1645_s2 = inlined_call_operand.vmem [shape: f32[1,8], index: 2, kind: input, shape index: {}]   ;;  %s1646_s3 = inlined_call_operand.vmem [shape: f32[2048,8], index: 3, kind: output, shape index: {}]  }
   0x1 LB: > { %s955_s13 = sadd.s32 4294967295, %s1247_s12   ;;  %p959_p0 = scmp.ge.s32.totalorder %s1247_s12, 1  ;;  %s1247_s12 = sphi %s1269_s12, %s13_s12  }
   0x2   : > { %p138_p1 = scmp.lt.s32.totalorder %s1247_s12, 5 }
   0x4   : > { %p139_p2 = pnand %p959_p0, %p138_p1 }
   0x5   : > { %v238_v0 = vld [vmem:[%s1644_s1] sm:$0xff] (!%p139_p2)  ;;  %v239_v1 = vld [vmem:[%s1644_s1 + $0x8] sm:$0xff] (!%p139_p2)  ;;  %v240_v2 = vld [vmem:[%s1644_s1 + $0x10] sm:$0xff] (!%p139_p2)  ;;  %s960_s20 = sshll.u32 (!%p139_p2), %s955_s13, 6  ;;  %vm252_vm0 = vcmask (!%p139_p2), 400384   ;;  %vm445_vm1 = vcmask (!%p139_p2), 1040384  }
   0x6   : > { %142 = sbr.rel (%p139_p2) target bundleno = 299 (0x12b), region = 32  ;;  %v1213_v3 = vpack.c.bf16 (!%p139_p2), %v239_v1, %v238_v0  ;;  %v241_v4 = vld [vmem:[%s1644_s1 + $0x18] sm:$0xff] (!%p139_p2)  ;;  %p163_p3 = scmp.lt.s32.totalorder (!%p139_p2), %s960_s20, 255  ;;  %v242_v6 = vld [vmem:[%s1644_s1 + $0x20] sm:$0xff] (!%p139_p2)  ;;  %v243_v7 = vld [vmem:[%s1644_s1 + $0x28] sm:$0xff] (!%p139_p2)  ;;  %vm834_vm2 = vcmask (!%p139_p2), 64512  }
   0x7   : > { %v1217_v5 = vpack.c.bf16 (!%p139_p2), %v241_v4, %v240_v2  ;;  %v1221_v8 = vpack.c.bf16 (!%p139_p2), %v243_v7, %v242_v6  ;;  %v244_v11 = vld [vmem:[%s1644_s1 + $0x30] sm:$0x1] (!%p139_p2) }
   0x8   : > { %1214 = vmatprep.subr.bf16.mxu0 (!%p139_p2), %v1213_v3  ;;  %1225 = vmatprep.subr.bf16.mxu1 (!%p139_p2), %v1213_v3 }
   0x9   : > { %1216 = vmatpush3.bf16.msra.mxu0 (!%p139_p2), %v1213_v3  ;;  %1229 = vmatpush3.bf16.msra.mxu1 (!%p139_p2), %v1213_v3 }
   0xa   : > { %1218 = vmatprep.subr.bf16.mxu0 (!%p139_p2), %v1217_v5  ;;  %1226 = vmatprep.subr.bf16.mxu1 (!%p139_p2), %v1217_v5 }
   0xd   : > { %s1648_s20 = smov (!%p163_p3, %s960_s20), 255  ;;  %1220 = vmatpush3.bf16.msra.mxu0 %v1217_v5  ;;  %1230 = vmatpush3.bf16.msra.mxu1 %v1217_v5 }
   0xe   : > { %s961_s27 = sshll.u32 %s1648_s20, 3  ;;  %1222 = vmatprep.subr.bf16.mxu0 %v1221_v8  ;;  %1227 = vmatprep.subr.bf16.mxu1 %v1221_v8 }
   0xf   : > { %s1303_s30 = scalar_lea.vmem %s1643_s0, %s961_s27  ;;  %s1446_s10 = scalar_lea.vmem %s1646_s3, %s961_s27 }
  0x10   : > { %v174_v9 = vld [vmem:[%s1303_s30] sm:$0xff]  ;;  %v175_v12 = vld [vmem:[%s1303_s30 + $0x8] sm:$0xff]  ;;  %v176_v14 = vld [vmem:[%s1303_s30 + $0x10] sm:$0xff] }
  0x11   : > { %v206_v10 = vld [vmem:[%s1303_s30 + $0x100] sm:$0xff]  ;;  %1117 = vmatprep.mubr.msk.f32.mxu0 %vm252_vm0, %v174_v9  ;;  %1224 = vmatpush3.bf16.msra.mxu0 %v1221_v8  ;;  %v207_v13 = vld [vmem:[%s1303_s30 + $0x108] sm:$0xff]  ;;  %v208_v15 = vld [vmem:[%s1303_s30 + $0x110] sm:$0xff] }
  0x12   : > { %1165 = vmatprep.mubr.msk.f32.mxu1 %vm252_vm0, %v206_v10  ;;  %1231 = vmatpush3.bf16.msra.mxu1 %v1221_v8  ;;  %v177_v16 = vld [vmem:[%s1303_s30 + $0x18] sm:$0xff]  ;;  %v178_v18 = vld [vmem:[%s1303_s30 + $0x20] sm:$0xff]  ;;  %v179_v20 = vld [vmem:[%s1303_s30 + $0x28] sm:$0xff] }
  0x13   : > { %1115 = vmatprep.subr.msk.mxu0 %vm445_vm1, %v244_v11  ;;  %1228 = vmatprep.subr.msk.mxu1 %vm445_vm1, %v244_v11  ;;  %v209_v17 = vld [vmem:[%s1303_s30 + $0x118] sm:$0xff]  ;;  %v210_v19 = vld [vmem:[%s1303_s30 + $0x120] sm:$0xff]  ;;  %v211_v21 = vld [vmem:[%s1303_s30 + $0x128] sm:$0xff] }
  0x14   : > { %v180_v22 = vld [vmem:[%s1303_s30 + $0x30] sm:$0xff]  ;;  %v181_v24 = vld [vmem:[%s1303_s30 + $0x38] sm:$0xff]  ;;  %v182_v26 = vld [vmem:[%s1303_s30 + $0x40] sm:$0xff] }
  0x15   : > { %1116 = vmatpush3.msk.msra.mxu0 %vm445_vm1, %v244_v11  ;;  %v212_v23 = vld [vmem:[%s1303_s30 + $0x130] sm:$0xff]  ;;  %v213_v25 = vld [vmem:[%s1303_s30 + $0x138] sm:$0xff]  ;;  %v214_v27 = vld [vmem:[%s1303_s30 + $0x140] sm:$0xff] }
  0x16   : > { %1232 = vmatpush3.msk.msra.mxu1 %vm445_vm1, %v244_v11  ;;  %1118 = vmatmul.mubr.msk.f32.vlgmr.msra.gmra.mrb[0].mxu0 %vm252_vm0, %v175_v12  ;;  %v183_v28 = vld [vmem:[%s1303_s30 + $0x48] sm:$0xff]  ;;  %v184_v30 = vld [vmem:[%s1303_s30 + $0x50] sm:$0xff]  ;;  %v185_v32 = vld [vmem:[%s1303_s30 + $0x58] sm:$0xff] }
  0x17   : > { %1166 = vmatmul.mubr.msk.f32.vlgmr.msra.gmra.mrb[0].mxu1 %vm252_vm0, %v207_v13  ;;  %1120 = vmatprep.mubr.msk.f32.mxu0 %vm252_vm0, %v176_v14  ;;  %v215_v29 = vld [vmem:[%s1303_s30 + $0x148] sm:$0xff]  ;;  %v216_v31 = vld [vmem:[%s1303_s30 + $0x150] sm:$0xff]  ;;  %v217_v33 = vld [vmem:[%s1303_s30 + $0x158] sm:$0xff] }
  0x18   : > { %1168 = vmatprep.mubr.msk.f32.mxu1 %vm252_vm0, %v208_v15  ;;  %v186_v34 = vld [vmem:[%s1303_s30 + $0x60] sm:$0xff]  ;;  %v187_v36 = vld [vmem:[%s1303_s30 + $0x68] sm:$0xff]  ;;  %v188_v38 = vld [vmem:[%s1303_s30 + $0x70] sm:$0xff] }
  0x19   : > { %v218_v35 = vld [vmem:[%s1303_s30 + $0x160] sm:$0xff]  ;;  %v219_v37 = vld [vmem:[%s1303_s30 + $0x168] sm:$0xff]  ;;  %v220_v39 = vld [vmem:[%s1303_s30 + $0x170] sm:$0xff] }
  0x1a   : > { %1121 = vmatmul.mubr.msk.f32.gmra.mrb[2].mxu0 %vm252_vm0, %v177_v16  ;;  %v189_v40 = vld [vmem:[%s1303_s30 + $0x78] sm:$0xff]  ;;  %v190_v42 = vld [vmem:[%s1303_s30 + $0x80] sm:$0xff]  ;;  %v191_v44 = vld [vmem:[%s1303_s30 + $0x88] sm:$0xff] }
  0x1b   : > { %1169 = vmatmul.mubr.msk.f32.gmra.mrb[2].mxu1 %vm252_vm0, %v209_v17  ;;  %1123 = vmatprep.mubr.msk.f32.mxu0 %vm252_vm0, %v178_v18  ;;  %v221_v41 = vld [vmem:[%s1303_s30 + $0x178] sm:$0xff]  ;;  %v222_v43 = vld [vmem:[%s1303_s30 + $0x180] sm:$0xff]  ;;  %v223_v45 = vld [vmem:[%s1303_s30 + $0x188] sm:$0xff] }
  0x1c   : > { %1171 = vmatprep.mubr.msk.f32.mxu1 %vm252_vm0, %v210_v19  ;;  %v192_v46 = vld [vmem:[%s1303_s30 + $0x90] sm:$0xff]  ;;  %v193_v48 = vld [vmem:[%s1303_s30 + $0x98] sm:$0xff]  ;;  %v194_v50 = vld [vmem:[%s1303_s30 + $0xa0] sm:$0xff] }
  0x1d   : > { %v224_v47 = vld [vmem:[%s1303_s30 + $0x190] sm:$0xff]  ;;  %v225_v49 = vld [vmem:[%s1303_s30 + $0x198] sm:$0xff]  ;;  %v226_v51 = vld [vmem:[%s1303_s30 + $0x1a0] sm:$0xff] }
  0x1e   : > { %1124 = vmatmul.mubr.msk.f32.gmra.mrb[4].mxu0 %vm252_vm0, %v179_v20  ;;  %v195_v52 = vld [vmem:[%s1303_s30 + $0xa8] sm:$0xff]  ;;  %v196_v54 = vld [vmem:[%s1303_s30 + $0xb0] sm:$0xff]  ;;  %v197_v56 = vld [vmem:[%s1303_s30 + $0xb8] sm:$0xff] }
  0x1f   : > { %1172 = vmatmul.mubr.msk.f32.gmra.mrb[4].mxu1 %vm252_vm0, %v211_v21  ;;  %1126 = vmatprep.mubr.msk.f32.mxu0 %vm252_vm0, %v180_v22  ;;  %v227_v53 = vld [vmem:[%s1303_s30 + $0x1a8] sm:$0xff]  ;;  %v228_v55 = vld [vmem:[%s1303_s30 + $0x1b0] sm:$0xff]  ;;  %v229_v57 = vld [vmem:[%s1303_s30 + $0x1b8] sm:$0xff] }
  0x20   : > { %1174 = vmatprep.mubr.msk.f32.mxu1 %vm252_vm0, %v212_v23  ;;  %v198_v58 = vld [vmem:[%s1303_s30 + $0xc0] sm:$0xff]  ;;  %v199_v60 = vld [vmem:[%s1303_s30 + $0xc8] sm:$0xff]  ;;  %v200_v62 = vld [vmem:[%s1303_s30 + $0xd0] sm:$0xff] }
  0x21   : > { %v230_v59 = vld [vmem:[%s1303_s30 + $0x1c0] sm:$0xff]  ;;  %v231_v61 = vld [vmem:[%s1303_s30 + $0x1c8] sm:$0xff]  ;;  %v232_v63 = vld [vmem:[%s1303_s30 + $0x1d0] sm:$0xff] }
  0x22   : > { %1127 = vmatmul.mubr.msk.f32.gmra.mrb[6].mxu0 %vm252_vm0, %v181_v24  ;;  %v201_v0 = vld [vmem:[%s1303_s30 + $0xd8] sm:$0xff]  ;;  %v202_v2 = vld [vmem:[%s1303_s30 + $0xe0] sm:$0xff]  ;;  %v203_v4 = vld [vmem:[%s1303_s30 + $0xe8] sm:$0xff] }
  0x23   : > { %1175 = vmatmul.mubr.msk.f32.gmra.mrb[6].mxu1 %vm252_vm0, %v213_v25  ;;  %1129 = vmatprep.mubr.msk.f32.mxu0 %vm252_vm0, %v182_v26  ;;  %v233_v1 = vld [vmem:[%s1303_s30 + $0x1d8] sm:$0xff]  ;;  %v234_v3 = vld [vmem:[%s1303_s30 + $0x1e0] sm:$0xff]  ;;  %v235_v5 = vld [vmem:[%s1303_s30 + $0x1e8] sm:$0xff] }
  0x24   : > { %1177 = vmatprep.mubr.msk.f32.mxu1 %vm252_vm0, %v214_v27  ;;  %v204_v6 = vld [vmem:[%s1303_s30 + $0xf0] sm:$0xff]  ;;  %v205_v8 = vld [vmem:[%s1303_s30 + $0xf8] sm:$0xff]  ;;  %v1439_v10 = vld [vmem:[%s1645_s2] ss:$0 sm:$0xff] }
  0x25   : > { %v236_v7 = vld [vmem:[%s1303_s30 + $0x1f0] sm:$0xff]  ;;  %v237_v9 = vld [vmem:[%s1303_s30 + $0x1f8] sm:$0xff] }
  0x26   : > { %1130 = vmatmul.mubr.msk.f32.gmra.mrb[8].mxu0 %vm252_vm0, %v183_v28 }
  0x27   : > { %1178 = vmatmul.mubr.msk.f32.gmra.mrb[8].mxu1 %vm252_vm0, %v215_v29  ;;  %1132 = vmatprep.mubr.msk.f32.mxu0 %vm252_vm0, %v184_v30 }
  0x28   : > { %1180 = vmatprep.mubr.msk.f32.mxu1 %vm252_vm0, %v216_v31 }
  0x2a   : > { %1133 = vmatmul.mubr.msk.f32.gmra.mrb[10].mxu0 %vm252_vm0, %v185_v32 }
  0x2b   : > { %1181 = vmatmul.mubr.msk.f32.gmra.mrb[10].mxu1 %vm252_vm0, %v217_v33  ;;  %1135 = vmatprep.mubr.msk.f32.mxu0 %vm252_vm0, %v186_v34 }
  0x2c   : > { %1183 = vmatprep.mubr.msk.f32.mxu1 %vm252_vm0, %v218_v35 }
  0x2e   : > { %1136 = vmatmul.mubr.msk.f32.gmra.mrb[12].mxu0 %vm252_vm0, %v187_v36 }
  0x2f   : > { %1184 = vmatmul.mubr.msk.f32.gmra.mrb[12].mxu1 %vm252_vm0, %v219_v37  ;;  %1138 = vmatprep.mubr.msk.f32.mxu0 %vm252_vm0, %v188_v38 }
  0x30   : > { %1186 = vmatprep.mubr.msk.f32.mxu1 %vm252_vm0, %v220_v39 }
  0x32   : > { %1139 = vmatmul.mubr.msk.f32.gmra.mrb[14].mxu0 %vm252_vm0, %v189_v40 }
  0x33   : > { %1187 = vmatmul.mubr.msk.f32.gmra.mrb[14].mxu1 %vm252_vm0, %v221_v41  ;;  %1141 = vmatprep.mubr.msk.f32.mxu0 %vm252_vm0, %v190_v42 }
  0x34   : > { %1189 = vmatprep.mubr.msk.f32.mxu1 %vm252_vm0, %v222_v43 }
  0x36   : > { %1142 = vmatmul.mubr.msk.f32.gmra.mrb[16].mxu0 %vm252_vm0, %v191_v44 }
  0x37   : > { %1190 = vmatmul.mubr.msk.f32.gmra.mrb[16].mxu1 %vm252_vm0, %v223_v45  ;;  %1144 = vmatprep.mubr.msk.f32.mxu0 %vm252_vm0, %v192_v46 }
  0x38   : > { %1192 = vmatprep.mubr.msk.f32.mxu1 %vm252_vm0, %v224_v47 }
  0x3a   : > { %1145 = vmatmul.mubr.msk.f32.gmra.mrb[18].mxu0 %vm252_vm0, %v193_v48 }
  0x3b   : > { %1193 = vmatmul.mubr.msk.f32.gmra.mrb[18].mxu1 %vm252_vm0, %v225_v49  ;;  %1147 = vmatprep.mubr.msk.f32.mxu0 %vm252_vm0, %v194_v50 }
  0x3c   : > { %1195 = vmatprep.mubr.msk.f32.mxu1 %vm252_vm0, %v226_v51 }
  0x3e   : > { %1148 = vmatmul.mubr.msk.f32.gmra.mrb[20].mxu0 %vm252_vm0, %v195_v52 }
  0x3f   : > { %1196 = vmatmul.mubr.msk.f32.gmra.mrb[20].mxu1 %vm252_vm0, %v227_v53  ;;  %1150 = vmatprep.mubr.msk.f32.mxu0 %vm252_vm0, %v196_v54 }
  0x40   : > { %1198 = vmatprep.mubr.msk.f32.mxu1 %vm252_vm0, %v228_v55 }
  0x42   : > { %1151 = vmatmul.mubr.msk.f32.gmra.mrb[22].mxu0 %vm252_vm0, %v197_v56 }
  0x43   : > { %1199 = vmatmul.mubr.msk.f32.gmra.mrb[22].mxu1 %vm252_vm0, %v229_v57  ;;  %1153 = vmatprep.mubr.msk.f32.mxu0 %vm252_vm0, %v198_v58 }
  0x44   : > { %1201 = vmatprep.mubr.msk.f32.mxu1 %vm252_vm0, %v230_v59 }
  0x46   : > { %1154 = vmatmul.mubr.msk.f32.gmra.mrb[24].mxu0 %vm252_vm0, %v199_v60 }
  0x47   : > { %1202 = vmatmul.mubr.msk.f32.gmra.mrb[24].mxu1 %vm252_vm0, %v231_v61  ;;  %1156 = vmatprep.mubr.msk.f32.mxu0 %vm252_vm0, %v200_v62 }
  0x48   : > { %1204 = vmatprep.mubr.msk.f32.mxu1 %vm252_vm0, %v232_v63 }
  0x4a   : > { %1157 = vmatmul.mubr.msk.f32.gmra.mrb[26].mxu0 %vm252_vm0, %v201_v0 }
  0x4b   : > { %1205 = vmatmul.mubr.msk.f32.gmra.mrb[26].mxu1 %vm252_vm0, %v233_v1  ;;  %1159 = vmatprep.mubr.msk.f32.mxu0 %vm252_vm0, %v202_v2 }
  0x4c   : > { %1207 = vmatprep.mubr.msk.f32.mxu1 %vm252_vm0, %v234_v3 }
  0x4e   : > { %1160 = vmatmul.mubr.msk.f32.gmra.mrb[28].mxu0 %vm252_vm0, %v203_v4 }
  0x4f   : > { %1208 = vmatmul.mubr.msk.f32.gmra.mrb[28].mxu1 %vm252_vm0, %v235_v5  ;;  %1162 = vmatprep.mubr.msk.f32.mxu0 %vm252_vm0, %v204_v6 }
  0x50   : > { %1210 = vmatprep.mubr.msk.f32.mxu1 %vm252_vm0, %v236_v7 }
  0x52   : > { %1163 = vmatmul.mubr.msk.f32.gmra.mrb[30].mxu0 %vm252_vm0, %v205_v8 }
  0x53   : > { %1211 = vmatmul.mubr.msk.f32.gmra.mrb[30].mxu1 %vm252_vm0, %v237_v9 }
  0xe9   : > { %v1119_v11 = vpop.f32.mrb[0].mxu0 }
  0xea   : > { %v1167_v12 = vpop.f32.mrb[0].mxu1  ;;  %v521_v13 = vadd.f32 %v1119_v11, %v1439_v10  ;;  %v515_v15 = vpop.f32.mrb[1].mxu0 }
  0xeb   : > { %v681_v14 = vadd.f32 %v1167_v12, %v1439_v10  ;;  %v675_v16 = vpop.f32.mrb[1].mxu1  ;;  %v516_v17 = vadd.f32 %v1439_v10, %v515_v15 }
  0xec   : > { %v676_v18 = vadd.f32 %v1439_v10, %v675_v16  ;;  %836 = vst.msk [vmem:[%s1446_s10 + $0x8] sm:$0xff] %vm834_vm2, %v521_v13 }
  0xed   : > { %868 = vst.msk [vmem:[%s1446_s10 + $0x108] sm:$0xff] %vm834_vm2, %v681_v14  ;;  %835 = vst.msk [vmem:[%s1446_s10] sm:$0xff] %vm834_vm2, %v516_v17  ;;  %v1122_v19 = vpop.f32.mrb[2].mxu0 }
  0xee   : > { %867 = vst.msk [vmem:[%s1446_s10 + $0x100] sm:$0xff] %vm834_vm2, %v676_v18  ;;  %v1170_v20 = vpop.f32.mrb[2].mxu1  ;;  %v531_v21 = vadd.f32 %v1122_v19, %v1439_v10  ;;  %v525_v23 = vpop.f32.mrb[3].mxu0 }
  0xef   : > { %v691_v22 = vadd.f32 %v1170_v20, %v1439_v10  ;;  %v685_v24 = vpop.f32.mrb[3].mxu1  ;;  %v526_v25 = vadd.f32 %v1439_v10, %v525_v23 }
  0xf0   : > { %v686_v26 = vadd.f32 %v1439_v10, %v685_v24  ;;  %838 = vst.msk [vmem:[%s1446_s10 + $0x18] sm:$0xff] %vm834_vm2, %v531_v21 }
  0xf1   : > { %870 = vst.msk [vmem:[%s1446_s10 + $0x118] sm:$0xff] %vm834_vm2, %v691_v22  ;;  %837 = vst.msk [vmem:[%s1446_s10 + $0x10] sm:$0xff] %vm834_vm2, %v526_v25  ;;  %v1125_v27 = vpop.f32.mrb[4].mxu0 }
  0xf2   : > { %869 = vst.msk [vmem:[%s1446_s10 + $0x110] sm:$0xff] %vm834_vm2, %v686_v26  ;;  %v1173_v28 = vpop.f32.mrb[4].mxu1  ;;  %v541_v29 = vadd.f32 %v1125_v27, %v1439_v10  ;;  %v535_v31 = vpop.f32.mrb[5].mxu0 }
  0xf3   : > { %v701_v30 = vadd.f32 %v1173_v28, %v1439_v10  ;;  %v695_v32 = vpop.f32.mrb[5].mxu1  ;;  %v536_v33 = vadd.f32 %v1439_v10, %v535_v31 }
  0xf4   : > { %v696_v34 = vadd.f32 %v1439_v10, %v695_v32  ;;  %840 = vst.msk [vmem:[%s1446_s10 + $0x28] sm:$0xff] %vm834_vm2, %v541_v29 }
  0xf5   : > { %872 = vst.msk [vmem:[%s1446_s10 + $0x128] sm:$0xff] %vm834_vm2, %v701_v30  ;;  %839 = vst.msk [vmem:[%s1446_s10 + $0x20] sm:$0xff] %vm834_vm2, %v536_v33  ;;  %v1128_v35 = vpop.f32.mrb[6].mxu0 }
  0xf6   : > { %871 = vst.msk [vmem:[%s1446_s10 + $0x120] sm:$0xff] %vm834_vm2, %v696_v34  ;;  %v1176_v36 = vpop.f32.mrb[6].mxu1  ;;  %v551_v37 = vadd.f32 %v1128_v35, %v1439_v10  ;;  %v545_v39 = vpop.f32.mrb[7].mxu0 }
  0xf7   : > { %v711_v38 = vadd.f32 %v1176_v36, %v1439_v10  ;;  %v705_v40 = vpop.f32.mrb[7].mxu1  ;;  %v546_v41 = vadd.f32 %v1439_v10, %v545_v39 }
  0xf8   : > { %v706_v42 = vadd.f32 %v1439_v10, %v705_v40  ;;  %842 = vst.msk [vmem:[%s1446_s10 + $0x38] sm:$0xff] %vm834_vm2, %v551_v37 }
  0xf9   : > { %874 = vst.msk [vmem:[%s1446_s10 + $0x138] sm:$0xff] %vm834_vm2, %v711_v38  ;;  %841 = vst.msk [vmem:[%s1446_s10 + $0x30] sm:$0xff] %vm834_vm2, %v546_v41  ;;  %v1131_v43 = vpop.f32.mrb[8].mxu0 }
  0xfa   : > { %873 = vst.msk [vmem:[%s1446_s10 + $0x130] sm:$0xff] %vm834_vm2, %v706_v42  ;;  %v1179_v44 = vpop.f32.mrb[8].mxu1  ;;  %v561_v45 = vadd.f32 %v1131_v43, %v1439_v10  ;;  %v555_v47 = vpop.f32.mrb[9].mxu0 }
  0xfb   : > { %v721_v46 = vadd.f32 %v1179_v44, %v1439_v10  ;;  %v715_v48 = vpop.f32.mrb[9].mxu1  ;;  %v556_v49 = vadd.f32 %v1439_v10, %v555_v47 }
  0xfc   : > { %v716_v50 = vadd.f32 %v1439_v10, %v715_v48  ;;  %844 = vst.msk [vmem:[%s1446_s10 + $0x48] sm:$0xff] %vm834_vm2, %v561_v45 }
  0xfd   : > { %876 = vst.msk [vmem:[%s1446_s10 + $0x148] sm:$0xff] %vm834_vm2, %v721_v46  ;;  %843 = vst.msk [vmem:[%s1446_s10 + $0x40] sm:$0xff] %vm834_vm2, %v556_v49  ;;  %v1134_v51 = vpop.f32.mrb[10].mxu0 }
  0xfe   : > { %875 = vst.msk [vmem:[%s1446_s10 + $0x140] sm:$0xff] %vm834_vm2, %v716_v50  ;;  %v1182_v52 = vpop.f32.mrb[10].mxu1  ;;  %v571_v53 = vadd.f32 %v1134_v51, %v1439_v10  ;;  %v565_v55 = vpop.f32.mrb[11].mxu0 }
  0xff   : > { %v731_v54 = vadd.f32 %v1182_v52, %v1439_v10  ;;  %v725_v56 = vpop.f32.mrb[11].mxu1  ;;  %v566_v57 = vadd.f32 %v1439_v10, %v565_v55 }
 0x100   : > { %v726_v58 = vadd.f32 %v1439_v10, %v725_v56  ;;  %846 = vst.msk [vmem:[%s1446_s10 + $0x58] sm:$0xff] %vm834_vm2, %v571_v53 }
 0x101   : > { %878 = vst.msk [vmem:[%s1446_s10 + $0x158] sm:$0xff] %vm834_vm2, %v731_v54  ;;  %845 = vst.msk [vmem:[%s1446_s10 + $0x50] sm:$0xff] %vm834_vm2, %v566_v57  ;;  %v1137_v59 = vpop.f32.mrb[12].mxu0 }
 0x102   : > { %877 = vst.msk [vmem:[%s1446_s10 + $0x150] sm:$0xff] %vm834_vm2, %v726_v58  ;;  %v1185_v60 = vpop.f32.mrb[12].mxu1  ;;  %v581_v61 = vadd.f32 %v1137_v59, %v1439_v10  ;;  %v575_v63 = vpop.f32.mrb[13].mxu0 }
 0x103   : > { %v741_v62 = vadd.f32 %v1185_v60, %v1439_v10  ;;  %v735_v0 = vpop.f32.mrb[13].mxu1  ;;  %v576_v1 = vadd.f32 %v1439_v10, %v575_v63 }
 0x104   : > { %v736_v2 = vadd.f32 %v1439_v10, %v735_v0  ;;  %848 = vst.msk [vmem:[%s1446_s10 + $0x68] sm:$0xff] %vm834_vm2, %v581_v61 }
 0x105   : > { %880 = vst.msk [vmem:[%s1446_s10 + $0x168] sm:$0xff] %vm834_vm2, %v741_v62  ;;  %847 = vst.msk [vmem:[%s1446_s10 + $0x60] sm:$0xff] %vm834_vm2, %v576_v1  ;;  %v1140_v3 = vpop.f32.mrb[14].mxu0 }
 0x106   : > { %879 = vst.msk [vmem:[%s1446_s10 + $0x160] sm:$0xff] %vm834_vm2, %v736_v2  ;;  %v1188_v4 = vpop.f32.mrb[14].mxu1  ;;  %v591_v5 = vadd.f32 %v1140_v3, %v1439_v10  ;;  %v585_v7 = vpop.f32.mrb[15].mxu0 }
 0x107   : > { %v751_v6 = vadd.f32 %v1188_v4, %v1439_v10  ;;  %v745_v8 = vpop.f32.mrb[15].mxu1  ;;  %v586_v9 = vadd.f32 %v1439_v10, %v585_v7 }
 0x108   : > { %v746_v11 = vadd.f32 %v1439_v10, %v745_v8  ;;  %850 = vst.msk [vmem:[%s1446_s10 + $0x78] sm:$0xff] %vm834_vm2, %v591_v5 }
 0x109   : > { %882 = vst.msk [vmem:[%s1446_s10 + $0x178] sm:$0xff] %vm834_vm2, %v751_v6  ;;  %849 = vst.msk [vmem:[%s1446_s10 + $0x70] sm:$0xff] %vm834_vm2, %v586_v9  ;;  %v1143_v12 = vpop.f32.mrb[16].mxu0 }
 0x10a   : > { %881 = vst.msk [vmem:[%s1446_s10 + $0x170] sm:$0xff] %vm834_vm2, %v746_v11  ;;  %v1191_v13 = vpop.f32.mrb[16].mxu1  ;;  %v601_v14 = vadd.f32 %v1143_v12, %v1439_v10  ;;  %v595_v16 = vpop.f32.mrb[17].mxu0 }
 0x10b   : > { %v761_v15 = vadd.f32 %v1191_v13, %v1439_v10  ;;  %v755_v17 = vpop.f32.mrb[17].mxu1  ;;  %v596_v18 = vadd.f32 %v1439_v10, %v595_v16 }
 0x10c   : > { %v756_v19 = vadd.f32 %v1439_v10, %v755_v17  ;;  %852 = vst.msk [vmem:[%s1446_s10 + $0x88] sm:$0xff] %vm834_vm2, %v601_v14 }
 0x10d   : > { %884 = vst.msk [vmem:[%s1446_s10 + $0x188] sm:$0xff] %vm834_vm2, %v761_v15  ;;  %851 = vst.msk [vmem:[%s1446_s10 + $0x80] sm:$0xff] %vm834_vm2, %v596_v18  ;;  %v1146_v20 = vpop.f32.mrb[18].mxu0 }
 0x10e   : > { %883 = vst.msk [vmem:[%s1446_s10 + $0x180] sm:$0xff] %vm834_vm2, %v756_v19  ;;  %v1194_v21 = vpop.f32.mrb[18].mxu1  ;;  %v611_v22 = vadd.f32 %v1146_v20, %v1439_v10  ;;  %v605_v24 = vpop.f32.mrb[19].mxu0 }
 0x10f   : > { %v771_v23 = vadd.f32 %v1194_v21, %v1439_v10  ;;  %v765_v25 = vpop.f32.mrb[19].mxu1  ;;  %v606_v26 = vadd.f32 %v1439_v10, %v605_v24 }
 0x110   : > { %v766_v27 = vadd.f32 %v1439_v10, %v765_v25  ;;  %854 = vst.msk [vmem:[%s1446_s10 + $0x98] sm:$0xff] %vm834_vm2, %v611_v22 }
 0x111   : > { %886 = vst.msk [vmem:[%s1446_s10 + $0x198] sm:$0xff] %vm834_vm2, %v771_v23  ;;  %853 = vst.msk [vmem:[%s1446_s10 + $0x90] sm:$0xff] %vm834_vm2, %v606_v26  ;;  %v1149_v28 = vpop.f32.mrb[20].mxu0 }
 0x112   : > { %885 = vst.msk [vmem:[%s1446_s10 + $0x190] sm:$0xff] %vm834_vm2, %v766_v27  ;;  %v1197_v29 = vpop.f32.mrb[20].mxu1  ;;  %v621_v30 = vadd.f32 %v1149_v28, %v1439_v10  ;;  %v615_v32 = vpop.f32.mrb[21].mxu0 }
 0x113   : > { %v781_v31 = vadd.f32 %v1197_v29, %v1439_v10  ;;  %v775_v33 = vpop.f32.mrb[21].mxu1  ;;  %v616_v34 = vadd.f32 %v1439_v10, %v615_v32 }
 0x114   : > { %v776_v35 = vadd.f32 %v1439_v10, %v775_v33  ;;  %856 = vst.msk [vmem:[%s1446_s10 + $0xa8] sm:$0xff] %vm834_vm2, %v621_v30 }
 0x115   : > { %888 = vst.msk [vmem:[%s1446_s10 + $0x1a8] sm:$0xff] %vm834_vm2, %v781_v31  ;;  %855 = vst.msk [vmem:[%s1446_s10 + $0xa0] sm:$0xff] %vm834_vm2, %v616_v34  ;;  %v1152_v36 = vpop.f32.mrb[22].mxu0 }
 0x116   : > { %887 = vst.msk [vmem:[%s1446_s10 + $0x1a0] sm:$0xff] %vm834_vm2, %v776_v35  ;;  %v1200_v37 = vpop.f32.mrb[22].mxu1  ;;  %v631_v38 = vadd.f32 %v1152_v36, %v1439_v10  ;;  %v625_v40 = vpop.f32.mrb[23].mxu0 }
 0x117   : > { %v791_v39 = vadd.f32 %v1200_v37, %v1439_v10  ;;  %v785_v41 = vpop.f32.mrb[23].mxu1  ;;  %v626_v42 = vadd.f32 %v1439_v10, %v625_v40 }
 0x118   : > { %v786_v43 = vadd.f32 %v1439_v10, %v785_v41  ;;  %858 = vst.msk [vmem:[%s1446_s10 + $0xb8] sm:$0xff] %vm834_vm2, %v631_v38 }
 0x119   : > { %890 = vst.msk [vmem:[%s1446_s10 + $0x1b8] sm:$0xff] %vm834_vm2, %v791_v39  ;;  %857 = vst.msk [vmem:[%s1446_s10 + $0xb0] sm:$0xff] %vm834_vm2, %v626_v42  ;;  %v1155_v44 = vpop.f32.mrb[24].mxu0 }
 0x11a   : > { %889 = vst.msk [vmem:[%s1446_s10 + $0x1b0] sm:$0xff] %vm834_vm2, %v786_v43  ;;  %v1203_v45 = vpop.f32.mrb[24].mxu1  ;;  %v641_v46 = vadd.f32 %v1155_v44, %v1439_v10  ;;  %v635_v48 = vpop.f32.mrb[25].mxu0 }
 0x11b   : > { %v801_v47 = vadd.f32 %v1203_v45, %v1439_v10  ;;  %v795_v49 = vpop.f32.mrb[25].mxu1  ;;  %v636_v50 = vadd.f32 %v1439_v10, %v635_v48 }
 0x11c   : > { %v796_v51 = vadd.f32 %v1439_v10, %v795_v49  ;;  %860 = vst.msk [vmem:[%s1446_s10 + $0xc8] sm:$0xff] %vm834_vm2, %v641_v46 }
 0x11d   : > { %892 = vst.msk [vmem:[%s1446_s10 + $0x1c8] sm:$0xff] %vm834_vm2, %v801_v47  ;;  %859 = vst.msk [vmem:[%s1446_s10 + $0xc0] sm:$0xff] %vm834_vm2, %v636_v50  ;;  %v1158_v52 = vpop.f32.mrb[26].mxu0 }
 0x11e   : > { %891 = vst.msk [vmem:[%s1446_s10 + $0x1c0] sm:$0xff] %vm834_vm2, %v796_v51  ;;  %v1206_v53 = vpop.f32.mrb[26].mxu1  ;;  %v651_v54 = vadd.f32 %v1158_v52, %v1439_v10  ;;  %v645_v56 = vpop.f32.mrb[27].mxu0 }
 0x11f   : > { %v811_v55 = vadd.f32 %v1206_v53, %v1439_v10  ;;  %v805_v57 = vpop.f32.mrb[27].mxu1  ;;  %v646_v58 = vadd.f32 %v1439_v10, %v645_v56 }
 0x120   : > { %v806_v59 = vadd.f32 %v1439_v10, %v805_v57  ;;  %862 = vst.msk [vmem:[%s1446_s10 + $0xd8] sm:$0xff] %vm834_vm2, %v651_v54 }
 0x121   : > { %894 = vst.msk [vmem:[%s1446_s10 + $0x1d8] sm:$0xff] %vm834_vm2, %v811_v55  ;;  %861 = vst.msk [vmem:[%s1446_s10 + $0xd0] sm:$0xff] %vm834_vm2, %v646_v58  ;;  %v1161_v60 = vpop.f32.mrb[28].mxu0 }
 0x122   : > { %893 = vst.msk [vmem:[%s1446_s10 + $0x1d0] sm:$0xff] %vm834_vm2, %v806_v59  ;;  %v1209_v61 = vpop.f32.mrb[28].mxu1  ;;  %v661_v62 = vadd.f32 %v1161_v60, %v1439_v10  ;;  %v655_v0 = vpop.f32.mrb[29].mxu0 }
 0x123   : > { %v821_v63 = vadd.f32 %v1209_v61, %v1439_v10  ;;  %v815_v1 = vpop.f32.mrb[29].mxu1  ;;  %v656_v2 = vadd.f32 %v1439_v10, %v655_v0 }
 0x124   : > { %v816_v3 = vadd.f32 %v1439_v10, %v815_v1  ;;  %864 = vst.msk [vmem:[%s1446_s10 + $0xe8] sm:$0xff] %vm834_vm2, %v661_v62 }
 0x125   : > { %896 = vst.msk [vmem:[%s1446_s10 + $0x1e8] sm:$0xff] %vm834_vm2, %v821_v63  ;;  %863 = vst.msk [vmem:[%s1446_s10 + $0xe0] sm:$0xff] %vm834_vm2, %v656_v2  ;;  %v1164_v4 = vpop.f32.mrb[30].mxu0 }
 0x126   : > { %895 = vst.msk [vmem:[%s1446_s10 + $0x1e0] sm:$0xff] %vm834_vm2, %v816_v3  ;;  %v1212_v5 = vpop.f32.mrb[30].mxu1  ;;  %v671_v6 = vadd.f32 %v1164_v4, %v1439_v10  ;;  %v665_v8 = vpop.f32.mrb[31].mxu0 }
 0x127   : > { %v831_v7 = vadd.f32 %v1212_v5, %v1439_v10  ;;  %v825_v9 = vpop.f32.mrb[31].mxu1  ;;  %v666_v11 = vadd.f32 %v1439_v10, %v665_v8 }
 0x128   : > { %v826_v12 = vadd.f32 %v1439_v10, %v825_v9  ;;  %866 = vst.msk [vmem:[%s1446_s10 + $0xf8] sm:$0xff] %vm834_vm2, %v671_v6 }
 0x129   : > { %898 = vst.msk [vmem:[%s1446_s10 + $0x1f8] sm:$0xff] %vm834_vm2, %v831_v7  ;;  %865 = vst.msk [vmem:[%s1446_s10 + $0xf0] sm:$0xff] %vm834_vm2, %v666_v11 }
 0x12a   : > { %897 = vst.msk [vmem:[%s1446_s10 + $0x1f0] sm:$0xff] %vm834_vm2, %v826_v12 }
 0x12b PF: > { %s13_s12 = sadd.s32 1, %s1247_s12  }
 0x12c   : > { %p10_p4 = scmp.ge.s32.totalorder %s13_s12, 6  }
 0x12e   :  { %12 = sbr.rel (!%p10_p4) target bundleno = 1 (0x1), region = 62 }

// kernel: forward.12
= control target key start
LH: loop header
LB: loop body
LE: loop exit
PB: predicated region body
PF: predicated region fallthrough
CT: control target
= control target key end

     0   :  { %vm88_vm0 = vcmask 588800   ;;  %s239_s0 = inlined_call_operand.vmem [shape: f32[8,968], index: 0, kind: input, shape index: {}]   ;;  %s240_s1 = inlined_call_operand.vmem [shape: f32[8,968], index: 1, kind: input, shape index: {}]   ;;  %s241_s2 = inlined_call_operand.vmem [shape: f32[8,968], index: 2, kind: input, shape index: {}]   ;;  %s242_s3 = inlined_call_operand.vmem [shape: f32[8,968], index: 3, kind: input, shape index: {}]   ;;  %s243_s4 = inlined_call_operand.vmem [shape: f32[8,968], index: 4, kind: output, shape index: {}]  }
   0x1   :  { %v17_v0 = vld [vmem:[%s239_s0] sm:$0xff]  ;;  %v18_v5 = vld [vmem:[%s239_s0 + $0x8] sm:$0xff]  ;;  %v19_v11 = vld [vmem:[%s239_s0 + $0x10] sm:$0xff] }
   0x2   :  { %v25_v1 = vld [vmem:[%s240_s1] sm:$0xff]  ;;  %v26_v6 = vld [vmem:[%s240_s1 + $0x8] sm:$0xff]  ;;  %v27_v13 = vld [vmem:[%s240_s1 + $0x10] sm:$0xff] }
   0x3   :  { %v41_v2 = vld [vmem:[%s241_s2] sm:$0xff]  ;;  %v33_v3 = vmax.f32 %v17_v0, %v25_v1  ;;  %v34_v8 = vmax.f32 %v18_v5, %v26_v6  ;;  %v42_v9 = vld [vmem:[%s241_s2 + $0x8] sm:$0xff]  ;;  %v43_v14 = vld [vmem:[%s241_s2 + $0x10] sm:$0xff]  ;;  %v35_v17 = vmax.f32 %v19_v11, %v27_v13 }
   0x4   :  { %v49_v4 = vld [vmem:[%s242_s3] sm:$0xff]  ;;  %v50_v10 = vld [vmem:[%s242_s3 + $0x8] sm:$0xff]  ;;  %v51_v15 = vld [vmem:[%s242_s3 + $0x10] sm:$0xff] }
   0x5   :  { %v57_v7 = vmax.f32 %v41_v2, %v49_v4  ;;  %v58_v12 = vmax.f32 %v42_v9, %v50_v10  ;;  %v59_v18 = vmax.f32 %v43_v14, %v51_v15  ;;  %v20_v19 = vld [vmem:[%s239_s0 + $0x18] sm:$0xff]  ;;  %v21_v25 = vld [vmem:[%s239_s0 + $0x20] sm:$0xff]  ;;  %v22_v33 = vld [vmem:[%s239_s0 + $0x28] sm:$0xff] }
   0x6   :  { %v28_v20 = vld [vmem:[%s240_s1 + $0x18] sm:$0xff]  ;;  %v29_v26 = vld [vmem:[%s240_s1 + $0x20] sm:$0xff]  ;;  %v30_v36 = vld [vmem:[%s240_s1 + $0x28] sm:$0xff] }
   0x7   :  { %v65_v16 = vmax.f32 %v33_v3, %v57_v7  ;;  %v44_v21 = vld [vmem:[%s241_s2 + $0x18] sm:$0xff]  ;;  %v66_v22 = vmax.f32 %v34_v8, %v58_v12  ;;  %v36_v23 = vmax.f32 %v20_v19, %v28_v20  ;;  %v67_v28 = vmax.f32 %v35_v17, %v59_v18  ;;  %v45_v31 = vld [vmem:[%s241_s2 + $0x20] sm:$0xff]  ;;  %v46_v37 = vld [vmem:[%s241_s2 + $0x28] sm:$0xff] }
   0x8   :  { %v52_v24 = vld [vmem:[%s242_s3 + $0x18] sm:$0xff]  ;;  %v37_v30 = vmax.f32 %v21_v25, %v29_v26  ;;  %v53_v32 = vld [vmem:[%s242_s3 + $0x20] sm:$0xff]  ;;  %v54_v38 = vld [vmem:[%s242_s3 + $0x28] sm:$0xff]  ;;  %v38_v41 = vmax.f32 %v22_v33, %v30_v36 }
   0x9   :  { %v73_v27 = vmax.f32 %v65_v16, 0.0  ;;  %v60_v29 = vmax.f32 %v44_v21, %v52_v24  ;;  %v74_v34 = vmax.f32 %v66_v22, 0.0  ;;  %v61_v35 = vmax.f32 %v45_v31, %v53_v32  ;;  %v23_v43 = vld [vmem:[%s239_s0 + $0x30] sm:$0xff]  ;;  %v24_v49 = vld [vmem:[%s239_s0 + $0x38] sm:$0xff] }
   0xa   :  { %v75_v39 = vmax.f32 %v67_v28, 0.0  ;;  %v62_v42 = vmax.f32 %v46_v37, %v54_v38  ;;  %v31_v44 = vld [vmem:[%s240_s1 + $0x30] sm:$0xff]  ;;  %v32_v50 = vld [vmem:[%s240_s1 + $0x38] sm:$0xff] }
   0xb   :  { %81 = vst [vmem:[%s243_s4] sm:$0xff] %v73_v27  ;;  %v68_v40 = vmax.f32 %v36_v23, %v60_v29  ;;  %v47_v45 = vld [vmem:[%s241_s2 + $0x30] sm:$0xff]  ;;  %82 = vst [vmem:[%s243_s4 + $0x8] sm:$0xff] %v74_v34  ;;  %v69_v46 = vmax.f32 %v37_v30, %v61_v35  ;;  %v39_v47 = vmax.f32 %v23_v43, %v31_v44  ;;  %v48_v55 = vld [vmem:[%s241_s2 + $0x38] sm:$0xff] }
   0xc   :  { %v55_v48 = vld [vmem:[%s242_s3 + $0x30] sm:$0xff]  ;;  %83 = vst [vmem:[%s243_s4 + $0x10] sm:$0xff] %v75_v39  ;;  %v70_v52 = vmax.f32 %v38_v41, %v62_v42  ;;  %v40_v54 = vmax.f32 %v24_v49, %v32_v50  ;;  %v56_v56 = vld [vmem:[%s242_s3 + $0x38] sm:$0xff] }
   0xd   :  { %v76_v51 = vmax.f32 %v68_v40, 0.0  ;;  %v63_v53 = vmax.f32 %v47_v45, %v55_v48  ;;  %v77_v57 = vmax.f32 %v69_v46, 0.0  ;;  %v64_v58 = vmax.f32 %v48_v55, %v56_v56 }
   0xe   :  { %v78_v59 = vmax.f32 %v70_v52, 0.0 }
   0xf   :  { %84 = vst [vmem:[%s243_s4 + $0x18] sm:$0xff] %v76_v51  ;;  %v71_v60 = vmax.f32 %v39_v47, %v63_v53  ;;  %85 = vst [vmem:[%s243_s4 + $0x20] sm:$0xff] %v77_v57  ;;  %v72_v61 = vmax.f32 %v40_v54, %v64_v58 }
  0x10   :  { %86 = vst [vmem:[%s243_s4 + $0x28] sm:$0xff] %v78_v59 }
  0x11   :  { %v79_v62 = vmax.f32 %v71_v60, 0.0  ;;  %v80_v63 = vmax.f32 %v72_v61, 0.0 }
  0x13   :  { %87 = vst [vmem:[%s243_s4 + $0x30] sm:$0xff] %v79_v62  ;;  %89 = vst.msk [vmem:[%s243_s4 + $0x38] sm:$0xff] %vm88_vm0, %v80_v63 }

// kernel: forward.13
= control target key start
LH: loop header
LB: loop body
LE: loop exit
PB: predicated region body
PF: predicated region fallthrough
CT: control target
= control target key end

     0   :  { %v482_v0 = vmov 0.0|0.0   ;;  %vm96_vm0 = vcmask 588800   ;;  %v483_v39 = vmov 0.0   ;;  %vm362_vm1 = vcmask 80896   ;;  %s908_s1 = inlined_call_operand.vmem [shape: f32[200,10], index: 1, kind: input, shape index: {}]   ;;  %s909_s0 = inlined_call_operand.vmem [shape: f32[200,200], index: 0, kind: input, shape index: {}]   ;;  %s910_s2 = inlined_call_operand.vmem [shape: f32[1,10], index: 2, kind: input, shape index: {}]   ;;  %s911_s3 = inlined_call_operand.vmem [shape: f32[200,10], index: 3, kind: output, shape index: {}]  }
   0x1   :  { %418 = vmatprep.subr.bf16.mxu0 %v482_v0  ;;  %v64_v1 = vld [vmem:[%s908_s1] sm:$0xff]  ;;  %v65_v2 = vld [vmem:[%s908_s1 + $0x8] sm:$0xff]  ;;  %454 = vmatprep.subr.bf16.mxu1 %v482_v0  ;;  %v66_v3 = vld [vmem:[%s908_s1 + $0x10] sm:$0xff] }
   0x2   :  { %v419_v4 = vpack.c.bf16 %v65_v2, %v64_v1  ;;  %v67_v5 = vld [vmem:[%s908_s1 + $0x18] sm:$0xff]  ;;  %v68_v7 = vld [vmem:[%s908_s1 + $0x20] sm:$0xff]  ;;  %v69_v8 = vld [vmem:[%s908_s1 + $0x28] sm:$0xff] }
   0x3   :  { %v422_v6 = vpack.c.bf16 %v67_v5, %v66_v3  ;;  %v425_v9 = vpack.c.bf16 %v69_v8, %v68_v7  ;;  %v70_v10 = vld [vmem:[%s908_s1 + $0x30] sm:$0xff]  ;;  %v71_v11 = vld [vmem:[%s908_s1 + $0x38] sm:$0xff]  ;;  %v15_v12 = vld [vmem:[%s909_s0 + $0x8] sm:$0xff] }
   0x4   :  { %420 = vmatpush1.bf16.msra.mxu0 %v419_v4  ;;  %467 = vmatpush1.bf16.msra.mxu1 %v419_v4  ;;  %v41_v13 = vld [vmem:[%s909_s0 + $0xd8] sm:$0xff]  ;;  %v428_v14 = vpack.c.bf16 %v71_v11, %v70_v10  ;;  %v72_v15 = vld [vmem:[%s908_s1 + $0x40] sm:$0xff]  ;;  %v73_v16 = vld [vmem:[%s908_s1 + $0x48] sm:$0xff] }
   0x5   :  { %421 = vmatprep.subr.bf16.mxu0 %v482_v0  ;;  %455 = vmatprep.subr.bf16.mxu1 %v482_v0  ;;  %v431_v17 = vpack.c.bf16 %v73_v16, %v72_v15  ;;  %v74_v18 = vld [vmem:[%s908_s1 + $0x50] sm:$0xff]  ;;  %v75_v19 = vld [vmem:[%s908_s1 + $0x58] sm:$0xff]  ;;  %v76_v21 = vld [vmem:[%s908_s1 + $0x60] sm:$0xff] }
   0x6   :  { %393 = vmatprep.mubr.msk.f32.mxu0 %vm96_vm0, %v15_v12  ;;  %406 = vmatprep.mubr.msk.f32.mxu1 %vm96_vm0, %v41_v13  ;;  %v434_v20 = vpack.c.bf16 %v75_v19, %v74_v18  ;;  %v77_v22 = vld [vmem:[%s908_s1 + $0x68] sm:$0xff]  ;;  %v78_v24 = vld [vmem:[%s908_s1 + $0x70] sm:$0xff]  ;;  %v79_v25 = vld [vmem:[%s908_s1 + $0x78] sm:$0xff] }
   0x7   :  { %v437_v23 = vpack.c.bf16 %v77_v22, %v76_v21  ;;  %v440_v26 = vpack.c.bf16 %v79_v25, %v78_v24  ;;  %v80_v27 = vld [vmem:[%s908_s1 + $0x80] sm:$0xff]  ;;  %v81_v28 = vld [vmem:[%s908_s1 + $0x88] sm:$0xff]  ;;  %v82_v30 = vld [vmem:[%s908_s1 + $0x90] sm:$0xff] }
   0x8   :  { %423 = vmatpush1.bf16.msra.mxu0 %v422_v6  ;;  %468 = vmatpush1.bf16.msra.mxu1 %v422_v6  ;;  %v443_v29 = vpack.c.bf16 %v81_v28, %v80_v27  ;;  %v83_v31 = vld [vmem:[%s908_s1 + $0x98] sm:$0xff]  ;;  %v84_v33 = vld [vmem:[%s908_s1 + $0xa0] sm:$0xff]  ;;  %v85_v34 = vld [vmem:[%s908_s1 + $0xa8] sm:$0xff] }
   0x9   :  { %424 = vmatprep.subr.bf16.mxu0 %v482_v0  ;;  %456 = vmatprep.subr.bf16.mxu1 %v482_v0  ;;  %v446_v32 = vpack.c.bf16 %v83_v31, %v82_v30  ;;  %v449_v35 = vpack.c.bf16 %v85_v34, %v84_v33  ;;  %v86_v36 = vld [vmem:[%s908_s1 + $0xb0] sm:$0xff]  ;;  %v87_v37 = vld [vmem:[%s908_s1 + $0xb8] sm:$0xff]  ;;  %v88_v40 = vld [vmem:[%s908_s1 + $0xc0] sm:$0xff] }
   0xa   :  { %v452_v38 = vpack.c.bf16 %v87_v37, %v86_v36  ;;  %v14_v41 = vld [vmem:[%s909_s0] sm:$0xff]  ;;  %v40_v42 = vld [vmem:[%s909_s0 + $0xd0] sm:$0xff]  ;;  %v17_v43 = vld [vmem:[%s909_s0 + $0x18] sm:$0xff] }
   0xb   :  { %v43_v44 = vld [vmem:[%s909_s0 + $0xe8] sm:$0xff]  ;;  %v16_v45 = vld [vmem:[%s909_s0 + $0x10] sm:$0xff]  ;;  %v42_v46 = vld [vmem:[%s909_s0 + $0xe0] sm:$0xff] }
   0xc   :  { %426 = vmatpush1.bf16.msra.mxu0 %v425_v9  ;;  %469 = vmatpush1.bf16.msra.mxu1 %v425_v9  ;;  %v19_v47 = vld [vmem:[%s909_s0 + $0x28] sm:$0xff]  ;;  %v45_v48 = vld [vmem:[%s909_s0 + $0xf8] sm:$0xff]  ;;  %v18_v49 = vld [vmem:[%s909_s0 + $0x20] sm:$0xff] }
   0xd   :  { %427 = vmatprep.subr.bf16.mxu0 %v482_v0  ;;  %457 = vmatprep.subr.bf16.mxu1 %v482_v0  ;;  %v44_v50 = vld [vmem:[%s909_s0 + $0xf0] sm:$0xff]  ;;  %v21_v51 = vld [vmem:[%s909_s0 + $0x38] sm:$0xff]  ;;  %v47_v52 = vld [vmem:[%s909_s0 + $0x108] sm:$0xff] }
   0xe   :  { %v20_v53 = vld [vmem:[%s909_s0 + $0x30] sm:$0xff]  ;;  %v46_v54 = vld [vmem:[%s909_s0 + $0x100] sm:$0xff]  ;;  %v23_v55 = vld [vmem:[%s909_s0 + $0x48] sm:$0xff] }
   0xf   :  { %v49_v56 = vld [vmem:[%s909_s0 + $0x118] sm:$0xff]  ;;  %v22_v57 = vld [vmem:[%s909_s0 + $0x40] sm:$0xff]  ;;  %v48_v58 = vld [vmem:[%s909_s0 + $0x110] sm:$0xff] }
  0x10   :  { %429 = vmatpush1.bf16.msra.mxu0 %v428_v14  ;;  %470 = vmatpush1.bf16.msra.mxu1 %v428_v14  ;;  %v25_v59 = vld [vmem:[%s909_s0 + $0x58] sm:$0xff]  ;;  %v51_v60 = vld [vmem:[%s909_s0 + $0x128] sm:$0xff]  ;;  %v24_v61 = vld [vmem:[%s909_s0 + $0x50] sm:$0xff] }
  0x11   :  { %430 = vmatprep.subr.bf16.mxu0 %v482_v0  ;;  %458 = vmatprep.subr.bf16.mxu1 %v482_v0  ;;  %v50_v62 = vld [vmem:[%s909_s0 + $0x120] sm:$0xff]  ;;  %v27_v63 = vld [vmem:[%s909_s0 + $0x68] sm:$0xff]  ;;  %v52_v2 = vld [vmem:[%s909_s0 + $0x130] sm:$0xff] }
  0x12   :  { %v26_v1 = vld [vmem:[%s909_s0 + $0x60] sm:$0xff]  ;;  %v29_v3 = vld [vmem:[%s909_s0 + $0x78] sm:$0xff]  ;;  %v55_v4 = vld [vmem:[%s909_s0 + $0x148] sm:$0xff] }
  0x13   :  { %v28_v5 = vld [vmem:[%s909_s0 + $0x70] sm:$0xff]  ;;  %v54_v6 = vld [vmem:[%s909_s0 + $0x140] sm:$0xff]  ;;  %v31_v7 = vld [vmem:[%s909_s0 + $0x88] sm:$0xff] }
  0x14   :  { %432 = vmatpush1.bf16.msra.mxu0 %v431_v17  ;;  %471 = vmatpush1.bf16.msra.mxu1 %v431_v17  ;;  %v57_v8 = vld [vmem:[%s909_s0 + $0x158] sm:$0xff]  ;;  %v30_v9 = vld [vmem:[%s909_s0 + $0x80] sm:$0xff]  ;;  %v56_v10 = vld [vmem:[%s909_s0 + $0x150] sm:$0xff] }
  0x15   :  { %433 = vmatprep.subr.bf16.mxu0 %v482_v0  ;;  %459 = vmatprep.subr.bf16.mxu1 %v482_v0  ;;  %v33_v11 = vld [vmem:[%s909_s0 + $0x98] sm:$0xff]  ;;  %v59_v12 = vld [vmem:[%s909_s0 + $0x168] sm:$0xff]  ;;  %v32_v13 = vld [vmem:[%s909_s0 + $0x90] sm:$0xff] }
  0x16   :  { %v58_v14 = vld [vmem:[%s909_s0 + $0x160] sm:$0xff]  ;;  %v35_v15 = vld [vmem:[%s909_s0 + $0xa8] sm:$0xff]  ;;  %v61_v16 = vld [vmem:[%s909_s0 + $0x178] sm:$0xff] }
  0x17   :  { %v34_v17 = vld [vmem:[%s909_s0 + $0xa0] sm:$0xff]  ;;  %v60_v18 = vld [vmem:[%s909_s0 + $0x170] sm:$0xff]  ;;  %v37_v19 = vld [vmem:[%s909_s0 + $0xb8] sm:$0xff] }
  0x18   :  { %435 = vmatpush1.bf16.msra.mxu0 %v434_v20  ;;  %472 = vmatpush1.bf16.msra.mxu1 %v434_v20  ;;  %v63_v20 = vld [vmem:[%s909_s0 + $0x188] sm:$0xff]  ;;  %v36_v21 = vld [vmem:[%s909_s0 + $0xb0] sm:$0xff]  ;;  %v62_v22 = vld [vmem:[%s909_s0 + $0x180] sm:$0xff] }
  0x19   :  { %436 = vmatprep.subr.bf16.mxu0 %v482_v0  ;;  %460 = vmatprep.subr.bf16.mxu1 %v482_v0  ;;  %v38_v24 = vld [vmem:[%s909_s0 + $0xc0] sm:$0xff] }
  0x1a   :  { %v781_v25 = vld [vmem:[%s910_s2] ss:$0 sm:$0xff] }
  0x1c   :  { %438 = vmatpush1.bf16.msra.mxu0 %v437_v23  ;;  %473 = vmatpush1.bf16.msra.mxu1 %v437_v23  ;;  %v39_v23 = vld [vmem:[%s909_s0 + $0xc8] sm:$0xff] }
  0x1d   :  { %439 = vmatprep.subr.bf16.mxu0 %v482_v0  ;;  %461 = vmatprep.subr.bf16.mxu1 %v482_v0 }
  0x20   :  { %441 = vmatpush1.bf16.msra.mxu0 %v440_v26  ;;  %474 = vmatpush1.bf16.msra.mxu1 %v440_v26 }
  0x21   :  { %442 = vmatprep.subr.bf16.mxu0 %v482_v0  ;;  %462 = vmatprep.subr.bf16.mxu1 %v482_v0 }
  0x24   :  { %444 = vmatpush1.bf16.msra.mxu0 %v443_v29  ;;  %475 = vmatpush1.bf16.msra.mxu1 %v443_v29 }
  0x25   :  { %445 = vmatprep.subr.bf16.mxu0 %v482_v0  ;;  %463 = vmatprep.subr.bf16.mxu1 %v482_v0 }
  0x28   :  { %447 = vmatpush1.bf16.msra.mxu0 %v446_v32  ;;  %476 = vmatpush1.bf16.msra.mxu1 %v446_v32 }
  0x29   :  { %448 = vmatprep.subr.bf16.mxu0 %v482_v0  ;;  %464 = vmatprep.subr.bf16.mxu1 %v482_v0 }
  0x2c   :  { %450 = vmatpush1.bf16.msra.mxu0 %v449_v35  ;;  %477 = vmatpush1.bf16.msra.mxu1 %v449_v35 }
  0x2d   :  { %451 = vmatprep.subr.bf16.mxu0 %v482_v0  ;;  %465 = vmatprep.subr.bf16.mxu1 %v482_v0  ;;  %v53_v0 = vld [vmem:[%s909_s0 + $0x138] sm:$0xff] }
  0x30   :  { %453 = vmatpush1.bf16.msra.mxu0 %v452_v38  ;;  %478 = vmatpush1.bf16.msra.mxu1 %v452_v38 }
  0x31   :  { %220 = vmatprep.subr.mxu0 %v483_v39  ;;  %466 = vmatprep.subr.mxu1 %v483_v39 }
  0x34   :  { %221 = vmatpush1.msra.mxu0 %v88_v40  ;;  %479 = vmatpush1.msra.mxu1 %v88_v40 }
  0x35   :  { %237 = vmatmul.mubr.f32.vlgmr.msra.gmra.mrb[0].mxu0 %v14_v41  ;;  %302 = vmatmul.mubr.f32.vlgmr.msra.gmra.mrb[0].mxu1 %v40_v42 }
  0x36   :  { %394 = vmatprep.mubr.msk.f32.mxu0 %vm96_vm0, %v17_v43  ;;  %407 = vmatprep.mubr.msk.f32.mxu1 %vm96_vm0, %v43_v44 }
  0x39   :  { %242 = vmatmul.mubr.f32.gmra.mrb[2].mxu0 %v16_v45  ;;  %307 = vmatmul.mubr.f32.gmra.mrb[2].mxu1 %v42_v46 }
  0x3a   :  { %395 = vmatprep.mubr.msk.f32.mxu0 %vm96_vm0, %v19_v47  ;;  %408 = vmatprep.mubr.msk.f32.mxu1 %vm96_vm0, %v45_v48 }
  0x3d   :  { %247 = vmatmul.mubr.f32.gmra.mrb[4].mxu0 %v18_v49  ;;  %312 = vmatmul.mubr.f32.gmra.mrb[4].mxu1 %v44_v50 }
  0x3e   :  { %396 = vmatprep.mubr.msk.f32.mxu0 %vm96_vm0, %v21_v51  ;;  %409 = vmatprep.mubr.msk.f32.mxu1 %vm96_vm0, %v47_v52 }
  0x41   :  { %252 = vmatmul.mubr.f32.gmra.mrb[6].mxu0 %v20_v53  ;;  %317 = vmatmul.mubr.f32.gmra.mrb[6].mxu1 %v46_v54 }
  0x42   :  { %397 = vmatprep.mubr.msk.f32.mxu0 %vm96_vm0, %v23_v55  ;;  %410 = vmatprep.mubr.msk.f32.mxu1 %vm96_vm0, %v49_v56 }
  0x45   :  { %257 = vmatmul.mubr.f32.gmra.mrb[8].mxu0 %v22_v57  ;;  %322 = vmatmul.mubr.f32.gmra.mrb[8].mxu1 %v48_v58 }
  0x46   :  { %398 = vmatprep.mubr.msk.f32.mxu0 %vm96_vm0, %v25_v59  ;;  %411 = vmatprep.mubr.msk.f32.mxu1 %vm96_vm0, %v51_v60 }
  0x49   :  { %262 = vmatmul.mubr.f32.gmra.mrb[10].mxu0 %v24_v61  ;;  %327 = vmatmul.mubr.f32.gmra.mrb[10].mxu1 %v50_v62 }
  0x4a   :  { %399 = vmatprep.mubr.msk.f32.mxu0 %vm96_vm0, %v27_v63  ;;  %412 = vmatprep.mubr.msk.f32.mxu1 %vm96_vm0, %v53_v0 }
  0x4d   :  { %267 = vmatmul.mubr.f32.gmra.mrb[12].mxu0 %v26_v1  ;;  %332 = vmatmul.mubr.f32.gmra.mrb[12].mxu1 %v52_v2 }
  0x4e   :  { %400 = vmatprep.mubr.msk.f32.mxu0 %vm96_vm0, %v29_v3  ;;  %413 = vmatprep.mubr.msk.f32.mxu1 %vm96_vm0, %v55_v4 }
  0x51   :  { %272 = vmatmul.mubr.f32.gmra.mrb[14].mxu0 %v28_v5  ;;  %337 = vmatmul.mubr.f32.gmra.mrb[14].mxu1 %v54_v6 }
  0x52   :  { %401 = vmatprep.mubr.msk.f32.mxu0 %vm96_vm0, %v31_v7  ;;  %414 = vmatprep.mubr.msk.f32.mxu1 %vm96_vm0, %v57_v8 }
  0x55   :  { %277 = vmatmul.mubr.f32.gmra.mrb[16].mxu0 %v30_v9  ;;  %342 = vmatmul.mubr.f32.gmra.mrb[16].mxu1 %v56_v10 }
  0x56   :  { %402 = vmatprep.mubr.msk.f32.mxu0 %vm96_vm0, %v33_v11  ;;  %415 = vmatprep.mubr.msk.f32.mxu1 %vm96_vm0, %v59_v12 }
  0x59   :  { %282 = vmatmul.mubr.f32.gmra.mrb[18].mxu0 %v32_v13  ;;  %347 = vmatmul.mubr.f32.gmra.mrb[18].mxu1 %v58_v14 }
  0x5a   :  { %403 = vmatprep.mubr.msk.f32.mxu0 %vm96_vm0, %v35_v15  ;;  %416 = vmatprep.mubr.msk.f32.mxu1 %vm96_vm0, %v61_v16 }
  0x5d   :  { %287 = vmatmul.mubr.f32.gmra.mrb[20].mxu0 %v34_v17  ;;  %352 = vmatmul.mubr.f32.gmra.mrb[20].mxu1 %v60_v18 }
  0x5e   :  { %404 = vmatprep.mubr.msk.f32.mxu0 %vm96_vm0, %v37_v19  ;;  %417 = vmatprep.mubr.msk.f32.mxu1 %vm96_vm0, %v63_v20 }
  0x61   :  { %292 = vmatmul.mubr.f32.gmra.mrb[22].mxu0 %v36_v21  ;;  %357 = vmatmul.mubr.f32.gmra.mrb[22].mxu1 %v62_v22 }
  0x62   :  { %405 = vmatprep.mubr.msk.f32.mxu0 %vm96_vm0, %v39_v23 }
  0x65   :  { %297 = vmatmul.mubr.f32.gmra.mrb[24].mxu0 %v38_v24 }
 0x108   :  { %v238_v26 = vpop.f32.mrb[0].mxu0  ;;  %v303_v27 = vpop.f32.mrb[0].mxu1 }
 0x109   :  { %v239_v28 = vadd.f32 %v781_v25, %v238_v26  ;;  %v240_v29 = vpop.f32.mrb[1].mxu0  ;;  %v304_v30 = vadd.f32 %v781_v25, %v303_v27  ;;  %v305_v31 = vpop.f32.mrb[1].mxu1 }
 0x10b   :  { %363 = vst.msk [vmem:[%s911_s3] sm:$0xff] %vm362_vm1, %v239_v28  ;;  %376 = vst.msk [vmem:[%s911_s3 + $0x68] sm:$0xff] %vm362_vm1, %v304_v30 }
 0x10c   :  { %v243_v32 = vpop.f32.mrb[2].mxu0  ;;  %v308_v33 = vpop.f32.mrb[2].mxu1 }
 0x10d   :  { %v244_v34 = vadd.f32 %v781_v25, %v243_v32  ;;  %v245_v35 = vpop.f32.mrb[3].mxu0  ;;  %v309_v36 = vadd.f32 %v781_v25, %v308_v33  ;;  %v310_v37 = vpop.f32.mrb[3].mxu1 }
 0x10f   :  { %364 = vst.msk [vmem:[%s911_s3 + $0x8] sm:$0xff] %vm362_vm1, %v244_v34  ;;  %377 = vst.msk [vmem:[%s911_s3 + $0x70] sm:$0xff] %vm362_vm1, %v309_v36 }
 0x110   :  { %v248_v38 = vpop.f32.mrb[4].mxu0  ;;  %v313_v39 = vpop.f32.mrb[4].mxu1 }
 0x111   :  { %v249_v40 = vadd.f32 %v781_v25, %v248_v38  ;;  %v250_v41 = vpop.f32.mrb[5].mxu0  ;;  %v314_v42 = vadd.f32 %v781_v25, %v313_v39  ;;  %v315_v43 = vpop.f32.mrb[5].mxu1 }
 0x113   :  { %365 = vst.msk [vmem:[%s911_s3 + $0x10] sm:$0xff] %vm362_vm1, %v249_v40  ;;  %378 = vst.msk [vmem:[%s911_s3 + $0x78] sm:$0xff] %vm362_vm1, %v314_v42 }
 0x114   :  { %v253_v44 = vpop.f32.mrb[6].mxu0  ;;  %v318_v45 = vpop.f32.mrb[6].mxu1 }
 0x115   :  { %v254_v46 = vadd.f32 %v781_v25, %v253_v44  ;;  %v255_v47 = vpop.f32.mrb[7].mxu0  ;;  %v319_v48 = vadd.f32 %v781_v25, %v318_v45  ;;  %v320_v49 = vpop.f32.mrb[7].mxu1 }
 0x117   :  { %366 = vst.msk [vmem:[%s911_s3 + $0x18] sm:$0xff] %vm362_vm1, %v254_v46  ;;  %379 = vst.msk [vmem:[%s911_s3 + $0x80] sm:$0xff] %vm362_vm1, %v319_v48 }
 0x118   :  { %v258_v50 = vpop.f32.mrb[8].mxu0  ;;  %v323_v51 = vpop.f32.mrb[8].mxu1 }
 0x119   :  { %v259_v52 = vadd.f32 %v781_v25, %v258_v50  ;;  %v260_v53 = vpop.f32.mrb[9].mxu0  ;;  %v324_v54 = vadd.f32 %v781_v25, %v323_v51  ;;  %v325_v55 = vpop.f32.mrb[9].mxu1 }
 0x11b   :  { %367 = vst.msk [vmem:[%s911_s3 + $0x20] sm:$0xff] %vm362_vm1, %v259_v52  ;;  %380 = vst.msk [vmem:[%s911_s3 + $0x88] sm:$0xff] %vm362_vm1, %v324_v54 }
 0x11c   :  { %v263_v56 = vpop.f32.mrb[10].mxu0  ;;  %v328_v57 = vpop.f32.mrb[10].mxu1 }
 0x11d   :  { %v264_v58 = vadd.f32 %v781_v25, %v263_v56  ;;  %v265_v59 = vpop.f32.mrb[11].mxu0  ;;  %v329_v60 = vadd.f32 %v781_v25, %v328_v57  ;;  %v330_v61 = vpop.f32.mrb[11].mxu1 }
 0x11f   :  { %368 = vst.msk [vmem:[%s911_s3 + $0x28] sm:$0xff] %vm362_vm1, %v264_v58  ;;  %381 = vst.msk [vmem:[%s911_s3 + $0x90] sm:$0xff] %vm362_vm1, %v329_v60 }
 0x120   :  { %v268_v62 = vpop.f32.mrb[12].mxu0  ;;  %v333_v63 = vpop.f32.mrb[12].mxu1 }
 0x121   :  { %v269_v0 = vadd.f32 %v781_v25, %v268_v62  ;;  %v270_v1 = vpop.f32.mrb[13].mxu0  ;;  %v334_v2 = vadd.f32 %v781_v25, %v333_v63  ;;  %v335_v3 = vpop.f32.mrb[13].mxu1 }
 0x123   :  { %369 = vst.msk [vmem:[%s911_s3 + $0x30] sm:$0xff] %vm362_vm1, %v269_v0  ;;  %382 = vst.msk [vmem:[%s911_s3 + $0x98] sm:$0xff] %vm362_vm1, %v334_v2 }
 0x124   :  { %v273_v4 = vpop.f32.mrb[14].mxu0  ;;  %v338_v5 = vpop.f32.mrb[14].mxu1 }
 0x125   :  { %v274_v6 = vadd.f32 %v781_v25, %v273_v4  ;;  %v275_v7 = vpop.f32.mrb[15].mxu0  ;;  %v339_v8 = vadd.f32 %v781_v25, %v338_v5  ;;  %v340_v9 = vpop.f32.mrb[15].mxu1 }
 0x127   :  { %370 = vst.msk [vmem:[%s911_s3 + $0x38] sm:$0xff] %vm362_vm1, %v274_v6  ;;  %383 = vst.msk [vmem:[%s911_s3 + $0xa0] sm:$0xff] %vm362_vm1, %v339_v8 }
 0x128   :  { %v278_v10 = vpop.f32.mrb[16].mxu0  ;;  %v343_v11 = vpop.f32.mrb[16].mxu1 }
 0x129   :  { %v279_v12 = vadd.f32 %v781_v25, %v278_v10  ;;  %v280_v13 = vpop.f32.mrb[17].mxu0  ;;  %v344_v14 = vadd.f32 %v781_v25, %v343_v11  ;;  %v345_v15 = vpop.f32.mrb[17].mxu1 }
 0x12b   :  { %371 = vst.msk [vmem:[%s911_s3 + $0x40] sm:$0xff] %vm362_vm1, %v279_v12  ;;  %384 = vst.msk [vmem:[%s911_s3 + $0xa8] sm:$0xff] %vm362_vm1, %v344_v14 }
 0x12c   :  { %v283_v16 = vpop.f32.mrb[18].mxu0  ;;  %v348_v17 = vpop.f32.mrb[18].mxu1 }
 0x12d   :  { %v284_v18 = vadd.f32 %v781_v25, %v283_v16  ;;  %v285_v19 = vpop.f32.mrb[19].mxu0  ;;  %v349_v20 = vadd.f32 %v781_v25, %v348_v17  ;;  %v350_v21 = vpop.f32.mrb[19].mxu1 }
 0x12f   :  { %372 = vst.msk [vmem:[%s911_s3 + $0x48] sm:$0xff] %vm362_vm1, %v284_v18  ;;  %385 = vst.msk [vmem:[%s911_s3 + $0xb0] sm:$0xff] %vm362_vm1, %v349_v20 }
 0x130   :  { %v288_v22 = vpop.f32.mrb[20].mxu0  ;;  %v353_v23 = vpop.f32.mrb[20].mxu1 }
 0x131   :  { %v289_v24 = vadd.f32 %v781_v25, %v288_v22  ;;  %v290_v26 = vpop.f32.mrb[21].mxu0  ;;  %v354_v27 = vadd.f32 %v781_v25, %v353_v23  ;;  %v355_v28 = vpop.f32.mrb[21].mxu1 }
 0x133   :  { %373 = vst.msk [vmem:[%s911_s3 + $0x50] sm:$0xff] %vm362_vm1, %v289_v24  ;;  %386 = vst.msk [vmem:[%s911_s3 + $0xb8] sm:$0xff] %vm362_vm1, %v354_v27 }
 0x134   :  { %v293_v29 = vpop.f32.mrb[22].mxu0  ;;  %v358_v30 = vpop.f32.mrb[22].mxu1 }
 0x135   :  { %v294_v31 = vadd.f32 %v781_v25, %v293_v29  ;;  %v295_v32 = vpop.f32.mrb[23].mxu0  ;;  %v359_v33 = vadd.f32 %v781_v25, %v358_v30  ;;  %v360_v34 = vpop.f32.mrb[23].mxu1 }
 0x137   :  { %374 = vst.msk [vmem:[%s911_s3 + $0x58] sm:$0xff] %vm362_vm1, %v294_v31  ;;  %387 = vst.msk [vmem:[%s911_s3 + $0xc0] sm:$0xff] %vm362_vm1, %v359_v33 }
 0x138   :  { %v298_v35 = vpop.f32.mrb[24].mxu0 }
 0x139   :  { %v299_v36 = vadd.f32 %v781_v25, %v298_v35  ;;  %v300_v37 = vpop.f32.mrb[25].mxu0 }
 0x13b   :  { %375 = vst.msk [vmem:[%s911_s3 + $0x60] sm:$0xff] %vm362_vm1, %v299_v36 }

// kernel: forward.14
= control target key start
LH: loop header
LB: loop body
LE: loop exit
PB: predicated region body
PF: predicated region fallthrough
CT: control target
= control target key end

     0   :  { %vm25_vm0 = vcmask 736256   ;;  %s71_s0 = inlined_call_operand.vmem [shape: f32[8,90], index: 0, kind: input, shape index: {}]   ;;  %s72_s1 = inlined_call_operand.vmem [shape: f32[8,90], index: 1, kind: input, shape index: {}]   ;;  %s73_s2 = inlined_call_operand.vmem [shape: f32[8,90], index: 2, kind: input, shape index: {}]   ;;  %s74_s3 = inlined_call_operand.vmem [shape: f32[8,90], index: 3, kind: input, shape index: {}]   ;;  %s75_s4 = inlined_call_operand.vmem [shape: f32[8,90], index: 4, kind: output, shape index: {}]  }
   0x1   :  { %v17_v0 = vld [vmem:[%s71_s0] sm:$0xff] }
   0x2   :  { %v18_v1 = vld [vmem:[%s72_s1] sm:$0xff] }
   0x3   :  { %v20_v2 = vld [vmem:[%s73_s2] sm:$0xff]  ;;  %v19_v3 = vmax.f32 %v17_v0, %v18_v1 }
   0x4   :  { %v21_v4 = vld [vmem:[%s74_s3] sm:$0xff] }
   0x5   :  { %v22_v5 = vmax.f32 %v20_v2, %v21_v4 }
   0x7   :  { %v23_v6 = vmax.f32 %v19_v3, %v22_v5 }
   0x9   :  { %v24_v7 = vmax.f32 %v23_v6, 0.0 }
   0xb   :  { %26 = vst.msk [vmem:[%s75_s4] sm:$0xff] %vm25_vm0, %v24_v7 }

// kernel: forward.15
= control target key start
LH: loop header
LB: loop body
LE: loop exit
PB: predicated region body
PF: predicated region fallthrough
CT: control target
= control target key end

     0   :  { %v300_v0 = vmov 0.0|0.0   ;;  %vm301_vm0 = vmmov 0   ;;  %v302_v6 = vmov 0.0   ;;  %vm44_vm1 = vcmask 1041408   ;;  %s394_s1 = inlined_call_operand.vmem [shape: f32[90,32], index: 1, kind: input, shape index: {}]   ;;  %s395_s3 = inlined_call_operand.vmem [shape: f32[32,6], index: 3, kind: input, shape index: {}]   ;;  %s396_s0 = inlined_call_operand.vmem [shape: f32[8,90], index: 0, kind: input, shape index: {}]   ;;  %s397_s2 = inlined_call_operand.vmem [shape: f32[1,32], index: 2, kind: input, shape index: {}]   ;;  %s398_s4 = inlined_call_operand.vmem [shape: f32[1,6], index: 4, kind: input, shape index: {}]   ;;  %s399_s5 = inlined_call_operand.vmem [shape: f32[8,6], index: 5, kind: output, shape index: {}]  }
   0x1   :  { %271 = vmatprep.subr.bf16.mxu0 %v300_v0  ;;  %v21_v1 = vld [vmem:[%s394_s1] sm:$0xff]  ;;  %v22_v2 = vld [vmem:[%s394_s1 + $0x8] sm:$0xff]  ;;  %v23_v3 = vld [vmem:[%s394_s1 + $0x10] sm:$0xff]  ;;  %290 = vmatprep.subr.bf16.mxu1 %v300_v0  ;;  %vm303_vm2 = vmmov 1   ;;  %vm40_vm4 = vcmask 736256   ;;  %vm130_vm5 = vcmask 261120  }
   0x2   :  { %v272_v4 = vpack.c.bf16 %v22_v2, %v21_v1  ;;  %v24_v5 = vld [vmem:[%s394_s1 + $0x18] sm:$0xff]  ;;  %257 = vmatprep.mubr.msk.f32.mxu0 %vm301_vm0, %v302_v6  ;;  %268 = vmatprep.mubr.msk.f32.mxu1 %vm301_vm0, %v302_v6  ;;  %v25_v8 = vld [vmem:[%s394_s1 + $0x20] sm:$0xff]  ;;  %v26_v9 = vld [vmem:[%s394_s1 + $0x28] sm:$0xff]  ;;  %vm204_vm6 = vcmask 48128  }
   0x3   :  { %v275_v7 = vpack.c.bf16 %v24_v5, %v23_v3  ;;  %v119_v10 = vld [vmem:[%s395_s3] sm:$0xff]  ;;  %v120_v11 = vld [vmem:[%s395_s3 + $0x8] sm:$0xff]  ;;  %v278_v13 = vpack.c.bf16 %v26_v9, %v25_v8  ;;  %v27_v14 = vld [vmem:[%s394_s1 + $0x30] sm:$0xff] }
   0x4   :  { %273 = vmatpush3.bf16.msra.mxu0 %v272_v4  ;;  %v291_v12 = vpack.c.bf16 %v120_v11, %v119_v10  ;;  %v28_v15 = vld [vmem:[%s394_s1 + $0x38] sm:$0xff]  ;;  %v29_v17 = vld [vmem:[%s394_s1 + $0x40] sm:$0xff]  ;;  %v30_v18 = vld [vmem:[%s394_s1 + $0x48] sm:$0xff] }
   0x5   :  { %274 = vmatprep.subr.bf16.mxu0 %v300_v0  ;;  %v281_v16 = vpack.c.bf16 %v28_v15, %v27_v14  ;;  %v284_v19 = vpack.c.bf16 %v30_v18, %v29_v17  ;;  %v31_v20 = vld [vmem:[%s394_s1 + $0x50] sm:$0xff]  ;;  %v32_v21 = vld [vmem:[%s394_s1 + $0x58] sm:$0x3]  ;;  %vm288_vm3 = vmpackc.low %vm44_vm1, %vm303_vm2 }
   0x6   :  { %292 = vmatpush3.bf16.msra.mxu1 %v291_v12  ;;  %v287_v22 = vpack.c.bf16 %v32_v21, %v31_v20  ;;  %v20_v23 = vld [vmem:[%s396_s0] sm:$0xff]  ;;  %v121_v24 = vld [vmem:[%s395_s3 + $0x10] sm:$0xff]  ;;  %v122_v25 = vld [vmem:[%s395_s3 + $0x18] sm:$0xff] }
   0x7   :  { %293 = vmatprep.subr.bf16.mxu1 %v300_v0  ;;  %v294_v26 = vpack.c.bf16 %v122_v25, %v121_v24  ;;  %v210_v27 = vld [vmem:[%s397_s2] ss:$0 sm:$0xff] }
   0x8   :  { %276 = vmatpush3.bf16.msra.mxu0 %v275_v7  ;;  %v213_v32 = vld [vmem:[%s398_s4] ss:$0 sm:$0xff] }
   0x9   :  { %277 = vmatprep.subr.bf16.mxu0 %v300_v0 }
   0xa   :  { %295 = vmatpush3.bf16.msra.mxu1 %v294_v26 }
   0xc   :  { %279 = vmatpush3.bf16.msra.mxu0 %v278_v13 }
   0xd   :  { %280 = vmatprep.subr.bf16.mxu0 %v300_v0 }
  0x10   :  { %282 = vmatpush3.bf16.msra.mxu0 %v281_v16 }
  0x11   :  { %283 = vmatprep.subr.bf16.mxu0 %v300_v0 }
  0x14   :  { %285 = vmatpush3.bf16.msra.mxu0 %v284_v19 }
  0x15   :  { %286 = vmatprep.subr.bf16.mxu0 %v300_v0 }
  0x18   :  { %289 = vmatpush3.bf16.msk.msra.mxu0 %vm288_vm3, %v287_v22 }
  0x1b   :  { %258 = vmatmul.mubr.msk.f32.vlgmr.msra.gmra.mrb[0].mxu0 %vm40_vm4, %v20_v23 }
  0xee   :  { %v114_v28 = vpop.f32.mrb[0].mxu0 }
  0xef   :  { %v115_v29 = vadd.f32 %v210_v27, %v114_v28  ;;  %v259_v30 = vpop.f32.mrb[1].mxu0 }
  0xf1   :  { %v118_v31 = vmax.f32 %v115_v29, 0.0 }
  0xf3   :  { %269 = vmatmul.mubr.msk.f32.vlgmr.msra.gmra.mrb[0].mxu1 %vm130_vm5, %v118_v31 }
 0x1c6   :  { %v200_v33 = vpop.f32.mrb[0].mxu1 }
 0x1c7   :  { %v201_v34 = vadd.f32 %v213_v32, %v200_v33  ;;  %v270_v35 = vpop.f32.mrb[1].mxu1 }
 0x1c9   :  { %205 = vst.msk [vmem:[%s399_s5] sm:$0xff] %vm204_vm6, %v201_v34 }

// kernel: forward.16
= control target key start
LH: loop header
LB: loop body
LE: loop exit
PB: predicated region body
PF: predicated region fallthrough
CT: control target
= control target key end

     0   :  { %s2265_s0 = inlined_call_operand.vmem [shape: f32[4,6], index: 0, kind: input, shape index: {}]   ;;  %s2266_s1 = inlined_call_operand.vmem [shape: f32[4,28,28], index: 1, kind: input, shape index: {}]   ;;  %s2267_s2 = inlined_call_operand.vmem [shape: f32[4,1,784], index: 2, kind: output, shape index: {}]  }
   0x1   :  { %s7_s11 = sshll.u32 %s2265_s0, 4  ;;  %s8_s11 = int_to_ptr.vmem [resolvable:$true] %s7_s11 }
   0x2   :  { %s1522_s12 = scalar_lea.vmem %s8_s11, 64  ;;  %p1527_p1 = scmp.lt.s32.totalorder %s8_s11, %s8_s11 }
   0x3   :  { %p1523_p0 = scmp.ne.s32.totalorder %s8_s11, %s1522_s12  ;;  %p1528_p2 = scmp.lt.s32.totalorder %s1522_s12, %s1522_s12 }
   0x5   :  { %p1529_p3 = por %p1528_p2, %p1527_p1 }
   0x7   :  { %p1530_p4 = pnand %p1529_p3, %p1523_p0 }
   0x9   :  { %1533 = shalt.err (!%p1530_p4)  }
   0xa   :  { %s1544_s13 = smov [#allocation3]  }
   0xb   :  { %10 = dma.vmem_to_smem %s8_s11, 64, %s1544_s13, [#allocation2] }
   0xc   :  { %1538 = dma.done.wait [#allocation2], 64 }
   0xd   :  { %1539 = vsyncadd [#allocation2], 4294967232 }
   0xe   :  { %12 = sfence }
   0xf   :  { %s1566_s14 = smov 0  }
  0x10 LB: > { %s1572_s0 = sadd.s32 4294967295, %s1542_s14   ;;  %p1361_p5 = scmp.ge.s32.totalorder %s1542_s14, 1  ;;  %s1542_s14 = sphi %s1566_s14, %s18_s14  }
  0x11   : > { %p94_p6 = scmp.lt.s32.totalorder %s1542_s14, 5 }
  0x13   : > { %p95_p7 = pnand %p1361_p5, %p94_p6 }
  0x14   : > { %s1577_s15 = sshll.u32 (!%p95_p7), %s1572_s0, 7  ;;  %v134_v0 = vlaneseq (!%p95_p7)  ;;  %v1545_v1 = vmov (!%p95_p7), 0.0   ;;  %vm766_vm13 = vcmask (!%p95_p7), 1043456   ;;  %p113_p8 = scmp.lt.s32.totalorder (!%p95_p7), %s1572_s0, 3 }
  0x15   : > { %98 = sbr.rel (%p95_p7) target bundleno = 387 (0x183), region = 24  ;;  %s128_s16 = sadd.s32 (!%p95_p7), 3, %s1577_s15  ;;  %852 = vmatprep.mubr.f32.mxu0 (!%p95_p7), %v1545_v1  ;;  %941 = vmatprep.mubr.f32.mxu1 (!%p95_p7), %v1545_v1 }
  0x16   : > { %s130_s17 = sadd.s32 (!%p95_p7), 4, %s1577_s15  ;;  %s129_s18 = sld [smem:[#allocation3 + %s128_s16]] (!%p95_p7)  ;;  %v135_v2 = vand.u32 (!%p95_p7), 127, %v134_v0  ;;  %v1585_v3 = vshrl.u32 (!%p95_p7), %v134_v0, 7 }
  0x17   : > { %s131_s19 = sld [smem:[#allocation3 + %s130_s17]] (!%p95_p7)  ;;  %s132_s20 = sadd.s32 (!%p95_p7), 5, %s1577_s15 }
  0x18   : > { %s133_s21 = sld [smem:[#allocation3 + %s132_s20]] (!%p95_p7)  ;;  %v136_v4 = vadd.s32 (!%p95_p7), 128, %v135_v2  ;;  %v138_v5 = vadd.s32 (!%p95_p7), 384, %v135_v2  ;;  %v142_v6 = vcvt.s32.f32 (!%p95_p7), %v135_v2  ;;  %v1589_v7 = vadd.s32 (!%p95_p7), 8, %v1585_v3  ;;  %s124_s22 = sadd.s32 (!%p95_p7), 1, %s1577_s15 }
  0x19   : > { %v137_v8 = vadd.s32 (!%p95_p7), 256, %v135_v2  ;;  %v1592_v9 = vadd.s32 (!%p95_p7), 16, %v1585_v3  ;;  %v1594_v10 = vadd.s32 (!%p95_p7), 640, %v135_v2  ;;  %v1596_v14 = vadd.s32 (!%p95_p7), 512, %v135_v2  ;;  %s1794_s23 = sld [smem:[#allocation3 + %s1577_s15]] (!%p95_p7)  ;;  %s126_s24 = sadd.s32 (!%p95_p7), 2, %s1577_s15 }
  0x1a   : > { %v143_v11 = vcvt.s32.f32 (!%p95_p7), %v136_v4  ;;  %v145_v12 = vcvt.s32.f32 (!%p95_p7), %v138_v5  ;;  %v150_v13 = vmul.f32 (!%p95_p7), 0.035714287, %v142_v6  ;;  %v1599_v16 = vadd.s32 (!%p95_p7), 24, %v1585_v3  ;;  %s1802_s25 = sld [smem:[#allocation3 + %s124_s22]] (!%p95_p7) }
  0x1b   : > { %v144_v15 = vcvt.s32.f32 (!%p95_p7), %v137_v8  ;;  %v147_v17 = vcvt.s32.f32 (!%p95_p7), %v1594_v10  ;;  %v1602_v18 = vadd.s32 (!%p95_p7), 768, %v135_v2  ;;  %v146_v26 = vcvt.s32.f32 (!%p95_p7), %v1596_v14  ;;  %s1818_s27 = sld [smem:[#allocation3 + %s126_s24]] (!%p95_p7) }
  0x1c   : > { %v151_v19 = vmul.f32 0.035714287, %v143_v11  ;;  %v1604_v20 = vstv %s129_s18  ;;  %v153_v22 = vmul.f32 0.035714287, %v145_v12  ;;  %v157_v23 = vfloor.f32 %v150_v13  ;;  %s2271_s0 = smov (!%p113_p8, %s1572_s0), 3 }
  0x1d   : > { %v1606_v21 = vstv %s131_s19  ;;  %v152_v24 = vmul.f32 0.035714287, %v144_v15  ;;  %v155_v25 = vmul.f32 0.035714287, %v147_v17  ;;  %v148_v30 = vcvt.s32.f32 %v1602_v18  ;;  %s1418_s26 = sshll.u32 %s2271_s0, 5  ;;  %s1481_s3 = smul.u32 7, %s2271_s0 }
  0x1e   : > { %v158_v27 = vfloor.f32 %v151_v19  ;;  %v1611_v28 = vstv %s133_s21  ;;  %v160_v29 = vfloor.f32 %v153_v22  ;;  %v164_v31 = vmul.f32 28.0, %v157_v23  ;;  %s1832_s30 = scalar_lea.vmem %s2266_s1, %s1418_s26 }
  0x1f   : > { %v206_v32 = vmul.f32 2.0, %v157_v23  ;;  %v159_v33 = vfloor.f32 %v152_v24  ;;  %v162_v34 = vfloor.f32 %v155_v25  ;;  %s121_s6 = scalar_lea.vmem %s2267_s2, %s1481_s3 }
  0x20   : > { %v165_v35 = vmul.f32 28.0, %v158_v27  ;;  %v207_v36 = vmul.f32 2.0, %v158_v27  ;;  %v167_v37 = vmul.f32 28.0, %v160_v29  ;;  %v209_v38 = vmul.f32 2.0, %v160_v29 }
  0x21   : > { %v171_v39 = vsub.f32 %v142_v6, %v164_v31  ;;  %v213_v40 = vadd.f32 1.0, %v206_v32  ;;  %v166_v41 = vmul.f32 28.0, %v159_v33  ;;  %v208_v42 = vmul.f32 2.0, %v159_v33 }
  0x22   : > { %v172_v43 = vsub.f32 %v143_v11, %v165_v35  ;;  %v214_v44 = vadd.f32 1.0, %v207_v36  ;;  %v174_v45 = vsub.f32 %v145_v12, %v167_v37  ;;  %v216_v46 = vadd.f32 1.0, %v209_v38 }
  0x23   : > { %v178_v47 = vmul.f32 2.0, %v171_v39  ;;  %v220_v48 = vmul.f32 0.035714287, %v213_v40  ;;  %v173_v49 = vsub.f32 %v144_v15, %v166_v41  ;;  %v215_v50 = vadd.f32 1.0, %v208_v42 }
  0x24   : > { %v179_v51 = vmul.f32 2.0, %v172_v43  ;;  %v221_v52 = vmul.f32 0.035714287, %v214_v44  ;;  %v181_v53 = vmul.f32 2.0, %v174_v45  ;;  %v223_v54 = vmul.f32 0.035714287, %v216_v46 }
  0x25   : > { %v185_v55 = vadd.f32 1.0, %v178_v47  ;;  %v1614_v56 = vadd.f32 -1.0, %v220_v48  ;;  %v180_v57 = vmul.f32 2.0, %v173_v49  ;;  %v222_v58 = vmul.f32 0.035714287, %v215_v50 }
  0x26   : > { %v186_v59 = vadd.f32 1.0, %v179_v51  ;;  %v1616_v60 = vadd.f32 -1.0, %v221_v52  ;;  %v188_v61 = vadd.f32 1.0, %v181_v53  ;;  %v1618_v62 = vadd.f32 -1.0, %v223_v54 }
  0x27   : > { %v192_v63 = vmul.f32 0.035714287, %v185_v55  ;;  %v274_v2 = vmul.f32 %v1614_v56, %v1606_v21  ;;  %v187_v4 = vadd.f32 1.0, %v180_v57  ;;  %v1622_v5 = vadd.f32 -1.0, %v222_v58 }
  0x28   : > { %v193_v6 = vmul.f32 0.035714287, %v186_v59  ;;  %v275_v8 = vmul.f32 %v1616_v60, %v1606_v21  ;;  %v195_v11 = vmul.f32 0.035714287, %v188_v61  ;;  %v277_v12 = vmul.f32 %v1618_v62, %v1606_v21 }
  0x29   : > { %v1628_v13 = vadd.f32 -1.0, %v192_v63  ;;  %v194_v15 = vmul.f32 0.035714287, %v187_v4  ;;  %v276_v19 = vmul.f32 %v1622_v5, %v1606_v21  ;;  %v169_v22 = vmul.f32 28.0, %v162_v34 }
  0x2a   : > { %v1632_v23 = vadd.f32 -1.0, %v193_v6  ;;  %v1634_v24 = vadd.f32 -1.0, %v195_v11  ;;  %v211_v25 = vmul.f32 2.0, %v162_v34  ;;  %v154_v27 = vmul.f32 0.035714287, %v146_v26 }
  0x2b   : > { %v266_v29 = vmul.f32 %v1628_v13, %v1604_v20  ;;  %v1640_v31 = vadd.f32 -1.0, %v194_v15  ;;  %v176_v32 = vsub.f32 %v147_v17, %v169_v22  ;;  %v156_v33 = vmul.f32 0.035714287, %v148_v30 }
  0x2c   : > { %v267_v35 = vmul.f32 %v1632_v23, %v1604_v20  ;;  %v269_v34 = vmul.f32 %v1634_v24, %v1604_v20  ;;  %v218_v36 = vadd.f32 1.0, %v211_v25  ;;  %v161_v37 = vfloor.f32 %v154_v27 }
  0x2d   : > { %v281_v38 = vadd.f32 %v274_v2, %v266_v29  ;;  %v268_v39 = vmul.f32 %v1640_v31, %v1604_v20  ;;  %v183_v40 = vmul.f32 2.0, %v176_v32  ;;  %v163_v41 = vfloor.f32 %v156_v33 }
  0x2e   : > { %v282_v42 = vadd.f32 %v275_v8, %v267_v35  ;;  %v284_v10 = vadd.f32 %v277_v12, %v269_v34  ;;  %v225_v17 = vmul.f32 0.035714287, %v218_v36  ;;  %v168_v43 = vmul.f32 28.0, %v161_v37 }
  0x2f   : > { %v289_v44 = vadd.f32 %v1611_v28, %v281_v38  ;;  %v283_v45 = vadd.f32 %v276_v19, %v268_v39  ;;  %v190_v46 = vadd.f32 1.0, %v183_v40  ;;  %v210_v47 = vmul.f32 2.0, %v161_v37 }
  0x30   : > { %v290_v48 = vadd.f32 %v1611_v28, %v282_v42  ;;  %v292_v49 = vadd.f32 %v1611_v28, %v284_v10  ;;  %v1655_v50 = vadd.f32 -1.0, %v225_v17  ;;  %v175_v51 = vsub.f32 %v146_v26, %v168_v43 }
  0x31   : > { %v331_v52 = vadd.f32 1.0, %v289_v44  ;;  %v291_v53 = vadd.f32 %v1611_v28, %v283_v45  ;;  %v197_v54 = vmul.f32 0.035714287, %v190_v46  ;;  %v217_v55 = vadd.f32 1.0, %v210_v47 }
  0x32   : > { %v332_v57 = vadd.f32 1.0, %v290_v48  ;;  %v334_v58 = vadd.f32 1.0, %v292_v49  ;;  %v279_v59 = vmul.f32 %v1655_v50, %v1606_v21  ;;  %v182_v61 = vmul.f32 2.0, %v175_v51 }
  0x33   : > { %v338_v63 = vmul.f32 14.0, %v331_v52  ;;  %v333_v2 = vadd.f32 1.0, %v291_v53  ;;  %v1662_v4 = vadd.f32 -1.0, %v197_v54  ;;  %v224_v6 = vmul.f32 0.035714287, %v217_v55 }
  0x34   : > { %v339_v8 = vmul.f32 14.0, %v332_v57  ;;  %v341_v11 = vmul.f32 14.0, %v334_v58  ;;  %v189_v14 = vadd.f32 1.0, %v182_v61  ;;  %v170_v26 = vmul.f32 28.0, %v163_v41 }
  0x35   : > { %v1386_v12 = vadd.f32 -0.5, %v338_v63  ;;  %v340_v15 = vmul.f32 14.0, %v333_v2  ;;  %v271_v19 = vmul.f32 %v1662_v4, %v1604_v20  ;;  %v1666_v22 = vadd.f32 -1.0, %v224_v6 }
  0x36   : > { %v1387_v25 = vadd.f32 -0.5, %v339_v8  ;;  %v1389_v27 = vadd.f32 -0.5, %v341_v11  ;;  %v196_v29 = vmul.f32 0.035714287, %v189_v14  ;;  %v177_v32 = vsub.f32 %v148_v30, %v170_v26 }
  0x37   : > { %v352_v33 = vmax.f32 %v1386_v12, 0.0  ;;  %v1388_v35 = vadd.f32 -0.5, %v340_v15  ;;  %v286_v34 = vadd.f32 %v279_v59, %v271_v19  ;;  %v278_v36 = vmul.f32 %v1666_v22, %v1606_v21 }
  0x38   : > { %v353_v37 = vmax.f32 %v1387_v25, 0.0  ;;  %v355_v38 = vmax.f32 %v1389_v27, 0.0  ;;  %v1672_v39 = vadd.f32 -1.0, %v196_v29  ;;  %v184_v40 = vmul.f32 2.0, %v177_v32 }
  0x39   : > { %v359_v42 = vmin.f32 %v352_v33, 27.0  ;;  %v354_v10 = vmax.f32 %v1388_v35, 0.0  ;;  %v294_v17 = vadd.f32 %v1611_v28, %v286_v34  ;;  %v212_v43 = vmul.f32 2.0, %v163_v41 }
  0x3a   : > { %v360_v44 = vmin.f32 %v353_v37, 27.0  ;;  %v362_v45 = vmin.f32 %v355_v38, 27.0  ;;  %v270_v18 = vmul.f32 %v1672_v39, %v1604_v20  ;;  %v191_v30 = vadd.f32 1.0, %v184_v40 }
  0x3b   : > { %v373_v46 = vfloor.f32 %v359_v42  ;;  %v361_v47 = vmin.f32 %v354_v10, 27.0  ;;  %v336_v48 = vadd.f32 1.0, %v294_v17  ;;  %v1677_v49 = vadd.f32 1.0, %v212_v43 }
  0x3c   : > { %v374_v51 = vfloor.f32 %v360_v44  ;;  %v376_v52 = vfloor.f32 %v362_v45  ;;  %v1679_v53 = vadd.f32 %v278_v36, %v270_v18  ;;  %v1681_v54 = vmul.f32 0.035714287, %v191_v30 }
  0x3d   : > { %v1683_v55 = vsub.f32 %v359_v42, %v373_v46  ;;  %v1496_v41 = vtrunc.f32 %v373_v46  ;;  %v375_v57 = vfloor.f32 %v361_v47  ;;  %v1685_v58 = vmul.f32 14.0, %v336_v48 }
  0x3e   : > { %v1687_v59 = vsub.f32 %v360_v44, %v374_v51  ;;  %v1498_v61 = vtrunc.f32 %v374_v51  ;;  %v1689_v63 = vsub.f32 %v362_v45, %v376_v52  ;;  %v1502_v2 = vtrunc.f32 %v376_v52 }
  0x3f   : > { %v1692_v6 = vsub.f32 1.0, %v1683_v55  ;;  %v1694_v8 = vcvt.f32.s32 %v1496_v41  ;;  %v1696_v11 = vsub.f32 %v361_v47, %v375_v57  ;;  %v1500_v14 = vtrunc.f32 %v375_v57 }
  0x40   : > { %v402_v26 = vsub.f32 1.0, %v1687_v59  ;;  %v1499_v12 = vcvt.f32.s32 %v1498_v61  ;;  %v1700_v15 = vsub.f32 1.0, %v1689_v63  ;;  %v1702_v19 = vcvt.f32.s32 %v1502_v2 }
  0x41   : > { %v443_v25 = vadd.s32 1, %v1694_v8  ;;  %vm469_vm0 = vcmp.eq.s32.totalorder %v1585_v3, %v1694_v8  ;;  %vm476_vm1 = vcmp.eq.s32.totalorder %v1589_v7, %v1694_v8  ;;  %v1710_v27 = vsub.f32 1.0, %v1696_v11 }
  0x42   : > { %v444_v29 = vadd.s32 1, %v1499_v12  ;;  %vm470_vm2 = vcmp.eq.s32.totalorder %v1585_v3, %v1499_v12  ;;  %vm477_vm3 = vcmp.eq.s32.totalorder %v1589_v7, %v1499_v12  ;;  %v446_v32 = vadd.s32 1, %v1702_v19 }
  0x43   : > { %v498_v33 = vsel %vm470_vm2, %v402_v26, 0.0  ;;  %v505_v35 = vsel %vm477_vm3, %v402_v26, 0.0  ;;  %vm472_vm4 = vcmp.eq.s32.totalorder %v1585_v3, %v1702_v19  ;;  %vm479_vm5 = vcmp.eq.s32.totalorder %v1589_v7, %v1702_v19 }
  0x44   : > { %vm452_vm6 = vcmp.lt.s32.totalorder %v444_v29, 27  ;;  %vm456_vm7 = vcmp.lt.s32.totalorder %v446_v32, 27  ;;  %v500_v34 = vsel %vm472_vm4, %v1700_v15, 0.0  ;;  %v507_v36 = vsel %vm479_vm5, %v1700_v15, 0.0 }
  0x45   : > { %v453_v37 = vsel %vm452_vm6, %v444_v29, 27  ;;  %v1721_v38 = vsel %vm456_vm7, %v446_v32, 27  ;;  %vm450_vm8 = vcmp.lt.s32.totalorder %v443_v25, 27  ;;  %v497_v40 = vsel %vm469_vm0, %v1692_v6, 0.0 }
  0x46   : > { %vm526_vm9 = vcmp.eq.s32.totalorder %v1585_v3, %v453_v37  ;;  %vm533_vm10 = vcmp.eq.s32.totalorder %v1589_v7, %v453_v37  ;;  %vm528_vm11 = vcmp.eq.s32.totalorder %v1585_v3, %v1721_v38  ;;  %vm535_vm12 = vcmp.eq.s32.totalorder %v1589_v7, %v1721_v38 }
  0x47   : > { %v554_v42 = vsel %vm526_vm9, %v1687_v59, 0.0  ;;  %v561_v10 = vsel %vm533_vm10, %v1687_v59, 0.0  ;;  %v556_v17 = vsel %vm528_vm11, %v1689_v63, 0.0  ;;  %v563_v43 = vsel %vm535_vm12, %v1689_v63, 0.0 }
  0x48   : > { %v582_v44 = vadd.f32 %v554_v42, %v498_v33  ;;  %v589_v45 = vadd.f32 %v561_v10, %v505_v35  ;;  %v584_v18 = vadd.f32 %v556_v17, %v500_v34  ;;  %v591_v30 = vadd.f32 %v563_v43, %v507_v36 }
  0x49   : > { %v1737_v46 = vsel %vm450_vm8, %v443_v25, 27  ;;  %v504_v47 = vsel %vm476_vm1, %v1692_v6, 0.0  ;;  %v1743_v48 = vcvt.f32.s32 %v1500_v14  ;;  %vm484_vm14 = vcmp.eq.s32.totalorder %v1592_v9, %v1499_v12 }
  0x4a   : > { %v1441_v51 = vpack.c.bf16 %v589_v45, %v582_v44  ;;  %v1451_v52 = vpack.c.bf16 %v591_v30, %v584_v18  ;;  %vm525_vm15 = vcmp.eq.s32.totalorder %v1585_v3, %v1737_v46  ;;  %vm532_vm0 = vcmp.eq.s32.totalorder %v1589_v7, %v1737_v46 }
  0x4b   : > { %v553_v41 = vsel %vm525_vm15, %v1683_v55, 0.0  ;;  %v560_v57 = vsel %vm532_vm0, %v1683_v55, 0.0  ;;  %v445_v61 = vadd.s32 1, %v1743_v48  ;;  %vm471_vm1 = vcmp.eq.s32.totalorder %v1585_v3, %v1743_v48 }
  0x4c   : > { %1442 = vmatprep.subr.bf16.mxu0 %v1441_v51  ;;  %1452 = vmatprep.subr.bf16.mxu1 %v1451_v52  ;;  %v581_v2 = vadd.f32 %v553_v41, %v497_v40  ;;  %v588_v14 = vadd.f32 %v560_v57, %v504_v47  ;;  %vm478_vm2 = vcmp.eq.s32.totalorder %v1589_v7, %v1743_v48  ;;  %v499_v25 = vsel %vm471_vm1, %v1710_v27, 0.0 }
  0x4d   : > { %vm454_vm3 = vcmp.lt.s32.totalorder %v445_v61, 27  ;;  %v506_v29 = vsel %vm478_vm2, %v1710_v27, 0.0  ;;  %vm491_vm4 = vcmp.eq.s32.totalorder %v1599_v16, %v1499_v12  ;;  %v512_v32 = vsel %vm484_vm14, %v402_v26, 0.0 }
  0x4e   : > { %v1443_v33 = vpack.c.bf16 %v588_v14, %v581_v2  ;;  %v455_v35 = vsel %vm454_vm3, %v445_v61, 27  ;;  %v519_v34 = vsel %vm491_vm4, %v402_v26, 0.0  ;;  %vm540_vm5 = vcmp.eq.s32.totalorder %v1592_v9, %v453_v37 }
  0x4f   : > { %vm527_vm6 = vcmp.eq.s32.totalorder %v1585_v3, %v455_v35  ;;  %vm534_vm7 = vcmp.eq.s32.totalorder %v1589_v7, %v455_v35  ;;  %vm547_vm8 = vcmp.eq.s32.totalorder %v1599_v16, %v453_v37  ;;  %v568_v36 = vsel %vm540_vm5, %v1687_v59, 0.0 }
  0x50   : > { %1444 = vmatpush1.bf16.msra.mxu0 %v1443_v33  ;;  %v555_v12 = vsel %vm527_vm6, %v1696_v11, 0.0  ;;  %v562_v40 = vsel %vm534_vm7, %v1696_v11, 0.0  ;;  %v575_v26 = vsel %vm547_vm8, %v1687_v59, 0.0  ;;  %v596_v42 = vadd.f32 %v568_v36, %v512_v32 }
  0x51   : > { %v583_v10 = vadd.f32 %v555_v12, %v499_v25  ;;  %v590_v17 = vadd.f32 %v562_v40, %v506_v29  ;;  %v603_v43 = vadd.f32 %v575_v26, %v519_v34  ;;  %vm486_vm9 = vcmp.eq.s32.totalorder %v1592_v9, %v1702_v19  ;;  %v1847_v34 = vld [vmem:[%s1832_s30] sm:$0xff] }
  0x52   : > { %vm1546_vm10 = vmmov 1   ;;  %vm493_vm12 = vcmp.eq.s32.totalorder %v1599_v16, %v1702_v19  ;;  %v514_v59 = vsel %vm486_vm9, %v1700_v15, 0.0  ;;  %vm542_vm14 = vcmp.eq.s32.totalorder %v1592_v9, %v1721_v38 }
  0x53   : > { %vm1775_vm11 = vmpackc.low %vm766_vm13, %vm1546_vm10  ;;  %vm549_vm15 = vcmp.eq.s32.totalorder %v1599_v16, %v1721_v38  ;;  %v1453_v44 = vpack.c.bf16 %v590_v17, %v583_v10  ;;  %v1445_v45 = vpack.c.bf16 %v603_v43, %v596_v42  ;;  %v521_v18 = vsel %vm493_vm12, %v1700_v15, 0.0  ;;  %v1871_v43 = vld [vmem:[%s1832_s30 + $0x8] sm:$0xff] }
  0x54   : > { %v570_v30 = vsel %vm542_vm14, %v1689_v63, 0.0  ;;  %v577_v19 = vsel %vm549_vm15, %v1689_v63, 0.0  ;;  %vm483_vm0 = vcmp.eq.s32.totalorder %v1592_v9, %v1694_v8  ;;  %vm490_vm1 = vcmp.eq.s32.totalorder %v1599_v16, %v1694_v8 }
  0x55   : > { %v598_v47 = vadd.f32 %v570_v30, %v514_v59  ;;  %vm753_vm2 = vcmask 228352   ;;  %1454 = vmatpush1.bf16.msra.mxu1 %v1453_v44  ;;  %1447 = vmatprep.subr.msk.bf16.mxu0 %vm1775_vm11, %v1445_v45  ;;  %v605_v15 = vadd.f32 %v577_v19, %v521_v18  ;;  %v511_v38 = vsel %vm483_vm0, %v1692_v6, 0.0 }
  0x56   : > { %v518_v63 = vsel %vm490_vm1, %v1692_v6, 0.0  ;;  %vm539_vm3 = vcmp.eq.s32.totalorder %v1592_v9, %v1737_v46  ;;  %vm546_vm4 = vcmp.eq.s32.totalorder %v1599_v16, %v1737_v46  ;;  %vm485_vm5 = vcmp.eq.s32.totalorder %v1592_v9, %v1743_v48 }
  0x57   : > { %v567_v8 = vsel %vm539_vm3, %v1683_v55, 0.0  ;;  %vm492_vm6 = vcmp.eq.s32.totalorder %v1599_v16, %v1743_v48  ;;  %v1455_v51 = vpack.c.bf16 %v605_v15, %v598_v47  ;;  %v574_v6 = vsel %vm546_vm4, %v1683_v55, 0.0  ;;  %v1883_v47 = vld [vmem:[%s1832_s30 + $0x10] sm:$0xff] }
  0x58   : > { %v595_v52 = vadd.f32 %v567_v8, %v511_v38  ;;  %v513_v41 = vsel %vm485_vm5, %v1710_v27, 0.0  ;;  %v602_v57 = vadd.f32 %v574_v6, %v518_v63  ;;  %v520_v46 = vsel %vm492_vm6, %v1710_v27, 0.0 }
  0x59   : > { %vm541_vm7 = vcmp.eq.s32.totalorder %v1592_v9, %v455_v35  ;;  %vm548_vm8 = vcmp.eq.s32.totalorder %v1599_v16, %v455_v35  ;;  %1457 = vmatprep.subr.msk.bf16.mxu1 %vm1775_vm11, %v1455_v51  ;;  %v1391_v55 = vadd.f32 -0.5, %v1685_v58  ;;  %v293_v27 = vadd.f32 %v1611_v28, %v1679_v53 }
  0x5a   : > { %v569_v48 = vsel %vm541_vm7, %v1696_v11, 0.0  ;;  %v576_v61 = vsel %vm548_vm8, %v1696_v11, 0.0  ;;  %v1448_v2 = vpack.c.bf16 %v602_v57, %v595_v52  ;;  %v1838_v29 = vadd.f32 -1.0, %v1681_v54 }
  0x5b   : > { %v597_v14 = vadd.f32 %v569_v48, %v513_v41  ;;  %v604_v25 = vadd.f32 %v576_v61, %v520_v46  ;;  %v357_v11 = vmax.f32 %v1391_v55, 0.0  ;;  %v335_v32 = vadd.f32 1.0, %v293_v27  ;;  %v1897_v48 = vld [vmem:[%s1832_s30 + $0x18] sm:$0xf] }
  0x5c   : > { %v226_v33 = vmul.f32 0.035714287, %v1677_v49  ;;  %v1842_v35 = vstv %s1794_s23  ;;  %1450 = vmatpush1.bf16.msk.msra.mxu0 %vm1775_vm11, %v1448_v2  ;;  %v272_v53 = vmul.f32 %v1838_v29, %v1604_v20  ;;  %v1854_v36 = vstv %s1802_s25 }
  0x5d   : > { %v1458_v58 = vpack.c.bf16 %v604_v25, %v597_v14  ;;  %v235_v54 = vmul.f32 %v1628_v13, %v1842_v35  ;;  %v364_v12 = vmin.f32 %v357_v11, 27.0  ;;  %v342_v40 = vmul.f32 14.0, %v335_v32 }
  0x5e   : > { %v1856_v49 = vadd.f32 -1.0, %v226_v33  ;;  %v243_v26 = vmul.f32 %v1614_v56, %v1854_v36  ;;  %v1863_v42 = vstv %s1818_s27 }
  0x5f   : > { %1460 = vmatpush1.bf16.msk.msra.mxu1 %vm1775_vm11, %v1458_v58  ;;  %1395 = vmatmul.mubr.msk.f32.vlgmr.msra.gmra.mrb[0].mxu0 %vm753_vm2, %v1847_v34  ;;  %v378_v20 = vfloor.f32 %v364_v12  ;;  %v1390_v10 = vadd.f32 -0.5, %v342_v40 }
  0x60   : > { %v280_v13 = vmul.f32 %v1856_v49, %v1606_v21  ;;  %v250_v17 = vadd.f32 %v243_v26, %v235_v54  ;;  %858 = vmatprep.mubr.f32.mxu0 %v1545_v1 }
  0x61   : > { %v399_v56 = vsub.f32 %v364_v12, %v378_v20  ;;  %v1506_v59 = vtrunc.f32 %v378_v20  ;;  %v356_v44 = vmax.f32 %v1390_v10, 0.0 }
  0x62   : > { %1401 = vmatmul.mubr.msk.f32.vlgmr.msra.gmra.mrb[0].mxu1 %vm753_vm2, %v1847_v34  ;;  %v287_v45 = vadd.f32 %v280_v13, %v272_v53  ;;  %v1877_v18 = vadd.f32 %v1863_v42, %v250_v17 }
  0x63   : > { %947 = vmatprep.mubr.f32.mxu1 %v1545_v1  ;;  %v406_v30 = vsub.f32 1.0, %v399_v56  ;;  %v1507_v21 = vcvt.f32.s32 %v1506_v59  ;;  %v363_v19 = vmin.f32 %v356_v44, 27.0  ;;  %1396 = vmatmul.mubr.msk.f32.gmra.mrb[2].mxu0 %vm753_vm2, %v1871_v43 }
  0x64   : > { %864 = vmatprep.mubr.f32.mxu0 %v1545_v1  ;;  %v295_v15 = vadd.f32 %v1611_v28, %v287_v45 }
  0x65   : > { %v448_v38 = vadd.s32 1, %v1507_v21  ;;  %vm474_vm9 = vcmp.eq.s32.totalorder %v1585_v3, %v1507_v21  ;;  %vm481_vm10 = vcmp.eq.s32.totalorder %v1589_v7, %v1507_v21  ;;  %v377_v63 = vfloor.f32 %v363_v19 }
  0x66   : > { %1402 = vmatmul.mubr.msk.f32.gmra.mrb[2].mxu1 %vm753_vm2, %v1871_v43  ;;  %v502_v8 = vsel %vm474_vm9, %v406_v30, 0.0  ;;  %vm488_vm12 = vcmp.eq.s32.totalorder %v1592_v9, %v1507_v21  ;;  %vm495_vm14 = vcmp.eq.s32.totalorder %v1599_v16, %v1507_v21  ;;  %v509_v51 = vsel %vm481_vm10, %v406_v30, 0.0 }
  0x67   : > { %953 = vmatprep.mubr.f32.mxu1 %v1545_v1  ;;  %vm460_vm15 = vcmp.lt.s32.totalorder %v448_v38, 27  ;;  %v398_v28 = vsub.f32 %v363_v19, %v377_v63  ;;  %v1504_v6 = vtrunc.f32 %v377_v63  ;;  %1397 = vmatmul.mubr.msk.f32.gmra.mrb[4].mxu0 %vm753_vm2, %v1883_v47  ;;  %v516_v41 = vsel %vm488_vm12, %v406_v30, 0.0 }
  0x68   : > { %v461_v52 = vsel %vm460_vm15, %v448_v38, 27  ;;  %v523_v57 = vsel %vm495_vm14, %v406_v30, 0.0  ;;  %v337_v46 = vadd.f32 1.0, %v295_v15  ;;  %870 = vmatprep.mubr.f32.mxu0 %v1545_v1 }
  0x69   : > { %vm530_vm0 = vcmp.eq.s32.totalorder %v1585_v3, %v461_v52  ;;  %vm537_vm1 = vcmp.eq.s32.totalorder %v1589_v7, %v461_v52  ;;  %v405_v61 = vsub.f32 1.0, %v398_v28  ;;  %v1505_v55 = vcvt.f32.s32 %v1504_v6 }
  0x6a   : > { %1403 = vmatmul.mubr.msk.f32.gmra.mrb[4].mxu1 %vm753_vm2, %v1883_v47  ;;  %v558_v27 = vsel %vm530_vm0, %v399_v56, 0.0  ;;  %v565_v2 = vsel %vm537_vm1, %v399_v56, 0.0  ;;  %vm544_vm3 = vcmp.eq.s32.totalorder %v1592_v9, %v461_v52  ;;  %vm551_vm4 = vcmp.eq.s32.totalorder %v1599_v16, %v461_v52 }
  0x6b   : > { %959 = vmatprep.mubr.f32.mxu1 %v1545_v1  ;;  %v586_v14 = vadd.f32 %v558_v27, %v502_v8  ;;  %v593_v25 = vadd.f32 %v565_v2, %v509_v51  ;;  %v447_v11 = vadd.s32 1, %v1505_v55  ;;  %vm473_vm5 = vcmp.eq.s32.totalorder %v1585_v3, %v1505_v55  ;;  %1398 = vmatmul.mubr.msk.f32.gmra.mrb[6].mxu0 %vm753_vm2, %v1897_v48 }
  0x6c   : > { %vm480_vm6 = vcmp.eq.s32.totalorder %v1589_v7, %v1505_v55  ;;  %v501_v32 = vsel %vm473_vm5, %v405_v61, 0.0  ;;  %v572_v33 = vsel %vm544_vm3, %v399_v56, 0.0  ;;  %v579_v58 = vsel %vm551_vm4, %v399_v56, 0.0  ;;  %1030 = vmatprep.mubr.f32.mxu0 %v1545_v1 }
  0x6d   : > { %v1461_v53 = vpack.c.bf16 %v593_v25, %v586_v14  ;;  %vm458_vm7 = vcmp.lt.s32.totalorder %v447_v11, 27  ;;  %v508_v54 = vsel %vm480_vm6, %v405_v61, 0.0  ;;  %v600_v12 = vadd.f32 %v572_v33, %v516_v41 }
  0x6e   : > { %1404 = vmatmul.mubr.msk.f32.gmra.mrb[6].mxu1 %vm753_vm2, %v1897_v48  ;;  %v459_v40 = vsel %vm458_vm7, %v447_v11, 27  ;;  %v607_v26 = vadd.f32 %v579_v58, %v523_v57  ;;  %v344_v20 = vmul.f32 14.0, %v337_v46  ;;  %vm487_vm8 = vcmp.eq.s32.totalorder %v1592_v9, %v1505_v55 }
  0x6f   : > { %1435 = vmatprep.mubr.msk.f32.mxu1 %vm753_vm2, %v1847_v34  ;;  %1462 = vmatprep.subr.bf16.mxu0 %v1461_v53  ;;  %vm529_vm9 = vcmp.eq.s32.totalorder %v1585_v3, %v459_v40  ;;  %vm536_vm10 = vcmp.eq.s32.totalorder %v1589_v7, %v459_v40  ;;  %vm494_vm12 = vcmp.eq.s32.totalorder %v1599_v16, %v1505_v55  ;;  %v515_v56 = vsel %vm487_vm8, %v405_v61, 0.0 }
  0x70   : > { %v557_v10 = vsel %vm529_vm9, %v398_v28, 0.0  ;;  %v564_v13 = vsel %vm536_vm10, %v398_v28, 0.0  ;;  %v1392_v17 = vadd.f32 -0.5, %v344_v20  ;;  %v522_v45 = vsel %vm494_vm12, %v405_v61, 0.0 }
  0x71   : > { %v585_v59 = vadd.f32 %v557_v10, %v501_v32  ;;  %v592_v44 = vadd.f32 %v564_v13, %v508_v54  ;;  %vm543_vm14 = vcmp.eq.s32.totalorder %v1592_v9, %v459_v40  ;;  %v1465_v30 = vpack.c.bf16 %v607_v26, %v600_v12 }
  0x72   : > { %v358_v21 = vmax.f32 %v1392_v17, 0.0  ;;  %vm550_vm15 = vcmp.eq.s32.totalorder %v1599_v16, %v459_v40  ;;  %v571_v19 = vsel %vm543_vm14, %v398_v28, 0.0  ;;  %v244_v20 = vmul.f32 %v1616_v60, %v1854_v36 }
  0x73   : > { %v1463_v15 = vpack.c.bf16 %v592_v44, %v585_v59  ;;  %v578_v38 = vsel %vm550_vm15, %v398_v28, 0.0  ;;  %v599_v63 = vadd.f32 %v571_v19, %v515_v56  ;;  %v296_v10 = vadd.f32 1.0, %v1877_v18 }
  0x74   : > { %v365_v8 = vmin.f32 %v358_v21, 27.0  ;;  %v606_v51 = vadd.f32 %v578_v38, %v522_v45 }
  0x75   : > { %1464 = vmatpush1.bf16.msra.mxu0 %v1463_v15  ;;  %v303_v37 = vmul.f32 14.0, %v296_v10 }
  0x76   : > { %1467 = vmatprep.subr.msk.bf16.mxu0 %vm1775_vm11, %v1465_v30  ;;  %v379_v6 = vfloor.f32 %v365_v8  ;;  %v1468_v52 = vpack.c.bf16 %v606_v51, %v599_v63 }
  0x77   : > { %v1379_v56 = vadd.f32 -0.5, %v303_v37 }
  0x78   : > { %v400_v41 = vsub.f32 %v365_v8, %v379_v6  ;;  %v1508_v57 = vtrunc.f32 %v379_v6 }
  0x79   : > { %1470 = vmatpush1.bf16.msk.msra.mxu0 %vm1775_vm11, %v1468_v52  ;;  %v317_v44 = vmax.f32 %v1379_v56, 0.0 }
  0x7a   : > { %v407_v46 = vsub.f32 1.0, %v400_v41  ;;  %v1509_v61 = vcvt.f32.s32 %v1508_v57 }
  0x7c   : > { %v449_v55 = vadd.s32 1, %v1509_v61  ;;  %vm475_vm0 = vcmp.eq.s32.totalorder %v1585_v3, %v1509_v61  ;;  %vm482_vm1 = vcmp.eq.s32.totalorder %v1589_v7, %v1509_v61  ;;  %vm489_vm3 = vcmp.eq.s32.totalorder %v1592_v9, %v1509_v61  ;;  %1407 = vmatmul.mubr.msk.f32.vlgmr.msra.gmra.mrb[8].mxu0 %vm753_vm2, %v1847_v34 }
  0x7d   : > { %vm496_vm4 = vcmp.eq.s32.totalorder %v1599_v16, %v1509_v61  ;;  %1036 = vmatprep.mubr.f32.mxu0 %v1545_v1  ;;  %v503_v28 = vsel %vm475_vm0, %v407_v46, 0.0  ;;  %v510_v2 = vsel %vm482_vm1, %v407_v46, 0.0  ;;  %v517_v14 = vsel %vm489_vm3, %v407_v46, 0.0 }
  0x7e   : > { %vm462_vm5 = vcmp.lt.s32.totalorder %v449_v55, 27  ;;  %v524_v25 = vsel %vm496_vm4, %v407_v46, 0.0 }
  0x7f   : > { %v463_v27 = vsel %vm462_vm5, %v449_v55, 27 }
  0x80   : > { %vm531_vm6 = vcmp.eq.s32.totalorder %v1585_v3, %v463_v27  ;;  %vm538_vm7 = vcmp.eq.s32.totalorder %v1589_v7, %v463_v27  ;;  %vm545_vm8 = vcmp.eq.s32.totalorder %v1592_v9, %v463_v27  ;;  %vm552_vm9 = vcmp.eq.s32.totalorder %v1599_v16, %v463_v27  ;;  %1408 = vmatmul.mubr.msk.f32.gmra.mrb[10].mxu0 %vm753_vm2, %v1871_v43 }
  0x81   : > { %v559_v34 = vsel %vm531_vm6, %v400_v41, 0.0  ;;  %v566_v11 = vsel %vm538_vm7, %v400_v41, 0.0  ;;  %v573_v32 = vsel %vm545_vm8, %v400_v41, 0.0  ;;  %v580_v33 = vsel %vm552_vm9, %v400_v41, 0.0  ;;  %1042 = vmatprep.mubr.f32.mxu0 %v1545_v1 }
  0x82   : > { %v587_v58 = vadd.f32 %v559_v34, %v503_v28  ;;  %v594_v53 = vadd.f32 %v566_v11, %v510_v2  ;;  %v601_v54 = vadd.f32 %v573_v32, %v517_v14  ;;  %v608_v12 = vadd.f32 %v580_v33, %v524_v25 }
  0x83   : > { %v239_v28 = vmul.f32 %v1672_v39, %v1842_v35  ;;  %v247_v27 = vmul.f32 %v1666_v22, %v1854_v36  ;;  %v240_v25 = vmul.f32 %v1662_v4, %v1842_v35  ;;  %v248_v34 = vmul.f32 %v1655_v50, %v1854_v36 }
  0x84   : > { %v1471_v40 = vpack.c.bf16 %v594_v53, %v587_v58  ;;  %v1475_v26 = vpack.c.bf16 %v608_v12, %v601_v54  ;;  %1409 = vmatmul.mubr.msk.f32.gmra.mrb[12].mxu0 %vm753_vm2, %v1883_v47 }
  0x85   : > { %1048 = vmatprep.mubr.f32.mxu0 %v1545_v1  ;;  %v236_v1 = vmul.f32 %v1632_v23, %v1842_v35  ;;  %v246_v23 = vmul.f32 %v1618_v62, %v1854_v36  ;;  %v254_v32 = vadd.f32 %v247_v27, %v239_v28  ;;  %v255_v54 = vadd.f32 %v248_v34, %v240_v25 }
  0x86   : > { %1472 = vmatprep.subr.bf16.mxu1 %v1471_v40 }
  0x87   : > { %1474 = vmatpush3.bf16.msra.mxu1 %v1471_v40  ;;  %v251_v13 = vadd.f32 %v244_v20, %v236_v1  ;;  %v262_v22 = vadd.f32 %v1863_v42, %v254_v32  ;;  %v263_v50 = vadd.f32 %v1863_v42, %v255_v54 }
  0x88   : > { %1477 = vmatprep.subr.msk.bf16.mxu1 %vm1775_vm11, %v1475_v26  ;;  %1410 = vmatmul.mubr.msk.f32.gmra.mrb[14].mxu0 %vm753_vm2, %v1897_v48 }
  0x89   : > { %v259_v17 = vadd.f32 %v1863_v42, %v251_v13  ;;  %v300_v20 = vadd.f32 1.0, %v262_v22 }
  0x8b   : > { %1480 = vmatpush3.bf16.msk.msra.mxu1 %vm1775_vm11, %v1475_v26  ;;  %v297_v60 = vadd.f32 1.0, %v259_v17 }
  0x8d   : > { %v304_v45 = vmul.f32 14.0, %v297_v60 }
  0x8e   : > { %1436 = vmatmul.mubr.msk.f32.vlgmr.msra.gmra.mrb[8].mxu1 %vm753_vm2, %v1871_v43  ;;  %v237_v43 = vmul.f32 %v1640_v31, %v1842_v35  ;;  %v324_v31 = vmin.f32 %v317_v44, 27.0  ;;  %v241_v44 = vmul.f32 %v1838_v29, %v1842_v35 }
  0x8f   : > { %1438 = vmatprep.mubr.msk.f32.mxu1 %vm753_vm2, %v1883_v47  ;;  %v245_v47 = vmul.f32 %v1622_v5, %v1854_v36  ;;  %v1380_v19 = vadd.f32 -0.5, %v304_v45  ;;  %v249_v45 = vmul.f32 %v1856_v49, %v1854_v36 }
  0x90   : > { %v366_v38 = vfloor.f32 %v324_v31 }
  0x91   : > { %v252_v59 = vadd.f32 %v245_v47, %v237_v43  ;;  %v318_v63 = vmax.f32 %v1380_v19, 0.0  ;;  %v256_v49 = vadd.f32 %v249_v45, %v241_v44 }
  0x92   : > { %1439 = vmatmul.mubr.msk.f32.gmra.mrb[10].mxu1 %vm753_vm2, %v1897_v48  ;;  %v238_v48 = vmul.f32 %v1634_v24, %v1842_v35  ;;  %v1482_v51 = vtrunc.f32 %v366_v38  ;;  %v380_v33 = vsub.f32 %v324_v31, %v366_v38 }
  0x93   : > { %v260_v30 = vadd.f32 %v1863_v42, %v252_v59  ;;  %v325_v62 = vmin.f32 %v318_v63, 27.0 }
  0x94   : > { %v253_v18 = vadd.f32 %v246_v23, %v238_v48  ;;  %v1970_v41 = vcvt.f32.s32 %v1482_v51  ;;  %v387_v40 = vsub.f32 1.0, %v380_v33  ;;  %v301_v48 = vadd.f32 1.0, %v263_v50 }
  0x95   : > { %v298_v15 = vadd.f32 1.0, %v260_v30  ;;  %v367_v57 = vfloor.f32 %v325_v62 }
  0x96   : > { %v261_v21 = vadd.f32 %v1863_v42, %v253_v18  ;;  %v422_v55 = vadd.s32 1, %v1970_v41  ;;  %vm609_vm2 = vcmp.eq.s32.totalorder %v1585_v3, %v1970_v41  ;;  %vm616_vm12 = vcmp.eq.s32.totalorder %v1589_v7, %v1970_v41 }
  0x97   : > { %v305_v24 = vmul.f32 14.0, %v298_v15  ;;  %v1484_v2 = vtrunc.f32 %v367_v57  ;;  %vm623_vm15 = vcmp.eq.s32.totalorder %v1592_v9, %v1970_v41  ;;  %v637_v10 = vsel %vm609_vm2, %v387_v40, 0.0 }
  0x98   : > { %v299_v5 = vadd.f32 1.0, %v261_v21  ;;  %vm429_vm11 = vcmp.lt.s32.totalorder %v422_v55, 27  ;;  %v1997_v17 = vsub.f32 %v325_v62, %v367_v57  ;;  %v644_v43 = vsel %vm616_vm12, %v387_v40, 0.0 }
  0x99   : > { %v1381_v6 = vadd.f32 -0.5, %v305_v24  ;;  %v1981_v58 = vcvt.f32.s32 %v1484_v2  ;;  %v430_v39 = vsel %vm429_vm11, %v422_v55, 27  ;;  %v651_v56 = vsel %vm623_vm15, %v387_v40, 0.0 }
  0x9a   : > { %v306_v8 = vmul.f32 14.0, %v299_v5  ;;  %vm665_vm10 = vcmp.eq.s32.totalorder %v1585_v3, %v430_v39  ;;  %vm672_vm14 = vcmp.eq.s32.totalorder %v1589_v7, %v430_v39  ;;  %vm679_vm0 = vcmp.eq.s32.totalorder %v1592_v9, %v430_v39 }
  0x9b   : > { %v319_v46 = vmax.f32 %v1381_v6, 0.0  ;;  %v423_v26 = vadd.s32 1, %v1981_v58  ;;  %v693_v13 = vsel %vm665_vm10, %v380_v33, 0.0  ;;  %v700_v47 = vsel %vm672_vm14, %v380_v33, 0.0 }
  0x9c   : > { %v1382_v52 = vadd.f32 -0.5, %v306_v8  ;;  %v707_v60 = vsel %vm679_vm0, %v380_v33, 0.0  ;;  %v307_v18 = vmul.f32 14.0, %v300_v20  ;;  %v2007_v30 = vadd.f32 %v693_v13, %v637_v10 }
  0x9d   : > { %v326_v14 = vmin.f32 %v319_v46, 27.0  ;;  %vm431_vm1 = vcmp.lt.s32.totalorder %v423_v26, 27  ;;  %v2009_v21 = vadd.f32 %v700_v47, %v644_v43  ;;  %v2013_v19 = vsub.f32 1.0, %v1997_v17 }
  0x9e   : > { %v320_v61 = vmax.f32 %v1382_v52, 0.0  ;;  %v2001_v59 = vsel %vm431_vm1, %v423_v26, 27  ;;  %vm630_vm3 = vcmp.eq.s32.totalorder %v1599_v16, %v1970_v41  ;;  %vm686_vm4 = vcmp.eq.s32.totalorder %v1599_v16, %v430_v39 }
  0x9f   : > { %v368_v53 = vfloor.f32 %v326_v14  ;;  %v308_v15 = vmul.f32 14.0, %v301_v48  ;;  %vm610_vm5 = vcmp.eq.s32.totalorder %v1585_v3, %v1981_v58  ;;  %vm666_vm6 = vcmp.eq.s32.totalorder %v1585_v3, %v2001_v59 }
  0xa0   : > { %v327_v11 = vmin.f32 %v320_v61, 27.0  ;;  %v2023_v35 = vadd.f32 %v707_v60, %v651_v56  ;;  %vm617_vm7 = vcmp.eq.s32.totalorder %v1589_v7, %v1981_v58  ;;  %vm673_vm8 = vcmp.eq.s32.totalorder %v1589_v7, %v2001_v59 }
  0xa1   : > { %v1486_v1 = vtrunc.f32 %v368_v53  ;;  %v1383_v36 = vadd.f32 -0.5, %v307_v18  ;;  %v2029_v5 = vsub.f32 %v326_v14, %v368_v53  ;;  %v658_v38 = vsel %vm630_vm3, %v387_v40, 0.0 }
  0xa2   : > { %v369_v12 = vfloor.f32 %v327_v11  ;;  %v714_v63 = vsel %vm686_vm4, %v380_v33, 0.0  ;;  %v638_v24 = vsel %vm610_vm5, %v2013_v19, 0.0  ;;  %v694_v8 = vsel %vm666_vm6, %v1997_v17, 0.0 }
  0xa3   : > { %v1995_v37 = vcvt.f32.s32 %v1486_v1  ;;  %vm624_vm11 = vcmp.eq.s32.totalorder %v1592_v9, %v1981_v58  ;;  %v1384_v51 = vadd.f32 -0.5, %v308_v15  ;;  %v645_v62 = vsel %vm617_vm7, %v2013_v19, 0.0 }
  0xa4   : > { %v1488_v4 = vtrunc.f32 %v369_v12  ;;  %v701_v6 = vsel %vm673_vm8, %v1997_v17, 0.0  ;;  %v2037_v52 = vsub.f32 %v327_v11, %v369_v12  ;;  %v2039_v57 = vadd.f32 %v714_v63, %v658_v38 }
  0xa5   : > { %v424_v31 = vadd.s32 1, %v1995_v37  ;;  %v321_v46 = vmax.f32 %v1383_v36, 0.0  ;;  %v264_v61 = vadd.f32 %v1863_v42, %v256_v49  ;;  %v722_v55 = vadd.f32 %v694_v8, %v638_v24 }
  0xa6   : > { %v1999_v23 = vcvt.f32.s32 %v1488_v4  ;;  %v389_v28 = vsub.f32 1.0, %v2029_v5  ;;  %v652_v27 = vsel %vm624_vm11, %v2013_v19, 0.0  ;;  %vm680_vm10 = vcmp.eq.s32.totalorder %v1592_v9, %v2001_v59 }
  0xa7   : > { %vm433_vm9 = vcmp.lt.s32.totalorder %v424_v31, 27  ;;  %v2046_v2 = vadd.f32 %v701_v6, %v645_v62  ;;  %vm611_vm12 = vcmp.eq.s32.totalorder %v1585_v3, %v1995_v37  ;;  %v322_v25 = vmax.f32 %v1384_v51, 0.0 }
  0xa8   : > { %v425_v29 = vadd.s32 1, %v1999_v23  ;;  %v434_v41 = vsel %vm433_vm9, %v424_v31, 27  ;;  %v2054_v42 = vsub.f32 1.0, %v2037_v52  ;;  %vm612_vm15 = vcmp.eq.s32.totalorder %v1585_v3, %v1999_v23 }
  0xa9   : > { %vm667_vm14 = vcmp.eq.s32.totalorder %v1585_v3, %v434_v41  ;;  %vm618_vm0 = vcmp.eq.s32.totalorder %v1589_v7, %v1995_v37  ;;  %vm674_vm1 = vcmp.eq.s32.totalorder %v1589_v7, %v434_v41  ;;  %vm619_vm3 = vcmp.eq.s32.totalorder %v1589_v7, %v1999_v23 }
  0xaa   : > { %vm435_vm2 = vcmp.lt.s32.totalorder %v425_v29, 27  ;;  %v2063_v34 = vmin.f32 %v321_v46, 27.0  ;;  %v302_v11 = vadd.f32 1.0, %v264_v61  ;;  %v639_v32 = vsel %vm611_vm12, %v389_v28, 0.0 }
  0xab   : > { %v2050_v14 = vsel %vm435_vm2, %v425_v29, 27  ;;  %v708_v33 = vsel %vm680_vm10, %v1997_v17, 0.0  ;;  %v695_v53 = vsel %vm667_vm14, %v2029_v5, 0.0  ;;  %v646_v54 = vsel %vm618_vm0, %v389_v28, 0.0 }
  0xac   : > { %vm668_vm4 = vcmp.eq.s32.totalorder %v1585_v3, %v2050_v14  ;;  %vm675_vm5 = vcmp.eq.s32.totalorder %v1589_v7, %v2050_v14  ;;  %vm625_vm6 = vcmp.eq.s32.totalorder %v1592_v9, %v1995_v37  ;;  %v2073_v39 = vmin.f32 %v322_v25, 27.0 }
  0xad   : > { %v640_v12 = vsel %vm612_vm15, %v2054_v42, 0.0  ;;  %v702_v22 = vsel %vm674_vm1, %v2029_v5, 0.0  ;;  %v647_v40 = vsel %vm619_vm3, %v2054_v42, 0.0  ;;  %vm681_vm7 = vcmp.eq.s32.totalorder %v1592_v9, %v434_v41 }
  0xae   : > { %v696_v26 = vsel %vm668_vm4, %v2037_v52, 0.0  ;;  %v703_v1 = vsel %vm675_vm5, %v2037_v52, 0.0  ;;  %v370_v50 = vfloor.f32 %v2063_v34  ;;  %v309_v4 = vmul.f32 14.0, %v302_v11 }
  0xaf   : > { %v723_v20 = vadd.f32 %v695_v53, %v639_v32  ;;  %v736_v10 = vadd.f32 %v708_v33, %v652_v27  ;;  %v653_v13 = vsel %vm625_vm6, %v389_v28, 0.0  ;;  %vm626_vm8 = vcmp.eq.s32.totalorder %v1592_v9, %v1999_v23 }
  0xb0   : > { %v709_v43 = vsel %vm681_vm7, %v2029_v5, 0.0  ;;  %vm682_vm9 = vcmp.eq.s32.totalorder %v1592_v9, %v2050_v14  ;;  %vm632_vm11 = vcmp.eq.s32.totalorder %v1599_v16, %v1995_v37  ;;  %v371_v47 = vfloor.f32 %v2073_v39 }
  0xb1   : > { %v724_v48 = vadd.f32 %v696_v26, %v640_v12  ;;  %v730_v56 = vadd.f32 %v702_v22, %v646_v54  ;;  %v731_v60 = vadd.f32 %v703_v1, %v647_v40  ;;  %vm688_vm2 = vcmp.eq.s32.totalorder %v1599_v16, %v434_v41 }
  0xb2   : > { %v654_v44 = vsel %vm626_vm8, %v2054_v42, 0.0  ;;  %v1490_v45 = vtrunc.f32 %v370_v50  ;;  %v1385_v31 = vadd.f32 -0.5, %v309_v4  ;;  %v737_v36 = vadd.f32 %v709_v43, %v653_v13 }
  0xb3   : > { %v710_v37 = vsel %vm682_vm9, %v2037_v52, 0.0  ;;  %v660_v49 = vsel %vm632_vm11, %v389_v28, 0.0  ;;  %v716_v24 = vsel %vm688_vm2, %v2029_v5, 0.0  ;;  %vm631_vm10 = vcmp.eq.s32.totalorder %v1599_v16, %v1981_v58 }
  0xb4   : > { %v1492_v8 = vtrunc.f32 %v371_v47  ;;  %vm687_vm12 = vcmp.eq.s32.totalorder %v1599_v16, %v2001_v59  ;;  %v1547_v6 = vmov 1966171168   ;;  %vm633_vm14 = vcmp.eq.s32.totalorder %v1599_v16, %v1999_v23 }
  0xb5   : > { %vm689_vm15 = vcmp.eq.s32.totalorder %v1599_v16, %v2050_v14  ;;  %v2105_v5 = vcvt.f32.s32 %v1490_v45  ;;  %v323_v61 = vmax.f32 %v1385_v31, 0.0  ;;  %v738_v27 = vadd.f32 %v710_v37, %v654_v44 }
  0xb6   : > { %v744_v25 = vadd.f32 %v716_v24, %v660_v49  ;;  %v659_v11 = vsel %vm631_vm10, %v2013_v19, 0.0  ;;  %v715_v33 = vsel %vm687_vm12, %v1997_v17, 0.0  ;;  %v661_v53 = vsel %vm633_vm14, %v2054_v42, 0.0 }
  0xb7   : > { %v2118_v54 = vcvt.f32.s32 %v1492_v8  ;;  %v717_v58 = vsel %vm689_vm15, %v2037_v52, 0.0  ;;  %v426_v1 = vadd.s32 1, %v2105_v5  ;;  %v2125_v59 = vmin.f32 %v323_v61, 27.0 }
  0xb8   : > { %v2131_v13 = vsub.f32 %v2063_v34, %v370_v50  ;;  %v745_v45 = vadd.f32 %v717_v58, %v661_v53  ;;  %vm613_vm1 = vcmp.eq.s32.totalorder %v1585_v3, %v2105_v5  ;;  %vm620_vm4 = vcmp.eq.s32.totalorder %v1589_v7, %v2105_v5 }
  0xb9   : > { %vm437_vm0 = vcmp.lt.s32.totalorder %v426_v1, 27  ;;  %v372_v34 = vfloor.f32 %v2125_v59  ;;  %vm614_vm5 = vcmp.eq.s32.totalorder %v1585_v3, %v2118_v54  ;;  %vm627_vm7 = vcmp.eq.s32.totalorder %v1592_v9, %v2105_v5 }
  0xba   : > { %vm621_vm11 = vcmp.eq.s32.totalorder %v1589_v7, %v2118_v54  ;;  %vm628_vm14 = vcmp.eq.s32.totalorder %v1592_v9, %v2118_v54 }
 0x132   : > { %v854_v18 = vpop.f32.mrb[0].mxu0 }
 0x133   : > { %v1140_v15 = vmul.f32 %v854_v18, %v2007_v30  ;;  %v856_v29 = vpop.f32.mrb[1].mxu0  ;;  %v1254_v30 = vunpack.c.l.s4 %v1547_v6 }
 0x134   : > { %v1141_v38 = vmul.f32 %v856_v29, %v722_v55 }
 0x135   : > { %v943_v63 = vpop.f32.mrb[0].mxu1  ;;  %v1255_v40 = vunpack.c.0.s8 %v1254_v30  ;;  %v1494_v30 = vtrunc.f32 %v372_v34 }
 0x136   : > { %v1142_v51 = vmul.f32 %v943_v63, %v723_v20  ;;  %v945_v62 = vpop.f32.mrb[1].mxu1  ;;  %v860_v41 = vpop.f32.mrb[2].mxu0  ;;  %v743_v20 = vadd.f32 %v715_v33, %v659_v11 }
 0x137   : > { %v1143_v46 = vmul.f32 %v945_v62, %v724_v48  ;;  %v1147_v55 = vmul.f32 %v860_v41, %v2009_v21  ;;  %v862_v28 = vpop.f32.mrb[3].mxu0  ;;  %v2134_v48 = vsub.f32 %v2073_v39, %v371_v47  ;;  %v2143_v47 = vsub.f32 1.0, %v2131_v13 }
 0x138   : > { %v1148_v23 = vmul.f32 %v862_v28, %v2046_v2 }
 0x139   : > { %v949_v32 = vpop.f32.mrb[2].mxu1  ;;  %v1168_v21 = vadd.f32 %v1147_v55, %v1140_v15  ;;  %v641_v61 = vsel %vm613_vm1, %v2143_v47, 0.0 }
 0x13a   : > { %v1149_v12 = vmul.f32 %v949_v32, %v730_v56  ;;  %v951_v22 = vpop.f32.mrb[3].mxu1  ;;  %v1178_v19 = vadd.f32 %v1148_v23, %v1141_v38  ;;  %v866_v2 = vpop.f32.mrb[4].mxu0  ;;  %v427_v56 = vadd.s32 1, %v2118_v54  ;;  %v2148_v38 = vsub.f32 1.0, %v2134_v48 }
 0x13b   : > { %v1150_v26 = vmul.f32 %v951_v22, %v731_v60  ;;  %v1154_v17 = vmul.f32 %v866_v2, %v2023_v35  ;;  %v868_v4 = vpop.f32.mrb[5].mxu0  ;;  %v2138_v35 = vsub.s32 %v1255_v40, %v1585_v3  ;;  %v648_v32 = vsel %vm620_vm4, %v2143_v47, 0.0 }
 0x13c   : > { %v1188_v42 = vadd.f32 %v1149_v12, %v1142_v51  ;;  %v1155_v43 = vmul.f32 %v868_v4, %v736_v10  ;;  %vm439_vm3 = vcmp.lt.s32.totalorder %v427_v56, 27  ;;  %v2151_v51 = vsel %vm437_vm0, %v426_v1, 27 }
 0x13d   : > { %v1198_v14 = vadd.f32 %v1150_v26, %v1143_v46  ;;  %v955_v52 = vpop.f32.mrb[4].mxu1  ;;  %v1169_v60 = vadd.f32 %v1168_v21, %v1154_v17  ;;  %v2163_v55 = vsel %vm439_vm3, %v427_v56, 27  ;;  %vm669_vm6 = vcmp.eq.s32.totalorder %v1585_v3, %v2151_v51 }
 0x13e   : > { %v1156_v18 = vmul.f32 %v955_v52, %v737_v36  ;;  %v957_v44 = vpop.f32.mrb[5].mxu1  ;;  %v1179_v31 = vadd.f32 %v1178_v19, %v1155_v43  ;;  %v872_v29 = vpop.f32.mrb[6].mxu0  ;;  %vm670_vm8 = vcmp.eq.s32.totalorder %v1585_v3, %v2163_v55  ;;  %v2178_v21 = vcvt.f32.s32 %v1494_v30 }
 0x13f   : > { %v1157_v15 = vmul.f32 %v957_v44, %v738_v27  ;;  %v1161_v10 = vmul.f32 %v872_v29, %v2039_v57  ;;  %v874_v39 = vpop.f32.mrb[7].mxu0  ;;  %v642_v40 = vsel %vm614_vm5, %v2148_v38, 0.0  ;;  %vm676_vm9 = vcmp.eq.s32.totalorder %v1589_v7, %v2151_v51 }
 0x140   : > { %v1189_v50 = vadd.f32 %v1188_v42, %v1156_v18  ;;  %v1162_v49 = vmul.f32 %v874_v39, %v743_v20  ;;  %vm677_vm2 = vcmp.eq.s32.totalorder %v1589_v7, %v2163_v55  ;;  %v697_v1 = vsel %vm669_vm6, %v2131_v13, 0.0 }
 0x141   : > { %v1199_v36 = vadd.f32 %v1198_v14, %v1157_v15  ;;  %v961_v37 = vpop.f32.mrb[6].mxu1  ;;  %v1170_v63 = vsel %vm766_vm13, %v1161_v10, 0.0  ;;  %v698_v17 = vsel %vm670_vm8, %v2134_v48, 0.0  ;;  %v428_v20 = vadd.s32 1, %v2178_v21 }
 0x142   : > { %v1163_v24 = vmul.f32 %v961_v37, %v744_v25  ;;  %v963_v8 = vpop.f32.mrb[7].mxu1  ;;  %v1171_v57 = vadd.f32 %v1170_v63, %v1169_v60  ;;  %v1180_v62 = vsel %vm766_vm13, %v1162_v49, 0.0  ;;  %v704_v43 = vsel %vm676_vm9, %v2131_v13, 0.0 }
 0x143   : > { %v1164_v6 = vmul.f32 %v963_v8, %v745_v45  ;;  %v1181_v46 = vadd.f32 %v1180_v62, %v1179_v31  ;;  %v649_v56 = vsel %vm621_vm11, %v2148_v38, 0.0  ;;  %v705_v60 = vsel %vm677_vm2, %v2134_v48, 0.0 }
 0x144   : > { %v1190_v41 = vsel %vm766_vm13, %v1163_v24, 0.0  ;;  %v1172_v28 = vrot.slane %v1171_v57, 4  ;;  %v725_v45 = vadd.f32 %v697_v1, %v641_v61  ;;  %v726_v31 = vadd.f32 %v698_v17, %v642_v40 }
 0x145   : > { %v1191_v27 = vadd.f32 %v1190_v41, %v1189_v50  ;;  %v1200_v25 = vsel %vm766_vm13, %v1164_v6, 0.0  ;;  %v1182_v11 = vrot.slane %v1181_v46, 4  ;;  %v732_v50 = vadd.f32 %v704_v43, %v648_v32 }
 0x146   : > { %v1201_v23 = vadd.f32 %v1200_v25, %v1199_v36  ;;  %v1173_v33 = vadd.f32 %v1172_v28, %v1171_v57  ;;  %vm683_vm10 = vcmp.eq.s32.totalorder %v1592_v9, %v2151_v51  ;;  %vm441_vm12 = vcmp.lt.s32.totalorder %v428_v20, 27 }
 0x147   : > { %v1192_v53 = vrot.slane %v1191_v27, 4  ;;  %v1183_v12 = vadd.f32 %v1182_v11, %v1181_v46  ;;  %v733_v36 = vadd.f32 %v705_v60, %v649_v56  ;;  %vm684_vm15 = vcmp.eq.s32.totalorder %v1592_v9, %v2163_v55 }
 0x148   : > { %v1202_v22 = vrot.slane %v1201_v23, 4  ;;  %v1174_v58 = vrot.slane %v1173_v33, 2  ;;  %v655_v62 = vsel %vm627_vm7, %v2143_v47, 0.0  ;;  %v711_v6 = vsel %vm683_vm10, %v2131_v13, 0.0 }
 0x149   : > { %v1193_v19 = vadd.f32 %v1192_v53, %v1191_v27  ;;  %v1184_v2 = vrot.slane %v1183_v12, 2  ;;  %vm634_vm0 = vcmp.eq.s32.totalorder %v1599_v16, %v2105_v5  ;;  %v386_v61 = vsub.f32 %v2125_v59, %v372_v34 }
 0x14a   : > { %v1203_v26 = vadd.f32 %v1202_v22, %v1201_v23  ;;  %v1175_v42 = vadd.f32 %v1174_v58, %v1173_v33  ;;  %v656_v28 = vsel %vm628_vm14, %v2148_v38, 0.0  ;;  %v712_v27 = vsel %vm684_vm15, %v2134_v48, 0.0 }
 0x14b   : > { %v1194_v4 = vrot.slane %v1193_v19, 2  ;;  %v1185_v14 = vadd.f32 %v1184_v2, %v1183_v12  ;;  %vm690_vm1 = vcmp.eq.s32.totalorder %v1599_v16, %v2151_v51  ;;  %vm635_vm3 = vcmp.eq.s32.totalorder %v1599_v16, %v2118_v54 }
 0x14c   : > { %v1204_v52 = vrot.slane %v1203_v26, 2  ;;  %v1176_v18 = vrot.slane %v1175_v42, 1  ;;  %vm691_vm4 = vcmp.eq.s32.totalorder %v1599_v16, %v2163_v55  ;;  %v442_v5 = vsel %vm441_vm12, %v428_v20, 27 }
 0x14d   : > { %v1195_v44 = vadd.f32 %v1194_v4, %v1193_v19  ;;  %v1186_v15 = vrot.slane %v1185_v14, 1  ;;  %v739_v32 = vadd.f32 %v711_v6, %v655_v62  ;;  %v662_v33 = vsel %vm634_vm0, %v2143_v47, 0.0 }
 0x14e   : > { %v1205_v29 = vadd.f32 %v1204_v52, %v1203_v26  ;;  %v1177_v10 = vadd.f32 %v1176_v18, %v1175_v42  ;;  %v740_v12 = vadd.f32 %v712_v27, %v656_v28  ;;  %v718_v22 = vsel %vm690_vm1, %v2131_v13, 0.0 }
 0x14f   : > { %v1196_v39 = vrot.slane %v1195_v44, 1  ;;  %v1187_v37 = vadd.f32 %v1186_v15, %v1185_v14  ;;  %v1032_v63 = vpop.f32.mrb[8].mxu0  ;;  %v663_v54 = vsel %vm635_vm3, %v2148_v38, 0.0  ;;  %v719_v58 = vsel %vm691_vm4, %v2134_v48, 0.0 }
 0x150   : > { %v1206_v49 = vrot.slane %v1205_v29, 1  ;;  %v1144_v8 = vmul.f32 %v1032_v63, %v725_v45  ;;  %v1034_v57 = vpop.f32.mrb[9].mxu0  ;;  %v393_v19 = vsub.f32 1.0, %v386_v61  ;;  %vm622_vm5 = vcmp.eq.s32.totalorder %v1589_v7, %v2178_v21 }
 0x151   : > { %v1197_v24 = vadd.f32 %v1196_v39, %v1195_v44  ;;  %v1250_v30 = vcombine.low %v1177_v10, %v1187_v37  ;;  %v1145_v46 = vmul.f32 %v1034_v57, %v726_v31  ;;  %vm678_vm6 = vcmp.eq.s32.totalorder %v1589_v7, %v442_v5 }
 0x152   : > { %v1207_v41 = vadd.f32 %v1206_v49, %v1205_v29  ;;  %v746_v17 = vadd.f32 %v718_v22, %v662_v33  ;;  %vm615_vm7 = vcmp.eq.s32.totalorder %v1585_v3, %v2178_v21  ;;  %vm671_vm8 = vcmp.eq.s32.totalorder %v1585_v3, %v442_v5 }
 0x153   : > { %v2217_v25 = vrot.slane %v1250_v30, %v2138_v35  ;;  %v1038_v23 = vpop.f32.mrb[10].mxu0  ;;  %v747_v48 = vadd.f32 %v719_v58, %v663_v54  ;;  %v650_v42 = vsel %vm622_vm5, %v393_v19, 0.0  ;;  %v706_v4 = vsel %vm678_vm6, %v386_v61, 0.0 }
 0x154   : > { %v1251_v11 = vcombine.low %v1197_v24, %v1207_v41  ;;  %v1151_v59 = vmul.f32 %v1038_v23, %v732_v50  ;;  %v1040_v34 = vpop.f32.mrb[11].mxu0  ;;  %vm636_vm9 = vcmp.eq.s32.totalorder %v1599_v16, %v2178_v21  ;;  %v643_v14 = vsel %vm615_vm7, %v393_v19, 0.0 }
 0x155   : > { %v1152_v53 = vmul.f32 %v1040_v34, %v733_v36  ;;  %v699_v7 = vsel %vm671_vm8, %v386_v61, 0.0  ;;  %vm692_vm11 = vcmp.eq.s32.totalorder %v1599_v16, %v442_v5  ;;  %vm629_vm2 = vcmp.eq.s32.totalorder %v1592_v9, %v2178_v21 }
 0x156   : > { %v2226_v51 = vrot.slane %v1251_v11, %v2138_v35  ;;  %v1208_v40 = vadd.f32 %v1151_v59, %v1144_v8  ;;  %vm685_vm10 = vcmp.eq.s32.totalorder %v1592_v9, %v442_v5  ;;  %v734_v60 = vadd.f32 %v706_v4, %v650_v42 }
 0x157   : > { %v1218_v2 = vadd.f32 %v1152_v53, %v1145_v46  ;;  %v1044_v26 = vpop.f32.mrb[12].mxu0  ;;  %v664_v18 = vsel %vm636_vm9, %v393_v19, 0.0  ;;  %v727_v45 = vadd.f32 %v699_v7, %v643_v14  ;;  %v720_v31 = vsel %vm692_vm11, %v386_v61, 0.0 }
 0x158   : > { %v1281_v55 = vcombine.low %v2217_v25, %v2226_v51  ;;  %v1158_v47 = vmul.f32 %v1044_v26, %v739_v32  ;;  %v1046_v1 = vpop.f32.mrb[13].mxu0  ;;  %v657_v50 = vsel %vm629_vm2, %v393_v19, 0.0  ;;  %v713_v10 = vsel %vm685_vm10, %v386_v61, 0.0 }
 0x159   : > { %v1159_v13 = vmul.f32 %v1046_v1, %v740_v12  ;;  %vm1228_vm12 = vcmask 130048   ;;  %v748_v49 = vadd.f32 %v720_v31, %v664_v18  ;;  %v741_v24 = vadd.f32 %v713_v10, %v657_v50 }
 0x15a   : > { %v1209_v38 = vadd.f32 %v1208_v40, %v1158_v47  ;;  %vm1301_vm14 = vcmp.lt.s32.totalorder %v134_v0, 784 }
 0x15b   : > { %v1219_v20 = vadd.f32 %v1218_v2, %v1159_v13  ;;  %v1050_v43 = vpop.f32.mrb[14].mxu0 }
 0x15c   : > { %v1165_v52 = vmul.f32 %v1050_v43, %v746_v17  ;;  %v1052_v56 = vpop.f32.mrb[15].mxu0 }
 0x15d   : > { %v1166_v3 = vmul.f32 %v1052_v56, %v747_v48 }
 0x15e   : > { %v1210_v44 = vsel %vm766_vm13, %v1165_v52, 0.0 }
 0x15f   : > { %v1211_v15 = vadd.f32 %v1210_v44, %v1209_v38  ;;  %v1220_v29 = vsel %vm766_vm13, %v1166_v3, 0.0  ;;  %vm1234_vm13 = vcmask 125952   ;;  %v1289_v38 = vrot.slane %v1281_v55, %v2138_v35 }
 0x160   : > { %v1221_v16 = vadd.f32 %v1220_v29, %v1219_v20 }
 0x161   : > { %v1437_v39 = vpop.f32.mrb[8].mxu1  ;;  %v1212_v36 = vrot.slane %v1211_v15, 4 }
 0x162   : > { %v1153_v37 = vmul.f32 %v1437_v39, %v734_v60  ;;  %v1121_v21 = vpop.f32.mrb[9].mxu1  ;;  %v1222_v9 = vrot.slane %v1221_v16, 4 }
 0x163   : > { %v1146_v63 = vmul.f32 %v1121_v21, %v727_v45  ;;  %v1213_v8 = vadd.f32 %v1212_v36, %v1211_v15 }
 0x164   : > { %v1230_v57 = vsel %vm1228_vm12, %v1153_v37, 0.0  ;;  %v1223_v62 = vadd.f32 %v1222_v9, %v1221_v16 }
 0x165   : > { %v1229_v6 = vsel %vm1228_vm12, %v1146_v63, 0.0  ;;  %v1440_v30 = vpop.f32.mrb[10].mxu1  ;;  %v1214_v41 = vrot.slane %v1213_v8, 2 }
 0x166   : > { %v1231_v46 = vadd.f32 %v1230_v57, %v1229_v6  ;;  %v1167_v61 = vmul.f32 %v1440_v30, %v748_v49  ;;  %v1131_v28 = vpop.f32.mrb[11].mxu1  ;;  %v1224_v27 = vrot.slane %v1223_v62, 2 }
 0x167   : > { %v1160_v11 = vmul.f32 %v1131_v28, %v741_v24  ;;  %v1215_v23 = vadd.f32 %v1214_v41, %v1213_v8 }
 0x168   : > { %v1225_v5 = vadd.f32 %v1224_v27, %v1223_v62  ;;  %v1235_v59 = vsel %vm1234_vm13, %v1167_v61, 0.0 }
 0x169   : > { %v1232_v34 = vsel %vm1228_vm12, %v1160_v11, 0.0  ;;  %v1216_v32 = vrot.slane %v1215_v23, 1 }
 0x16a   : > { %v1233_v33 = vadd.f32 %v1232_v34, %v1231_v46  ;;  %v1226_v53 = vrot.slane %v1225_v5, 1 }
 0x16b   : > { %v1217_v12 = vadd.f32 %v1216_v32, %v1215_v23 }
 0x16c   : > { %v1236_v22 = vadd.f32 %v1235_v59, %v1233_v33  ;;  %v1227_v40 = vadd.f32 %v1226_v53, %v1225_v5 }
 0x16e   : > { %v1237_v54 = vrot.slane %v1236_v22, 4  ;;  %v1252_v58 = vcombine.low %v1217_v12, %v1227_v40 }
 0x170   : > { %v1238_v19 = vadd.f32 %v1237_v54, %v1236_v22  ;;  %v1273_v17 = vrot.slane %v1252_v58, %v2138_v35 }
 0x172   : > { %v1239_v2 = vrot.slane %v1238_v19, 2 }
 0x174   : > { %v1240_v26 = vadd.f32 %v1239_v2, %v1238_v19 }
 0x176   : > { %v1241_v47 = vrot.slane %v1240_v26, 1 }
 0x178   : > { %v1242_v1 = vadd.f32 %v1241_v47, %v1240_v26 }
 0x17a   : > { %v1280_v13 = vrot.slane %v1242_v1, %v2138_v35 }
 0x17c   : > { %v1282_v48 = vcombine.low %v1273_v17, %v1280_v13 }
 0x17e   : > { %v1296_v42 = vrot.slane %v1282_v48, %v2138_v35 }
 0x180   : > { %v1297_v4 = vcombine.low %v1289_v38, %v1296_v42 }
 0x182   : > { %1303 = vst.msk [vmem:[%s121_s6] sm:$0x7f] %vm1301_vm14, %v1297_v4 }
 0x183 PF: > { %s18_s14 = sadd.s32 1, %s1542_s14  }
 0x184   : > { %p15_p9 = scmp.ge.s32.totalorder %s18_s14, 6  }
 0x186   :  { %17 = sbr.rel (!%p15_p9) target bundleno = 16 (0x10), region = 54 }

// kernel: forward.17
= control target key start
LH: loop header
LB: loop body
LE: loop exit
PB: predicated region body
PF: predicated region fallthrough
CT: control target
= control target key end

     0   :  { %s1253_s12 = smov 0   ;;  %s1618_s0 = inlined_call_operand.vmem [shape: f32[2560,25], index: 0, kind: input, shape index: {}]   ;;  %s1619_s1 = inlined_call_operand.vmem [shape: f32[25,10], index: 1, kind: input, shape index: {}]   ;;  %s1620_s2 = inlined_call_operand.vmem [shape: f32[1,10], index: 2, kind: input, shape index: {}]   ;;  %s1621_s3 = inlined_call_operand.vmem [shape: f32[2560,10], index: 3, kind: output, shape index: {}]  }
   0x1 LB: > { %s952_s13 = sadd.s32 4294967295, %s1230_s12   ;;  %p956_p0 = scmp.ge.s32.totalorder %s1230_s12, 1  ;;  %s1230_s12 = sphi %s1253_s12, %s13_s12  }
   0x2   : > { %p138_p1 = scmp.lt.s32.totalorder %s1230_s12, 6 }
   0x4   : > { %p139_p2 = pnand %p956_p0, %p138_p1 }
   0x5   : > { %v238_v0 = vld [vmem:[%s1619_s1] sm:$0xff] (!%p139_p2)  ;;  %v239_v1 = vld [vmem:[%s1619_s1 + $0x8] sm:$0xff] (!%p139_p2)  ;;  %v240_v2 = vld [vmem:[%s1619_s1 + $0x10] sm:$0xff] (!%p139_p2)  ;;  %vm442_vm0 = vcmask (!%p139_p2), 1040384   ;;  %s957_s20 = sshll.u32 (!%p139_p2), %s952_s13, 6  ;;  %vm1232_vm1 = vmmov (!%p139_p2), 1  }
   0x6   : > { %142 = sbr.rel (%p139_p2) target bundleno = 295 (0x127), region = 32  ;;  %v1201_v3 = vpack.c.bf16 (!%p139_p2), %v239_v1, %v238_v0  ;;  %v241_v4 = vld [vmem:[%s1619_s1 + $0x18] sm:$0x1] (!%p139_p2)  ;;  %p163_p3 = scmp.lt.s32.totalorder (!%p139_p2), %s957_s20, 319  ;;  %vm1206_vm2 = vmpackc.low (!%p139_p2), %vm442_vm0, %vm1232_vm1  ;;  %vm249_vm3 = vcmask (!%p139_p2), 203776   ;;  %vm831_vm4 = vcmask (!%p139_p2), 80896  }
   0x7   : > { %v1205_v5 = vpack.c.bf16 (!%p139_p2), %v241_v4, %v240_v2 }
   0x8   : > { %1202 = vmatprep.subr.bf16.mxu0 (!%p139_p2), %v1201_v3  ;;  %1211 = vmatprep.subr.bf16.mxu1 (!%p139_p2), %v1201_v3 }
   0x9   : > { %1204 = vmatpush3.bf16.msra.mxu0 (!%p139_p2), %v1201_v3  ;;  %1213 = vmatpush3.bf16.msra.mxu1 (!%p139_p2), %v1201_v3 }
   0xa   : > { %1207 = vmatprep.subr.msk.bf16.mxu0 (!%p139_p2), %vm1206_vm2, %v1205_v5  ;;  %1212 = vmatprep.subr.msk.bf16.mxu1 (!%p139_p2), %vm1206_vm2, %v1205_v5 }
   0xd   : > { %s1623_s20 = smov (!%p163_p3, %s957_s20), 319  ;;  %1210 = vmatpush3.bf16.msk.msra.mxu0 %vm1206_vm2, %v1205_v5  ;;  %1214 = vmatpush3.bf16.msk.msra.mxu1 %vm1206_vm2, %v1205_v5 }
   0xe   : > { %s958_s23 = sshll.u32 %s1623_s20, 3 }
   0xf   : > { %s1281_s26 = scalar_lea.vmem %s1618_s0, %s958_s23  ;;  %s1421_s4 = scalar_lea.vmem %s1621_s3, %s958_s23 }
  0x10   : > { %v174_v6 = vld [vmem:[%s1281_s26] sm:$0xff]  ;;  %v175_v8 = vld [vmem:[%s1281_s26 + $0x8] sm:$0xff]  ;;  %v176_v10 = vld [vmem:[%s1281_s26 + $0x10] sm:$0xff] }
  0x11   : > { %v206_v7 = vld [vmem:[%s1281_s26 + $0x100] sm:$0xff]  ;;  %v207_v9 = vld [vmem:[%s1281_s26 + $0x108] sm:$0xff]  ;;  %1105 = vmatprep.mubr.msk.f32.mxu0 %vm249_vm3, %v174_v6  ;;  %v208_v11 = vld [vmem:[%s1281_s26 + $0x110] sm:$0xff] }
  0x12   : > { %1153 = vmatprep.mubr.msk.f32.mxu1 %vm249_vm3, %v206_v7  ;;  %1106 = vmatmul.mubr.msk.f32.vlgmr.msra.gmra.mrb[0].mxu0 %vm249_vm3, %v175_v8  ;;  %v177_v12 = vld [vmem:[%s1281_s26 + $0x18] sm:$0xff]  ;;  %v178_v14 = vld [vmem:[%s1281_s26 + $0x20] sm:$0xff]  ;;  %v179_v16 = vld [vmem:[%s1281_s26 + $0x28] sm:$0xff] }
  0x13   : > { %1154 = vmatmul.mubr.msk.f32.vlgmr.msra.gmra.mrb[0].mxu1 %vm249_vm3, %v207_v9  ;;  %1108 = vmatprep.mubr.msk.f32.mxu0 %vm249_vm3, %v176_v10  ;;  %v209_v13 = vld [vmem:[%s1281_s26 + $0x118] sm:$0xff]  ;;  %v210_v15 = vld [vmem:[%s1281_s26 + $0x120] sm:$0xff]  ;;  %v211_v17 = vld [vmem:[%s1281_s26 + $0x128] sm:$0xff] }
  0x14   : > { %1156 = vmatprep.mubr.msk.f32.mxu1 %vm249_vm3, %v208_v11  ;;  %v180_v18 = vld [vmem:[%s1281_s26 + $0x30] sm:$0xff]  ;;  %v181_v20 = vld [vmem:[%s1281_s26 + $0x38] sm:$0xff]  ;;  %v182_v22 = vld [vmem:[%s1281_s26 + $0x40] sm:$0xff] }
  0x15   : > { %v212_v19 = vld [vmem:[%s1281_s26 + $0x130] sm:$0xff]  ;;  %v213_v21 = vld [vmem:[%s1281_s26 + $0x138] sm:$0xff]  ;;  %v214_v23 = vld [vmem:[%s1281_s26 + $0x140] sm:$0xff] }
  0x16   : > { %1109 = vmatmul.mubr.msk.f32.gmra.mrb[2].mxu0 %vm249_vm3, %v177_v12  ;;  %v183_v24 = vld [vmem:[%s1281_s26 + $0x48] sm:$0xff]  ;;  %v184_v26 = vld [vmem:[%s1281_s26 + $0x50] sm:$0xff]  ;;  %v185_v28 = vld [vmem:[%s1281_s26 + $0x58] sm:$0xff] }
  0x17   : > { %1157 = vmatmul.mubr.msk.f32.gmra.mrb[2].mxu1 %vm249_vm3, %v209_v13  ;;  %1111 = vmatprep.mubr.msk.f32.mxu0 %vm249_vm3, %v178_v14  ;;  %v215_v25 = vld [vmem:[%s1281_s26 + $0x148] sm:$0xff]  ;;  %v216_v27 = vld [vmem:[%s1281_s26 + $0x150] sm:$0xff]  ;;  %v217_v29 = vld [vmem:[%s1281_s26 + $0x158] sm:$0xff] }
  0x18   : > { %1159 = vmatprep.mubr.msk.f32.mxu1 %vm249_vm3, %v210_v15  ;;  %v186_v30 = vld [vmem:[%s1281_s26 + $0x60] sm:$0xff]  ;;  %v187_v32 = vld [vmem:[%s1281_s26 + $0x68] sm:$0xff]  ;;  %v188_v34 = vld [vmem:[%s1281_s26 + $0x70] sm:$0xff] }
  0x19   : > { %v218_v31 = vld [vmem:[%s1281_s26 + $0x160] sm:$0xff]  ;;  %v219_v33 = vld [vmem:[%s1281_s26 + $0x168] sm:$0xff]  ;;  %v220_v35 = vld [vmem:[%s1281_s26 + $0x170] sm:$0xff] }
  0x1a   : > { %1112 = vmatmul.mubr.msk.f32.gmra.mrb[4].mxu0 %vm249_vm3, %v179_v16  ;;  %v189_v36 = vld [vmem:[%s1281_s26 + $0x78] sm:$0xff]  ;;  %v190_v38 = vld [vmem:[%s1281_s26 + $0x80] sm:$0xff]  ;;  %v191_v40 = vld [vmem:[%s1281_s26 + $0x88] sm:$0xff] }
  0x1b   : > { %1160 = vmatmul.mubr.msk.f32.gmra.mrb[4].mxu1 %vm249_vm3, %v211_v17  ;;  %1114 = vmatprep.mubr.msk.f32.mxu0 %vm249_vm3, %v180_v18  ;;  %v221_v37 = vld [vmem:[%s1281_s26 + $0x178] sm:$0xff]  ;;  %v222_v39 = vld [vmem:[%s1281_s26 + $0x180] sm:$0xff]  ;;  %v223_v41 = vld [vmem:[%s1281_s26 + $0x188] sm:$0xff] }
  0x1c   : > { %1162 = vmatprep.mubr.msk.f32.mxu1 %vm249_vm3, %v212_v19  ;;  %v192_v42 = vld [vmem:[%s1281_s26 + $0x90] sm:$0xff]  ;;  %v193_v44 = vld [vmem:[%s1281_s26 + $0x98] sm:$0xff]  ;;  %v194_v46 = vld [vmem:[%s1281_s26 + $0xa0] sm:$0xff] }
  0x1d   : > { %v224_v43 = vld [vmem:[%s1281_s26 + $0x190] sm:$0xff]  ;;  %v225_v45 = vld [vmem:[%s1281_s26 + $0x198] sm:$0xff]  ;;  %v226_v47 = vld [vmem:[%s1281_s26 + $0x1a0] sm:$0xff] }
  0x1e   : > { %1115 = vmatmul.mubr.msk.f32.gmra.mrb[6].mxu0 %vm249_vm3, %v181_v20  ;;  %v195_v48 = vld [vmem:[%s1281_s26 + $0xa8] sm:$0xff]  ;;  %v196_v50 = vld [vmem:[%s1281_s26 + $0xb0] sm:$0xff]  ;;  %v197_v52 = vld [vmem:[%s1281_s26 + $0xb8] sm:$0xff] }
  0x1f   : > { %1163 = vmatmul.mubr.msk.f32.gmra.mrb[6].mxu1 %vm249_vm3, %v213_v21  ;;  %1117 = vmatprep.mubr.msk.f32.mxu0 %vm249_vm3, %v182_v22  ;;  %v227_v49 = vld [vmem:[%s1281_s26 + $0x1a8] sm:$0xff]  ;;  %v228_v51 = vld [vmem:[%s1281_s26 + $0x1b0] sm:$0xff]  ;;  %v229_v53 = vld [vmem:[%s1281_s26 + $0x1b8] sm:$0xff] }
  0x20   : > { %1165 = vmatprep.mubr.msk.f32.mxu1 %vm249_vm3, %v214_v23  ;;  %v198_v54 = vld [vmem:[%s1281_s26 + $0xc0] sm:$0xff]  ;;  %v199_v56 = vld [vmem:[%s1281_s26 + $0xc8] sm:$0xff]  ;;  %v200_v58 = vld [vmem:[%s1281_s26 + $0xd0] sm:$0xff] }
  0x21   : > { %v230_v55 = vld [vmem:[%s1281_s26 + $0x1c0] sm:$0xff]  ;;  %v231_v57 = vld [vmem:[%s1281_s26 + $0x1c8] sm:$0xff]  ;;  %v232_v59 = vld [vmem:[%s1281_s26 + $0x1d0] sm:$0xff] }
  0x22   : > { %1118 = vmatmul.mubr.msk.f32.gmra.mrb[8].mxu0 %vm249_vm3, %v183_v24  ;;  %v201_v60 = vld [vmem:[%s1281_s26 + $0xd8] sm:$0xff]  ;;  %v202_v62 = vld [vmem:[%s1281_s26 + $0xe0] sm:$0xff]  ;;  %v203_v0 = vld [vmem:[%s1281_s26 + $0xe8] sm:$0xff] }
  0x23   : > { %1166 = vmatmul.mubr.msk.f32.gmra.mrb[8].mxu1 %vm249_vm3, %v215_v25  ;;  %1120 = vmatprep.mubr.msk.f32.mxu0 %vm249_vm3, %v184_v26  ;;  %v233_v61 = vld [vmem:[%s1281_s26 + $0x1d8] sm:$0xff]  ;;  %v234_v63 = vld [vmem:[%s1281_s26 + $0x1e0] sm:$0xff]  ;;  %v235_v1 = vld [vmem:[%s1281_s26 + $0x1e8] sm:$0xff] }
  0x24   : > { %1168 = vmatprep.mubr.msk.f32.mxu1 %vm249_vm3, %v216_v27  ;;  %v204_v2 = vld [vmem:[%s1281_s26 + $0xf0] sm:$0xff]  ;;  %v205_v4 = vld [vmem:[%s1281_s26 + $0xf8] sm:$0xff]  ;;  %v1414_v6 = vld [vmem:[%s1620_s2] ss:$0 sm:$0xff] }
  0x25   : > { %v236_v3 = vld [vmem:[%s1281_s26 + $0x1f0] sm:$0xff]  ;;  %v237_v5 = vld [vmem:[%s1281_s26 + $0x1f8] sm:$0xff] }
  0x26   : > { %1121 = vmatmul.mubr.msk.f32.gmra.mrb[10].mxu0 %vm249_vm3, %v185_v28 }
  0x27   : > { %1169 = vmatmul.mubr.msk.f32.gmra.mrb[10].mxu1 %vm249_vm3, %v217_v29  ;;  %1123 = vmatprep.mubr.msk.f32.mxu0 %vm249_vm3, %v186_v30 }
  0x28   : > { %1171 = vmatprep.mubr.msk.f32.mxu1 %vm249_vm3, %v218_v31 }
  0x2a   : > { %1124 = vmatmul.mubr.msk.f32.gmra.mrb[12].mxu0 %vm249_vm3, %v187_v32 }
  0x2b   : > { %1172 = vmatmul.mubr.msk.f32.gmra.mrb[12].mxu1 %vm249_vm3, %v219_v33  ;;  %1126 = vmatprep.mubr.msk.f32.mxu0 %vm249_vm3, %v188_v34 }
  0x2c   : > { %1174 = vmatprep.mubr.msk.f32.mxu1 %vm249_vm3, %v220_v35 }
  0x2e   : > { %1127 = vmatmul.mubr.msk.f32.gmra.mrb[14].mxu0 %vm249_vm3, %v189_v36 }
  0x2f   : > { %1175 = vmatmul.mubr.msk.f32.gmra.mrb[14].mxu1 %vm249_vm3, %v221_v37  ;;  %1129 = vmatprep.mubr.msk.f32.mxu0 %vm249_vm3, %v190_v38 }
  0x30   : > { %1177 = vmatprep.mubr.msk.f32.mxu1 %vm249_vm3, %v222_v39 }
  0x32   : > { %1130 = vmatmul.mubr.msk.f32.gmra.mrb[16].mxu0 %vm249_vm3, %v191_v40 }
  0x33   : > { %1178 = vmatmul.mubr.msk.f32.gmra.mrb[16].mxu1 %vm249_vm3, %v223_v41  ;;  %1132 = vmatprep.mubr.msk.f32.mxu0 %vm249_vm3, %v192_v42 }
  0x34   : > { %1180 = vmatprep.mubr.msk.f32.mxu1 %vm249_vm3, %v224_v43 }
  0x36   : > { %1133 = vmatmul.mubr.msk.f32.gmra.mrb[18].mxu0 %vm249_vm3, %v193_v44 }
  0x37   : > { %1181 = vmatmul.mubr.msk.f32.gmra.mrb[18].mxu1 %vm249_vm3, %v225_v45  ;;  %1135 = vmatprep.mubr.msk.f32.mxu0 %vm249_vm3, %v194_v46 }
  0x38   : > { %1183 = vmatprep.mubr.msk.f32.mxu1 %vm249_vm3, %v226_v47 }
  0x3a   : > { %1136 = vmatmul.mubr.msk.f32.gmra.mrb[20].mxu0 %vm249_vm3, %v195_v48 }
  0x3b   : > { %1184 = vmatmul.mubr.msk.f32.gmra.mrb[20].mxu1 %vm249_vm3, %v227_v49  ;;  %1138 = vmatprep.mubr.msk.f32.mxu0 %vm249_vm3, %v196_v50 }
  0x3c   : > { %1186 = vmatprep.mubr.msk.f32.mxu1 %vm249_vm3, %v228_v51 }
  0x3e   : > { %1139 = vmatmul.mubr.msk.f32.gmra.mrb[22].mxu0 %vm249_vm3, %v197_v52 }
  0x3f   : > { %1187 = vmatmul.mubr.msk.f32.gmra.mrb[22].mxu1 %vm249_vm3, %v229_v53  ;;  %1141 = vmatprep.mubr.msk.f32.mxu0 %vm249_vm3, %v198_v54 }
  0x40   : > { %1189 = vmatprep.mubr.msk.f32.mxu1 %vm249_vm3, %v230_v55 }
  0x42   : > { %1142 = vmatmul.mubr.msk.f32.gmra.mrb[24].mxu0 %vm249_vm3, %v199_v56 }
  0x43   : > { %1190 = vmatmul.mubr.msk.f32.gmra.mrb[24].mxu1 %vm249_vm3, %v231_v57  ;;  %1144 = vmatprep.mubr.msk.f32.mxu0 %vm249_vm3, %v200_v58 }
  0x44   : > { %1192 = vmatprep.mubr.msk.f32.mxu1 %vm249_vm3, %v232_v59 }
  0x46   : > { %1145 = vmatmul.mubr.msk.f32.gmra.mrb[26].mxu0 %vm249_vm3, %v201_v60 }
  0x47   : > { %1193 = vmatmul.mubr.msk.f32.gmra.mrb[26].mxu1 %vm249_vm3, %v233_v61  ;;  %1147 = vmatprep.mubr.msk.f32.mxu0 %vm249_vm3, %v202_v62 }
  0x48   : > { %1195 = vmatprep.mubr.msk.f32.mxu1 %vm249_vm3, %v234_v63 }
  0x4a   : > { %1148 = vmatmul.mubr.msk.f32.gmra.mrb[28].mxu0 %vm249_vm3, %v203_v0 }
  0x4b   : > { %1196 = vmatmul.mubr.msk.f32.gmra.mrb[28].mxu1 %vm249_vm3, %v235_v1  ;;  %1150 = vmatprep.mubr.msk.f32.mxu0 %vm249_vm3, %v204_v2 }
  0x4c   : > { %1198 = vmatprep.mubr.msk.f32.mxu1 %vm249_vm3, %v236_v3 }
  0x4e   : > { %1151 = vmatmul.mubr.msk.f32.gmra.mrb[30].mxu0 %vm249_vm3, %v205_v4 }
  0x4f   : > { %1199 = vmatmul.mubr.msk.f32.gmra.mrb[30].mxu1 %vm249_vm3, %v237_v5 }
  0xe5   : > { %v1107_v7 = vpop.f32.mrb[0].mxu0 }
  0xe6   : > { %v1155_v8 = vpop.f32.mrb[0].mxu1  ;;  %v518_v9 = vadd.f32 %v1107_v7, %v1414_v6  ;;  %v512_v11 = vpop.f32.mrb[1].mxu0 }
  0xe7   : > { %v678_v10 = vadd.f32 %v1155_v8, %v1414_v6  ;;  %v672_v12 = vpop.f32.mrb[1].mxu1  ;;  %v513_v13 = vadd.f32 %v1414_v6, %v512_v11 }
  0xe8   : > { %v673_v14 = vadd.f32 %v1414_v6, %v672_v12  ;;  %833 = vst.msk [vmem:[%s1421_s4 + $0x8] sm:$0xff] %vm831_vm4, %v518_v9 }
  0xe9   : > { %865 = vst.msk [vmem:[%s1421_s4 + $0x108] sm:$0xff] %vm831_vm4, %v678_v10  ;;  %832 = vst.msk [vmem:[%s1421_s4] sm:$0xff] %vm831_vm4, %v513_v13  ;;  %v1110_v15 = vpop.f32.mrb[2].mxu0 }
  0xea   : > { %864 = vst.msk [vmem:[%s1421_s4 + $0x100] sm:$0xff] %vm831_vm4, %v673_v14  ;;  %v1158_v16 = vpop.f32.mrb[2].mxu1  ;;  %v528_v17 = vadd.f32 %v1110_v15, %v1414_v6  ;;  %v522_v19 = vpop.f32.mrb[3].mxu0 }
  0xeb   : > { %v688_v18 = vadd.f32 %v1158_v16, %v1414_v6  ;;  %v682_v20 = vpop.f32.mrb[3].mxu1  ;;  %v523_v21 = vadd.f32 %v1414_v6, %v522_v19 }
  0xec   : > { %v683_v22 = vadd.f32 %v1414_v6, %v682_v20  ;;  %835 = vst.msk [vmem:[%s1421_s4 + $0x18] sm:$0xff] %vm831_vm4, %v528_v17 }
  0xed   : > { %867 = vst.msk [vmem:[%s1421_s4 + $0x118] sm:$0xff] %vm831_vm4, %v688_v18  ;;  %834 = vst.msk [vmem:[%s1421_s4 + $0x10] sm:$0xff] %vm831_vm4, %v523_v21  ;;  %v1113_v23 = vpop.f32.mrb[4].mxu0 }
  0xee   : > { %866 = vst.msk [vmem:[%s1421_s4 + $0x110] sm:$0xff] %vm831_vm4, %v683_v22  ;;  %v1161_v24 = vpop.f32.mrb[4].mxu1  ;;  %v538_v25 = vadd.f32 %v1113_v23, %v1414_v6  ;;  %v532_v27 = vpop.f32.mrb[5].mxu0 }
  0xef   : > { %v698_v26 = vadd.f32 %v1161_v24, %v1414_v6  ;;  %v692_v28 = vpop.f32.mrb[5].mxu1  ;;  %v533_v29 = vadd.f32 %v1414_v6, %v532_v27 }
  0xf0   : > { %v693_v30 = vadd.f32 %v1414_v6, %v692_v28  ;;  %837 = vst.msk [vmem:[%s1421_s4 + $0x28] sm:$0xff] %vm831_vm4, %v538_v25 }
  0xf1   : > { %869 = vst.msk [vmem:[%s1421_s4 + $0x128] sm:$0xff] %vm831_vm4, %v698_v26  ;;  %836 = vst.msk [vmem:[%s1421_s4 + $0x20] sm:$0xff] %vm831_vm4, %v533_v29  ;;  %v1116_v31 = vpop.f32.mrb[6].mxu0 }
  0xf2   : > { %868 = vst.msk [vmem:[%s1421_s4 + $0x120] sm:$0xff] %vm831_vm4, %v693_v30  ;;  %v1164_v32 = vpop.f32.mrb[6].mxu1  ;;  %v548_v33 = vadd.f32 %v1116_v31, %v1414_v6  ;;  %v542_v35 = vpop.f32.mrb[7].mxu0 }
  0xf3   : > { %v708_v34 = vadd.f32 %v1164_v32, %v1414_v6  ;;  %v702_v36 = vpop.f32.mrb[7].mxu1  ;;  %v543_v37 = vadd.f32 %v1414_v6, %v542_v35 }
  0xf4   : > { %v703_v38 = vadd.f32 %v1414_v6, %v702_v36  ;;  %839 = vst.msk [vmem:[%s1421_s4 + $0x38] sm:$0xff] %vm831_vm4, %v548_v33 }
  0xf5   : > { %871 = vst.msk [vmem:[%s1421_s4 + $0x138] sm:$0xff] %vm831_vm4, %v708_v34  ;;  %838 = vst.msk [vmem:[%s1421_s4 + $0x30] sm:$0xff] %vm831_vm4, %v543_v37  ;;  %v1119_v39 = vpop.f32.mrb[8].mxu0 }
  0xf6   : > { %870 = vst.msk [vmem:[%s1421_s4 + $0x130] sm:$0xff] %vm831_vm4, %v703_v38  ;;  %v1167_v40 = vpop.f32.mrb[8].mxu1  ;;  %v558_v41 = vadd.f32 %v1119_v39, %v1414_v6  ;;  %v552_v43 = vpop.f32.mrb[9].mxu0 }
  0xf7   : > { %v718_v42 = vadd.f32 %v1167_v40, %v1414_v6  ;;  %v712_v44 = vpop.f32.mrb[9].mxu1  ;;  %v553_v45 = vadd.f32 %v1414_v6, %v552_v43 }
  0xf8   : > { %v713_v46 = vadd.f32 %v1414_v6, %v712_v44  ;;  %841 = vst.msk [vmem:[%s1421_s4 + $0x48] sm:$0xff] %vm831_vm4, %v558_v41 }
  0xf9   : > { %873 = vst.msk [vmem:[%s1421_s4 + $0x148] sm:$0xff] %vm831_vm4, %v718_v42  ;;  %840 = vst.msk [vmem:[%s1421_s4 + $0x40] sm:$0xff] %vm831_vm4, %v553_v45  ;;  %v1122_v47 = vpop.f32.mrb[10].mxu0 }
  0xfa   : > { %872 = vst.msk [vmem:[%s1421_s4 + $0x140] sm:$0xff] %vm831_vm4, %v713_v46  ;;  %v1170_v48 = vpop.f32.mrb[10].mxu1  ;;  %v568_v49 = vadd.f32 %v1122_v47, %v1414_v6  ;;  %v562_v51 = vpop.f32.mrb[11].mxu0 }
  0xfb   : > { %v728_v50 = vadd.f32 %v1170_v48, %v1414_v6  ;;  %v722_v52 = vpop.f32.mrb[11].mxu1  ;;  %v563_v53 = vadd.f32 %v1414_v6, %v562_v51 }
  0xfc   : > { %v723_v54 = vadd.f32 %v1414_v6, %v722_v52  ;;  %843 = vst.msk [vmem:[%s1421_s4 + $0x58] sm:$0xff] %vm831_vm4, %v568_v49 }
  0xfd   : > { %875 = vst.msk [vmem:[%s1421_s4 + $0x158] sm:$0xff] %vm831_vm4, %v728_v50  ;;  %842 = vst.msk [vmem:[%s1421_s4 + $0x50] sm:$0xff] %vm831_vm4, %v563_v53  ;;  %v1125_v55 = vpop.f32.mrb[12].mxu0 }
  0xfe   : > { %874 = vst.msk [vmem:[%s1421_s4 + $0x150] sm:$0xff] %vm831_vm4, %v723_v54  ;;  %v1173_v56 = vpop.f32.mrb[12].mxu1  ;;  %v578_v57 = vadd.f32 %v1125_v55, %v1414_v6  ;;  %v572_v59 = vpop.f32.mrb[13].mxu0 }
  0xff   : > { %v738_v58 = vadd.f32 %v1173_v56, %v1414_v6  ;;  %v732_v60 = vpop.f32.mrb[13].mxu1  ;;  %v573_v61 = vadd.f32 %v1414_v6, %v572_v59 }
 0x100   : > { %v733_v62 = vadd.f32 %v1414_v6, %v732_v60  ;;  %845 = vst.msk [vmem:[%s1421_s4 + $0x68] sm:$0xff] %vm831_vm4, %v578_v57 }
 0x101   : > { %877 = vst.msk [vmem:[%s1421_s4 + $0x168] sm:$0xff] %vm831_vm4, %v738_v58  ;;  %844 = vst.msk [vmem:[%s1421_s4 + $0x60] sm:$0xff] %vm831_vm4, %v573_v61  ;;  %v1128_v63 = vpop.f32.mrb[14].mxu0 }
 0x102   : > { %876 = vst.msk [vmem:[%s1421_s4 + $0x160] sm:$0xff] %vm831_vm4, %v733_v62  ;;  %v1176_v0 = vpop.f32.mrb[14].mxu1  ;;  %v588_v1 = vadd.f32 %v1128_v63, %v1414_v6  ;;  %v582_v3 = vpop.f32.mrb[15].mxu0 }
 0x103   : > { %v748_v2 = vadd.f32 %v1176_v0, %v1414_v6  ;;  %v742_v4 = vpop.f32.mrb[15].mxu1  ;;  %v583_v5 = vadd.f32 %v1414_v6, %v582_v3 }
 0x104   : > { %v743_v7 = vadd.f32 %v1414_v6, %v742_v4  ;;  %847 = vst.msk [vmem:[%s1421_s4 + $0x78] sm:$0xff] %vm831_vm4, %v588_v1 }
 0x105   : > { %879 = vst.msk [vmem:[%s1421_s4 + $0x178] sm:$0xff] %vm831_vm4, %v748_v2  ;;  %846 = vst.msk [vmem:[%s1421_s4 + $0x70] sm:$0xff] %vm831_vm4, %v583_v5  ;;  %v1131_v8 = vpop.f32.mrb[16].mxu0 }
 0x106   : > { %878 = vst.msk [vmem:[%s1421_s4 + $0x170] sm:$0xff] %vm831_vm4, %v743_v7  ;;  %v1179_v9 = vpop.f32.mrb[16].mxu1  ;;  %v598_v10 = vadd.f32 %v1131_v8, %v1414_v6  ;;  %v592_v12 = vpop.f32.mrb[17].mxu0 }
 0x107   : > { %v758_v11 = vadd.f32 %v1179_v9, %v1414_v6  ;;  %v752_v13 = vpop.f32.mrb[17].mxu1  ;;  %v593_v14 = vadd.f32 %v1414_v6, %v592_v12 }
 0x108   : > { %v753_v15 = vadd.f32 %v1414_v6, %v752_v13  ;;  %849 = vst.msk [vmem:[%s1421_s4 + $0x88] sm:$0xff] %vm831_vm4, %v598_v10 }
 0x109   : > { %881 = vst.msk [vmem:[%s1421_s4 + $0x188] sm:$0xff] %vm831_vm4, %v758_v11  ;;  %848 = vst.msk [vmem:[%s1421_s4 + $0x80] sm:$0xff] %vm831_vm4, %v593_v14  ;;  %v1134_v16 = vpop.f32.mrb[18].mxu0 }
 0x10a   : > { %880 = vst.msk [vmem:[%s1421_s4 + $0x180] sm:$0xff] %vm831_vm4, %v753_v15  ;;  %v1182_v17 = vpop.f32.mrb[18].mxu1  ;;  %v608_v18 = vadd.f32 %v1134_v16, %v1414_v6  ;;  %v602_v20 = vpop.f32.mrb[19].mxu0 }
 0x10b   : > { %v768_v19 = vadd.f32 %v1182_v17, %v1414_v6  ;;  %v762_v21 = vpop.f32.mrb[19].mxu1  ;;  %v603_v22 = vadd.f32 %v1414_v6, %v602_v20 }
 0x10c   : > { %v763_v23 = vadd.f32 %v1414_v6, %v762_v21  ;;  %851 = vst.msk [vmem:[%s1421_s4 + $0x98] sm:$0xff] %vm831_vm4, %v608_v18 }
 0x10d   : > { %883 = vst.msk [vmem:[%s1421_s4 + $0x198] sm:$0xff] %vm831_vm4, %v768_v19  ;;  %850 = vst.msk [vmem:[%s1421_s4 + $0x90] sm:$0xff] %vm831_vm4, %v603_v22  ;;  %v1137_v24 = vpop.f32.mrb[20].mxu0 }
 0x10e   : > { %882 = vst.msk [vmem:[%s1421_s4 + $0x190] sm:$0xff] %vm831_vm4, %v763_v23  ;;  %v1185_v25 = vpop.f32.mrb[20].mxu1  ;;  %v618_v26 = vadd.f32 %v1137_v24, %v1414_v6  ;;  %v612_v28 = vpop.f32.mrb[21].mxu0 }
 0x10f   : > { %v778_v27 = vadd.f32 %v1185_v25, %v1414_v6  ;;  %v772_v29 = vpop.f32.mrb[21].mxu1  ;;  %v613_v30 = vadd.f32 %v1414_v6, %v612_v28 }
 0x110   : > { %v773_v31 = vadd.f32 %v1414_v6, %v772_v29  ;;  %853 = vst.msk [vmem:[%s1421_s4 + $0xa8] sm:$0xff] %vm831_vm4, %v618_v26 }
 0x111   : > { %885 = vst.msk [vmem:[%s1421_s4 + $0x1a8] sm:$0xff] %vm831_vm4, %v778_v27  ;;  %852 = vst.msk [vmem:[%s1421_s4 + $0xa0] sm:$0xff] %vm831_vm4, %v613_v30  ;;  %v1140_v32 = vpop.f32.mrb[22].mxu0 }
 0x112   : > { %884 = vst.msk [vmem:[%s1421_s4 + $0x1a0] sm:$0xff] %vm831_vm4, %v773_v31  ;;  %v1188_v33 = vpop.f32.mrb[22].mxu1  ;;  %v628_v34 = vadd.f32 %v1140_v32, %v1414_v6  ;;  %v622_v36 = vpop.f32.mrb[23].mxu0 }
 0x113   : > { %v788_v35 = vadd.f32 %v1188_v33, %v1414_v6  ;;  %v782_v37 = vpop.f32.mrb[23].mxu1  ;;  %v623_v38 = vadd.f32 %v1414_v6, %v622_v36 }
 0x114   : > { %v783_v39 = vadd.f32 %v1414_v6, %v782_v37  ;;  %855 = vst.msk [vmem:[%s1421_s4 + $0xb8] sm:$0xff] %vm831_vm4, %v628_v34 }
 0x115   : > { %887 = vst.msk [vmem:[%s1421_s4 + $0x1b8] sm:$0xff] %vm831_vm4, %v788_v35  ;;  %854 = vst.msk [vmem:[%s1421_s4 + $0xb0] sm:$0xff] %vm831_vm4, %v623_v38  ;;  %v1143_v40 = vpop.f32.mrb[24].mxu0 }
 0x116   : > { %886 = vst.msk [vmem:[%s1421_s4 + $0x1b0] sm:$0xff] %vm831_vm4, %v783_v39  ;;  %v1191_v41 = vpop.f32.mrb[24].mxu1  ;;  %v638_v42 = vadd.f32 %v1143_v40, %v1414_v6  ;;  %v632_v44 = vpop.f32.mrb[25].mxu0 }
 0x117   : > { %v798_v43 = vadd.f32 %v1191_v41, %v1414_v6  ;;  %v792_v45 = vpop.f32.mrb[25].mxu1  ;;  %v633_v46 = vadd.f32 %v1414_v6, %v632_v44 }
 0x118   : > { %v793_v47 = vadd.f32 %v1414_v6, %v792_v45  ;;  %857 = vst.msk [vmem:[%s1421_s4 + $0xc8] sm:$0xff] %vm831_vm4, %v638_v42 }
 0x119   : > { %889 = vst.msk [vmem:[%s1421_s4 + $0x1c8] sm:$0xff] %vm831_vm4, %v798_v43  ;;  %856 = vst.msk [vmem:[%s1421_s4 + $0xc0] sm:$0xff] %vm831_vm4, %v633_v46  ;;  %v1146_v48 = vpop.f32.mrb[26].mxu0 }
 0x11a   : > { %888 = vst.msk [vmem:[%s1421_s4 + $0x1c0] sm:$0xff] %vm831_vm4, %v793_v47  ;;  %v1194_v49 = vpop.f32.mrb[26].mxu1  ;;  %v648_v50 = vadd.f32 %v1146_v48, %v1414_v6  ;;  %v642_v52 = vpop.f32.mrb[27].mxu0 }
 0x11b   : > { %v808_v51 = vadd.f32 %v1194_v49, %v1414_v6  ;;  %v802_v53 = vpop.f32.mrb[27].mxu1  ;;  %v643_v54 = vadd.f32 %v1414_v6, %v642_v52 }
 0x11c   : > { %v803_v55 = vadd.f32 %v1414_v6, %v802_v53  ;;  %859 = vst.msk [vmem:[%s1421_s4 + $0xd8] sm:$0xff] %vm831_vm4, %v648_v50 }
 0x11d   : > { %891 = vst.msk [vmem:[%s1421_s4 + $0x1d8] sm:$0xff] %vm831_vm4, %v808_v51  ;;  %858 = vst.msk [vmem:[%s1421_s4 + $0xd0] sm:$0xff] %vm831_vm4, %v643_v54  ;;  %v1149_v56 = vpop.f32.mrb[28].mxu0 }
 0x11e   : > { %890 = vst.msk [vmem:[%s1421_s4 + $0x1d0] sm:$0xff] %vm831_vm4, %v803_v55  ;;  %v1197_v57 = vpop.f32.mrb[28].mxu1  ;;  %v658_v58 = vadd.f32 %v1149_v56, %v1414_v6  ;;  %v652_v60 = vpop.f32.mrb[29].mxu0 }
 0x11f   : > { %v818_v59 = vadd.f32 %v1197_v57, %v1414_v6  ;;  %v812_v61 = vpop.f32.mrb[29].mxu1  ;;  %v653_v62 = vadd.f32 %v1414_v6, %v652_v60 }
 0x120   : > { %v813_v63 = vadd.f32 %v1414_v6, %v812_v61  ;;  %861 = vst.msk [vmem:[%s1421_s4 + $0xe8] sm:$0xff] %vm831_vm4, %v658_v58 }
 0x121   : > { %893 = vst.msk [vmem:[%s1421_s4 + $0x1e8] sm:$0xff] %vm831_vm4, %v818_v59  ;;  %860 = vst.msk [vmem:[%s1421_s4 + $0xe0] sm:$0xff] %vm831_vm4, %v653_v62  ;;  %v1152_v0 = vpop.f32.mrb[30].mxu0 }
 0x122   : > { %892 = vst.msk [vmem:[%s1421_s4 + $0x1e0] sm:$0xff] %vm831_vm4, %v813_v63  ;;  %v1200_v1 = vpop.f32.mrb[30].mxu1  ;;  %v668_v2 = vadd.f32 %v1152_v0, %v1414_v6  ;;  %v662_v4 = vpop.f32.mrb[31].mxu0 }
 0x123   : > { %v828_v3 = vadd.f32 %v1200_v1, %v1414_v6  ;;  %v822_v5 = vpop.f32.mrb[31].mxu1  ;;  %v663_v7 = vadd.f32 %v1414_v6, %v662_v4 }
 0x124   : > { %v823_v8 = vadd.f32 %v1414_v6, %v822_v5  ;;  %863 = vst.msk [vmem:[%s1421_s4 + $0xf8] sm:$0xff] %vm831_vm4, %v668_v2 }
 0x125   : > { %895 = vst.msk [vmem:[%s1421_s4 + $0x1f8] sm:$0xff] %vm831_vm4, %v828_v3  ;;  %862 = vst.msk [vmem:[%s1421_s4 + $0xf0] sm:$0xff] %vm831_vm4, %v663_v7 }
 0x126   : > { %894 = vst.msk [vmem:[%s1421_s4 + $0x1f0] sm:$0xff] %vm831_vm4, %v823_v8 }
 0x127 PF: > { %s13_s12 = sadd.s32 1, %s1230_s12  }
 0x128   : > { %p10_p4 = scmp.ge.s32.totalorder %s13_s12, 7  }
 0x12a   :  { %12 = sbr.rel (!%p10_p4) target bundleno = 1 (0x1), region = 62 }

// kernel: forward.18
= control target key start
LH: loop header
LB: loop body
LE: loop exit
PB: predicated region body
PF: predicated region fallthrough
CT: control target
= control target key end

     0   :  { %vm124_vm0 = vcmask 261120   ;;  %s335_s0 = inlined_call_operand.vmem [shape: f32[8,1440], index: 0, kind: input, shape index: {}]   ;;  %s336_s1 = inlined_call_operand.vmem [shape: f32[8,1440], index: 1, kind: input, shape index: {}]   ;;  %s337_s2 = inlined_call_operand.vmem [shape: f32[8,1440], index: 2, kind: input, shape index: {}]   ;;  %s338_s3 = inlined_call_operand.vmem [shape: f32[8,1440], index: 3, kind: input, shape index: {}]   ;;  %s339_s4 = inlined_call_operand.vmem [shape: f32[8,1440], index: 4, kind: output, shape index: {}]  }
   0x1   :  { %v17_v0 = vld [vmem:[%s335_s0] sm:$0xff]  ;;  %v18_v5 = vld [vmem:[%s335_s0 + $0x8] sm:$0xff]  ;;  %v19_v11 = vld [vmem:[%s335_s0 + $0x10] sm:$0xff] }
   0x2   :  { %v29_v1 = vld [vmem:[%s336_s1] sm:$0xff]  ;;  %v30_v6 = vld [vmem:[%s336_s1 + $0x8] sm:$0xff]  ;;  %v31_v13 = vld [vmem:[%s336_s1 + $0x10] sm:$0xff] }
   0x3   :  { %v53_v2 = vld [vmem:[%s337_s2] sm:$0xff]  ;;  %v41_v3 = vmax.f32 %v17_v0, %v29_v1  ;;  %v42_v8 = vmax.f32 %v18_v5, %v30_v6  ;;  %v54_v9 = vld [vmem:[%s337_s2 + $0x8] sm:$0xff]  ;;  %v55_v14 = vld [vmem:[%s337_s2 + $0x10] sm:$0xff]  ;;  %v43_v17 = vmax.f32 %v19_v11, %v31_v13 }
   0x4   :  { %v65_v4 = vld [vmem:[%s338_s3] sm:$0xff]  ;;  %v66_v10 = vld [vmem:[%s338_s3 + $0x8] sm:$0xff]  ;;  %v67_v15 = vld [vmem:[%s338_s3 + $0x10] sm:$0xff] }
   0x5   :  { %v77_v7 = vmax.f32 %v53_v2, %v65_v4  ;;  %v78_v12 = vmax.f32 %v54_v9, %v66_v10  ;;  %v79_v18 = vmax.f32 %v55_v14, %v67_v15  ;;  %v20_v19 = vld [vmem:[%s335_s0 + $0x18] sm:$0xff]  ;;  %v21_v25 = vld [vmem:[%s335_s0 + $0x20] sm:$0xff]  ;;  %v22_v33 = vld [vmem:[%s335_s0 + $0x28] sm:$0xff] }
   0x6   :  { %v32_v20 = vld [vmem:[%s336_s1 + $0x18] sm:$0xff]  ;;  %v33_v26 = vld [vmem:[%s336_s1 + $0x20] sm:$0xff]  ;;  %v34_v36 = vld [vmem:[%s336_s1 + $0x28] sm:$0xff] }
   0x7   :  { %v89_v16 = vmax.f32 %v41_v3, %v77_v7  ;;  %v56_v21 = vld [vmem:[%s337_s2 + $0x18] sm:$0xff]  ;;  %v90_v22 = vmax.f32 %v42_v8, %v78_v12  ;;  %v44_v23 = vmax.f32 %v20_v19, %v32_v20  ;;  %v91_v28 = vmax.f32 %v43_v17, %v79_v18  ;;  %v57_v31 = vld [vmem:[%s337_s2 + $0x20] sm:$0xff]  ;;  %v58_v37 = vld [vmem:[%s337_s2 + $0x28] sm:$0xff] }
   0x8   :  { %v68_v24 = vld [vmem:[%s338_s3 + $0x18] sm:$0xff]  ;;  %v45_v30 = vmax.f32 %v21_v25, %v33_v26  ;;  %v69_v32 = vld [vmem:[%s338_s3 + $0x20] sm:$0xff]  ;;  %v70_v38 = vld [vmem:[%s338_s3 + $0x28] sm:$0xff]  ;;  %v46_v41 = vmax.f32 %v22_v33, %v34_v36 }
   0x9   :  { %v101_v27 = vmax.f32 %v89_v16, 0.0  ;;  %v80_v29 = vmax.f32 %v56_v21, %v68_v24  ;;  %v102_v34 = vmax.f32 %v90_v22, 0.0  ;;  %v81_v35 = vmax.f32 %v57_v31, %v69_v32  ;;  %v23_v43 = vld [vmem:[%s335_s0 + $0x30] sm:$0xff]  ;;  %v24_v49 = vld [vmem:[%s335_s0 + $0x38] sm:$0xff]  ;;  %v25_v57 = vld [vmem:[%s335_s0 + $0x40] sm:$0xff] }
   0xa   :  { %v103_v39 = vmax.f32 %v91_v28, 0.0  ;;  %v82_v42 = vmax.f32 %v58_v37, %v70_v38  ;;  %v35_v44 = vld [vmem:[%s336_s1 + $0x30] sm:$0xff]  ;;  %v36_v50 = vld [vmem:[%s336_s1 + $0x38] sm:$0xff]  ;;  %v37_v60 = vld [vmem:[%s336_s1 + $0x40] sm:$0xff] }
   0xb   :  { %113 = vst [vmem:[%s339_s4] sm:$0xff] %v101_v27  ;;  %v92_v40 = vmax.f32 %v44_v23, %v80_v29  ;;  %v59_v45 = vld [vmem:[%s337_s2 + $0x30] sm:$0xff]  ;;  %114 = vst [vmem:[%s339_s4 + $0x8] sm:$0xff] %v102_v34  ;;  %v93_v46 = vmax.f32 %v45_v30, %v81_v35  ;;  %v47_v47 = vmax.f32 %v23_v43, %v35_v44  ;;  %v60_v55 = vld [vmem:[%s337_s2 + $0x38] sm:$0xff] }
   0xc   :  { %v71_v48 = vld [vmem:[%s338_s3 + $0x30] sm:$0xff]  ;;  %115 = vst [vmem:[%s339_s4 + $0x10] sm:$0xff] %v103_v39  ;;  %v94_v52 = vmax.f32 %v46_v41, %v82_v42  ;;  %v48_v54 = vmax.f32 %v24_v49, %v36_v50  ;;  %v72_v56 = vld [vmem:[%s338_s3 + $0x38] sm:$0xff]  ;;  %v61_v61 = vld [vmem:[%s337_s2 + $0x40] sm:$0xff]  ;;  %v49_v1 = vmax.f32 %v25_v57, %v37_v60 }
   0xd   :  { %v104_v51 = vmax.f32 %v92_v40, 0.0  ;;  %v83_v53 = vmax.f32 %v59_v45, %v71_v48  ;;  %v105_v58 = vmax.f32 %v93_v46, 0.0  ;;  %v84_v59 = vmax.f32 %v60_v55, %v72_v56  ;;  %v73_v62 = vld [vmem:[%s338_s3 + $0x40] sm:$0xff]  ;;  %v26_v3 = vld [vmem:[%s335_s0 + $0x48] sm:$0xff]  ;;  %v27_v9 = vld [vmem:[%s335_s0 + $0x50] sm:$0xff] }
   0xe   :  { %v106_v63 = vmax.f32 %v94_v52, 0.0  ;;  %v85_v2 = vmax.f32 %v61_v61, %v73_v62  ;;  %v38_v4 = vld [vmem:[%s336_s1 + $0x48] sm:$0xff]  ;;  %v39_v10 = vld [vmem:[%s336_s1 + $0x50] sm:$0xff]  ;;  %v28_v17 = vld [vmem:[%s335_s0 + $0x58] sm:$0xff] }
   0xf   :  { %116 = vst [vmem:[%s339_s4 + $0x18] sm:$0xff] %v104_v51  ;;  %v95_v0 = vmax.f32 %v47_v47, %v83_v53  ;;  %v62_v5 = vld [vmem:[%s337_s2 + $0x48] sm:$0xff]  ;;  %117 = vst [vmem:[%s339_s4 + $0x20] sm:$0xff] %v105_v58  ;;  %v96_v6 = vmax.f32 %v48_v54, %v84_v59  ;;  %v50_v7 = vmax.f32 %v26_v3, %v38_v4  ;;  %v63_v15 = vld [vmem:[%s337_s2 + $0x50] sm:$0xff] }
  0x10   :  { %v74_v8 = vld [vmem:[%s338_s3 + $0x48] sm:$0xff]  ;;  %118 = vst [vmem:[%s339_s4 + $0x28] sm:$0xff] %v106_v63  ;;  %v97_v12 = vmax.f32 %v49_v1, %v85_v2  ;;  %v51_v14 = vmax.f32 %v27_v9, %v39_v10  ;;  %v75_v16 = vld [vmem:[%s338_s3 + $0x50] sm:$0xff]  ;;  %v40_v20 = vld [vmem:[%s336_s1 + $0x58] sm:$0xff] }
  0x11   :  { %v107_v11 = vmax.f32 %v95_v0, 0.0  ;;  %v86_v13 = vmax.f32 %v62_v5, %v74_v8  ;;  %v108_v18 = vmax.f32 %v96_v6, 0.0  ;;  %v87_v19 = vmax.f32 %v63_v15, %v75_v16  ;;  %v64_v21 = vld [vmem:[%s337_s2 + $0x58] sm:$0xff] }
  0x12   :  { %v76_v22 = vld [vmem:[%s338_s3 + $0x58] sm:$0xff]  ;;  %v109_v23 = vmax.f32 %v97_v12, 0.0  ;;  %v52_v25 = vmax.f32 %v28_v17, %v40_v20 }
  0x13   :  { %119 = vst [vmem:[%s339_s4 + $0x30] sm:$0xff] %v107_v11  ;;  %v98_v24 = vmax.f32 %v50_v7, %v86_v13  ;;  %v88_v26 = vmax.f32 %v64_v21, %v76_v22  ;;  %120 = vst [vmem:[%s339_s4 + $0x38] sm:$0xff] %v108_v18  ;;  %v99_v27 = vmax.f32 %v51_v14, %v87_v19 }
  0x14   :  { %121 = vst [vmem:[%s339_s4 + $0x40] sm:$0xff] %v109_v23 }
  0x15   :  { %v110_v28 = vmax.f32 %v98_v24, 0.0  ;;  %v100_v29 = vmax.f32 %v52_v25, %v88_v26  ;;  %v111_v30 = vmax.f32 %v99_v27, 0.0 }
  0x17   :  { %122 = vst [vmem:[%s339_s4 + $0x48] sm:$0xff] %v110_v28  ;;  %v112_v31 = vmax.f32 %v100_v29, 0.0  ;;  %123 = vst [vmem:[%s339_s4 + $0x50] sm:$0xff] %v111_v30 }
  0x19   :  { %125 = vst.msk [vmem:[%s339_s4 + $0x58] sm:$0xff] %vm124_vm0, %v112_v31 }

// kernel: forward.19
= control target key start
LH: loop header
LB: loop body
LE: loop exit
PB: predicated region body
PF: predicated region fallthrough
CT: control target
= control target key end

     0   :  { %v597_v0 = vmov 0.0|0.0   ;;  %vm117_vm0 = vcmask 998400   ;;  %vm214_vm1 = vcmask 1041408   ;;  %vm598_vm2 = vmmov 1   ;;  %s1136_s1 = inlined_call_operand.vmem [shape: f32[250,20], index: 1, kind: input, shape index: {}]   ;;  %s1137_s0 = inlined_call_operand.vmem [shape: f32[256,250], index: 0, kind: input, shape index: {}]   ;;  %s1138_s2 = inlined_call_operand.vmem [shape: f32[1,20], index: 2, kind: input, shape index: {}]   ;;  %s1139_s3 = inlined_call_operand.vmem [shape: f32[256,20], index: 3, kind: output, shape index: {}]  }
   0x1   :  { %514 = vmatprep.subr.bf16.mxu0 %v597_v0  ;;  %563 = vmatprep.subr.bf16.mxu1 %v597_v0  ;;  %v78_v1 = vld [vmem:[%s1136_s1] sm:$0xff]  ;;  %v79_v2 = vld [vmem:[%s1136_s1 + $0x8] sm:$0xff]  ;;  %v80_v3 = vld [vmem:[%s1136_s1 + $0x10] sm:$0xff]  ;;  %vm443_vm4 = vcmask 162816  }
   0x2   :  { %v515_v4 = vpack.c.bf16 %v79_v2, %v78_v1  ;;  %v81_v5 = vld [vmem:[%s1136_s1 + $0x18] sm:$0xff]  ;;  %v82_v7 = vld [vmem:[%s1136_s1 + $0x20] sm:$0xff]  ;;  %v83_v8 = vld [vmem:[%s1136_s1 + $0x28] sm:$0xff] }
   0x3   :  { %v518_v6 = vpack.c.bf16 %v81_v5, %v80_v3  ;;  %v521_v9 = vpack.c.bf16 %v83_v8, %v82_v7  ;;  %v84_v10 = vld [vmem:[%s1136_s1 + $0x30] sm:$0xff]  ;;  %v85_v11 = vld [vmem:[%s1136_s1 + $0x38] sm:$0xff]  ;;  %v15_v13 = vld [vmem:[%s1137_s0 + $0x8] sm:$0xff] }
   0x4   :  { %516 = vmatpush1.bf16.msra.mxu0 %v515_v4  ;;  %579 = vmatpush1.bf16.msra.mxu1 %v515_v4  ;;  %v524_v12 = vpack.c.bf16 %v85_v11, %v84_v10  ;;  %v47_v14 = vld [vmem:[%s1137_s0 + $0x108] sm:$0xff]  ;;  %v86_v15 = vld [vmem:[%s1136_s1 + $0x40] sm:$0xff]  ;;  %v88_v18 = vld [vmem:[%s1136_s1 + $0x50] sm:$0xff] }
   0x5   :  { %517 = vmatprep.subr.bf16.mxu0 %v597_v0  ;;  %564 = vmatprep.subr.bf16.mxu1 %v597_v0  ;;  %v87_v16 = vld [vmem:[%s1136_s1 + $0x48] sm:$0xff]  ;;  %v89_v19 = vld [vmem:[%s1136_s1 + $0x58] sm:$0xff]  ;;  %v90_v21 = vld [vmem:[%s1136_s1 + $0x60] sm:$0xff] }
   0x6   :  { %482 = vmatprep.mubr.msk.f32.mxu0 %vm117_vm0, %v15_v13  ;;  %498 = vmatprep.mubr.msk.f32.mxu1 %vm117_vm0, %v47_v14  ;;  %v527_v17 = vpack.c.bf16 %v87_v16, %v86_v15  ;;  %v530_v20 = vpack.c.bf16 %v89_v19, %v88_v18  ;;  %v91_v22 = vld [vmem:[%s1136_s1 + $0x68] sm:$0xff]  ;;  %v92_v24 = vld [vmem:[%s1136_s1 + $0x70] sm:$0xff]  ;;  %v93_v25 = vld [vmem:[%s1136_s1 + $0x78] sm:$0xff] }
   0x7   :  { %v533_v23 = vpack.c.bf16 %v91_v22, %v90_v21  ;;  %v536_v26 = vpack.c.bf16 %v93_v25, %v92_v24  ;;  %v94_v27 = vld [vmem:[%s1136_s1 + $0x80] sm:$0xff]  ;;  %v95_v28 = vld [vmem:[%s1136_s1 + $0x88] sm:$0xff]  ;;  %v96_v30 = vld [vmem:[%s1136_s1 + $0x90] sm:$0xff] }
   0x8   :  { %519 = vmatpush1.bf16.msra.mxu0 %v518_v6  ;;  %580 = vmatpush1.bf16.msra.mxu1 %v518_v6  ;;  %v539_v29 = vpack.c.bf16 %v95_v28, %v94_v27  ;;  %v97_v31 = vld [vmem:[%s1136_s1 + $0x98] sm:$0xff]  ;;  %v98_v33 = vld [vmem:[%s1136_s1 + $0xa0] sm:$0xff]  ;;  %v99_v34 = vld [vmem:[%s1136_s1 + $0xa8] sm:$0xff] }
   0x9   :  { %520 = vmatprep.subr.bf16.mxu0 %v597_v0  ;;  %565 = vmatprep.subr.bf16.mxu1 %v597_v0  ;;  %v542_v32 = vpack.c.bf16 %v97_v31, %v96_v30  ;;  %v545_v35 = vpack.c.bf16 %v99_v34, %v98_v33  ;;  %v100_v36 = vld [vmem:[%s1136_s1 + $0xb0] sm:$0xff]  ;;  %v101_v37 = vld [vmem:[%s1136_s1 + $0xb8] sm:$0xff]  ;;  %v102_v39 = vld [vmem:[%s1136_s1 + $0xc0] sm:$0xff] }
   0xa   :  { %v548_v38 = vpack.c.bf16 %v101_v37, %v100_v36  ;;  %v103_v40 = vld [vmem:[%s1136_s1 + $0xc8] sm:$0xff]  ;;  %v104_v42 = vld [vmem:[%s1136_s1 + $0xd0] sm:$0xff]  ;;  %v105_v43 = vld [vmem:[%s1136_s1 + $0xd8] sm:$0xff] }
   0xb   :  { %v551_v41 = vpack.c.bf16 %v103_v40, %v102_v39  ;;  %v554_v44 = vpack.c.bf16 %v105_v43, %v104_v42  ;;  %v106_v45 = vld [vmem:[%s1136_s1 + $0xe0] sm:$0xff]  ;;  %v107_v46 = vld [vmem:[%s1136_s1 + $0xe8] sm:$0xff]  ;;  %v108_v48 = vld [vmem:[%s1136_s1 + $0xf0] sm:$0xff] }
   0xc   :  { %522 = vmatpush1.bf16.msra.mxu0 %v521_v9  ;;  %581 = vmatpush1.bf16.msra.mxu1 %v521_v9  ;;  %v557_v47 = vpack.c.bf16 %v107_v46, %v106_v45  ;;  %v109_v49 = vld [vmem:[%s1136_s1 + $0xf8] sm:$0x3]  ;;  %vm561_vm3 = vmpackc.low %vm214_vm1, %vm598_vm2  ;;  %v14_v51 = vld [vmem:[%s1137_s0] sm:$0xff] }
   0xd   :  { %523 = vmatprep.subr.bf16.mxu0 %v597_v0  ;;  %566 = vmatprep.subr.bf16.mxu1 %v597_v0  ;;  %v560_v50 = vpack.c.bf16 %v109_v49, %v108_v48  ;;  %v46_v52 = vld [vmem:[%s1137_s0 + $0x100] sm:$0xff]  ;;  %v17_v53 = vld [vmem:[%s1137_s0 + $0x18] sm:$0xff]  ;;  %v16_v55 = vld [vmem:[%s1137_s0 + $0x10] sm:$0xff] }
   0xe   :  { %v49_v54 = vld [vmem:[%s1137_s0 + $0x118] sm:$0xff]  ;;  %v48_v56 = vld [vmem:[%s1137_s0 + $0x110] sm:$0xff]  ;;  %v19_v57 = vld [vmem:[%s1137_s0 + $0x28] sm:$0xff] }
   0xf   :  { %v51_v58 = vld [vmem:[%s1137_s0 + $0x128] sm:$0xff]  ;;  %v18_v59 = vld [vmem:[%s1137_s0 + $0x20] sm:$0xff]  ;;  %v21_v61 = vld [vmem:[%s1137_s0 + $0x38] sm:$0xff] }
  0x10   :  { %525 = vmatpush1.bf16.msra.mxu0 %v524_v12  ;;  %582 = vmatpush1.bf16.msra.mxu1 %v524_v12  ;;  %v50_v60 = vld [vmem:[%s1137_s0 + $0x120] sm:$0xff]  ;;  %v53_v62 = vld [vmem:[%s1137_s0 + $0x138] sm:$0xff]  ;;  %v20_v63 = vld [vmem:[%s1137_s0 + $0x30] sm:$0xff] }
  0x11   :  { %526 = vmatprep.subr.bf16.mxu0 %v597_v0  ;;  %567 = vmatprep.subr.bf16.mxu1 %v597_v0  ;;  %v23_v1 = vld [vmem:[%s1137_s0 + $0x48] sm:$0xff]  ;;  %v22_v3 = vld [vmem:[%s1137_s0 + $0x40] sm:$0xff]  ;;  %v25_v5 = vld [vmem:[%s1137_s0 + $0x58] sm:$0xff] }
  0x12   :  { %v55_v2 = vld [vmem:[%s1137_s0 + $0x148] sm:$0xff]  ;;  %v54_v4 = vld [vmem:[%s1137_s0 + $0x140] sm:$0xff]  ;;  %v57_v6 = vld [vmem:[%s1137_s0 + $0x158] sm:$0xff] }
  0x13   :  { %v24_v7 = vld [vmem:[%s1137_s0 + $0x50] sm:$0xff]  ;;  %v27_v9 = vld [vmem:[%s1137_s0 + $0x68] sm:$0xff]  ;;  %v26_v11 = vld [vmem:[%s1137_s0 + $0x60] sm:$0xff] }
  0x14   :  { %528 = vmatpush1.bf16.msra.mxu0 %v527_v17  ;;  %583 = vmatpush1.bf16.msra.mxu1 %v527_v17  ;;  %v56_v8 = vld [vmem:[%s1137_s0 + $0x150] sm:$0xff]  ;;  %v59_v10 = vld [vmem:[%s1137_s0 + $0x168] sm:$0xff]  ;;  %v58_v12 = vld [vmem:[%s1137_s0 + $0x160] sm:$0xff] }
  0x15   :  { %529 = vmatprep.subr.bf16.mxu0 %v597_v0  ;;  %568 = vmatprep.subr.bf16.mxu1 %v597_v0  ;;  %v29_v13 = vld [vmem:[%s1137_s0 + $0x78] sm:$0xff]  ;;  %v28_v15 = vld [vmem:[%s1137_s0 + $0x70] sm:$0xff]  ;;  %v31_v17 = vld [vmem:[%s1137_s0 + $0x88] sm:$0xff] }
  0x16   :  { %v61_v14 = vld [vmem:[%s1137_s0 + $0x178] sm:$0xff]  ;;  %v60_v16 = vld [vmem:[%s1137_s0 + $0x170] sm:$0xff]  ;;  %v63_v18 = vld [vmem:[%s1137_s0 + $0x188] sm:$0xff] }
  0x17   :  { %v30_v19 = vld [vmem:[%s1137_s0 + $0x80] sm:$0xff]  ;;  %v33_v21 = vld [vmem:[%s1137_s0 + $0x98] sm:$0xff]  ;;  %v64_v24 = vld [vmem:[%s1137_s0 + $0x190] sm:$0xff] }
  0x18   :  { %531 = vmatpush1.bf16.msra.mxu0 %v530_v20  ;;  %584 = vmatpush1.bf16.msra.mxu1 %v530_v20  ;;  %v62_v20 = vld [vmem:[%s1137_s0 + $0x180] sm:$0xff]  ;;  %v65_v22 = vld [vmem:[%s1137_s0 + $0x198] sm:$0xff]  ;;  %v35_v25 = vld [vmem:[%s1137_s0 + $0xa8] sm:$0xff] }
  0x19   :  { %532 = vmatprep.subr.bf16.mxu0 %v597_v0  ;;  %569 = vmatprep.subr.bf16.mxu1 %v597_v0  ;;  %v34_v27 = vld [vmem:[%s1137_s0 + $0xa0] sm:$0xff]  ;;  %v69_v30 = vld [vmem:[%s1137_s0 + $0x1b8] sm:$0xff]  ;;  %v36_v31 = vld [vmem:[%s1137_s0 + $0xb0] sm:$0xff] }
  0x1a   :  { %v66_v28 = vld [vmem:[%s1137_s0 + $0x1a0] sm:$0xff]  ;;  %v39_v33 = vld [vmem:[%s1137_s0 + $0xc8] sm:$0xff]  ;;  %v41_v37 = vld [vmem:[%s1137_s0 + $0xd8] sm:$0xff] }
  0x1b   :  { %v71_v34 = vld [vmem:[%s1137_s0 + $0x1c8] sm:$0xff]  ;;  %v70_v36 = vld [vmem:[%s1137_s0 + $0x1c0] sm:$0xff]  ;;  %v40_v39 = vld [vmem:[%s1137_s0 + $0xd0] sm:$0xff] }
  0x1c   :  { %534 = vmatpush1.bf16.msra.mxu0 %v533_v23  ;;  %585 = vmatpush1.bf16.msra.mxu1 %v533_v23  ;;  %v32_v23 = vld [vmem:[%s1137_s0 + $0x90] sm:$0xff]  ;;  %v75_v42 = vld [vmem:[%s1137_s0 + $0x1e8] sm:$0xff]  ;;  %v42_v43 = vld [vmem:[%s1137_s0 + $0xe0] sm:$0xff] }
  0x1d   :  { %535 = vmatprep.subr.bf16.mxu0 %v597_v0  ;;  %570 = vmatprep.subr.bf16.mxu1 %v597_v0  ;;  %v72_v40 = vld [vmem:[%s1137_s0 + $0x1d0] sm:$0xff]  ;;  %v45_v45 = vld [vmem:[%s1137_s0 + $0xf8] sm:$0xff]  ;;  %v974_v49 = vld [vmem:[%s1138_s2] ss:$0 sm:$0xff] }
  0x1e   :  { %v77_v46 = vld [vmem:[%s1137_s0 + $0x1f8] sm:$0xff]  ;;  %v76_v48 = vld [vmem:[%s1137_s0 + $0x1f0] sm:$0xff] }
  0x20   :  { %537 = vmatpush1.bf16.msra.mxu0 %v536_v26  ;;  %586 = vmatpush1.bf16.msra.mxu1 %v536_v26  ;;  %v67_v26 = vld [vmem:[%s1137_s0 + $0x1a8] sm:$0xff] }
  0x21   :  { %538 = vmatprep.subr.bf16.mxu0 %v597_v0  ;;  %571 = vmatprep.subr.bf16.mxu1 %v597_v0 }
  0x24   :  { %540 = vmatpush1.bf16.msra.mxu0 %v539_v29  ;;  %587 = vmatpush1.bf16.msra.mxu1 %v539_v29  ;;  %v37_v29 = vld [vmem:[%s1137_s0 + $0xb8] sm:$0xff] }
  0x25   :  { %541 = vmatprep.subr.bf16.mxu0 %v597_v0  ;;  %572 = vmatprep.subr.bf16.mxu1 %v597_v0 }
  0x28   :  { %543 = vmatpush1.bf16.msra.mxu0 %v542_v32  ;;  %588 = vmatpush1.bf16.msra.mxu1 %v542_v32  ;;  %v68_v32 = vld [vmem:[%s1137_s0 + $0x1b0] sm:$0xff] }
  0x29   :  { %544 = vmatprep.subr.bf16.mxu0 %v597_v0  ;;  %573 = vmatprep.subr.bf16.mxu1 %v597_v0 }
  0x2c   :  { %546 = vmatpush1.bf16.msra.mxu0 %v545_v35  ;;  %589 = vmatpush1.bf16.msra.mxu1 %v545_v35  ;;  %v38_v35 = vld [vmem:[%s1137_s0 + $0xc0] sm:$0xff] }
  0x2d   :  { %547 = vmatprep.subr.bf16.mxu0 %v597_v0  ;;  %574 = vmatprep.subr.bf16.mxu1 %v597_v0 }
  0x30   :  { %549 = vmatpush1.bf16.msra.mxu0 %v548_v38  ;;  %590 = vmatpush1.bf16.msra.mxu1 %v548_v38  ;;  %v73_v38 = vld [vmem:[%s1137_s0 + $0x1d8] sm:$0xff] }
  0x31   :  { %550 = vmatprep.subr.bf16.mxu0 %v597_v0  ;;  %575 = vmatprep.subr.bf16.mxu1 %v597_v0 }
  0x34   :  { %552 = vmatpush1.bf16.msra.mxu0 %v551_v41  ;;  %591 = vmatpush1.bf16.msra.mxu1 %v551_v41  ;;  %v43_v41 = vld [vmem:[%s1137_s0 + $0xe8] sm:$0xff] }
  0x35   :  { %553 = vmatprep.subr.bf16.mxu0 %v597_v0  ;;  %576 = vmatprep.subr.bf16.mxu1 %v597_v0 }
  0x38   :  { %555 = vmatpush1.bf16.msra.mxu0 %v554_v44  ;;  %592 = vmatpush1.bf16.msra.mxu1 %v554_v44  ;;  %v74_v44 = vld [vmem:[%s1137_s0 + $0x1e0] sm:$0xff] }
  0x39   :  { %556 = vmatprep.subr.bf16.mxu0 %v597_v0  ;;  %577 = vmatprep.subr.bf16.mxu1 %v597_v0 }
  0x3c   :  { %558 = vmatpush1.bf16.msra.mxu0 %v557_v47  ;;  %593 = vmatpush1.bf16.msra.mxu1 %v557_v47  ;;  %v44_v47 = vld [vmem:[%s1137_s0 + $0xf0] sm:$0xff] }
  0x3d   :  { %559 = vmatprep.subr.bf16.mxu0 %v597_v0  ;;  %578 = vmatprep.subr.bf16.mxu1 %v597_v0  ;;  %v52_v0 = vld [vmem:[%s1137_s0 + $0x130] sm:$0xff] }
  0x40   :  { %562 = vmatpush1.bf16.msk.msra.mxu0 %vm561_vm3, %v560_v50  ;;  %594 = vmatpush1.bf16.msk.msra.mxu1 %vm561_vm3, %v560_v50 }
  0x43   :  { %283 = vmatmul.mubr.f32.vlgmr.msra.gmra.mrb[0].mxu0 %v14_v51  ;;  %363 = vmatmul.mubr.f32.vlgmr.msra.gmra.mrb[0].mxu1 %v46_v52 }
  0x44   :  { %483 = vmatprep.mubr.msk.f32.mxu0 %vm117_vm0, %v17_v53  ;;  %499 = vmatprep.mubr.msk.f32.mxu1 %vm117_vm0, %v49_v54 }
  0x47   :  { %288 = vmatmul.mubr.f32.gmra.mrb[2].mxu0 %v16_v55  ;;  %368 = vmatmul.mubr.f32.gmra.mrb[2].mxu1 %v48_v56 }
  0x48   :  { %484 = vmatprep.mubr.msk.f32.mxu0 %vm117_vm0, %v19_v57  ;;  %500 = vmatprep.mubr.msk.f32.mxu1 %vm117_vm0, %v51_v58 }
  0x4b   :  { %293 = vmatmul.mubr.f32.gmra.mrb[4].mxu0 %v18_v59  ;;  %373 = vmatmul.mubr.f32.gmra.mrb[4].mxu1 %v50_v60 }
  0x4c   :  { %485 = vmatprep.mubr.msk.f32.mxu0 %vm117_vm0, %v21_v61  ;;  %501 = vmatprep.mubr.msk.f32.mxu1 %vm117_vm0, %v53_v62 }
  0x4f   :  { %298 = vmatmul.mubr.f32.gmra.mrb[6].mxu0 %v20_v63  ;;  %378 = vmatmul.mubr.f32.gmra.mrb[6].mxu1 %v52_v0 }
  0x50   :  { %486 = vmatprep.mubr.msk.f32.mxu0 %vm117_vm0, %v23_v1  ;;  %502 = vmatprep.mubr.msk.f32.mxu1 %vm117_vm0, %v55_v2 }
  0x53   :  { %303 = vmatmul.mubr.f32.gmra.mrb[8].mxu0 %v22_v3  ;;  %383 = vmatmul.mubr.f32.gmra.mrb[8].mxu1 %v54_v4 }
  0x54   :  { %487 = vmatprep.mubr.msk.f32.mxu0 %vm117_vm0, %v25_v5  ;;  %503 = vmatprep.mubr.msk.f32.mxu1 %vm117_vm0, %v57_v6 }
  0x57   :  { %308 = vmatmul.mubr.f32.gmra.mrb[10].mxu0 %v24_v7  ;;  %388 = vmatmul.mubr.f32.gmra.mrb[10].mxu1 %v56_v8 }
  0x58   :  { %488 = vmatprep.mubr.msk.f32.mxu0 %vm117_vm0, %v27_v9  ;;  %504 = vmatprep.mubr.msk.f32.mxu1 %vm117_vm0, %v59_v10 }
  0x5b   :  { %313 = vmatmul.mubr.f32.gmra.mrb[12].mxu0 %v26_v11  ;;  %393 = vmatmul.mubr.f32.gmra.mrb[12].mxu1 %v58_v12 }
  0x5c   :  { %489 = vmatprep.mubr.msk.f32.mxu0 %vm117_vm0, %v29_v13  ;;  %505 = vmatprep.mubr.msk.f32.mxu1 %vm117_vm0, %v61_v14 }
  0x5f   :  { %318 = vmatmul.mubr.f32.gmra.mrb[14].mxu0 %v28_v15  ;;  %398 = vmatmul.mubr.f32.gmra.mrb[14].mxu1 %v60_v16 }
  0x60   :  { %490 = vmatprep.mubr.msk.f32.mxu0 %vm117_vm0, %v31_v17  ;;  %506 = vmatprep.mubr.msk.f32.mxu1 %vm117_vm0, %v63_v18 }
  0x63   :  { %323 = vmatmul.mubr.f32.gmra.mrb[16].mxu0 %v30_v19  ;;  %403 = vmatmul.mubr.f32.gmra.mrb[16].mxu1 %v62_v20 }
  0x64   :  { %491 = vmatprep.mubr.msk.f32.mxu0 %vm117_vm0, %v33_v21  ;;  %507 = vmatprep.mubr.msk.f32.mxu1 %vm117_vm0, %v65_v22 }
  0x67   :  { %328 = vmatmul.mubr.f32.gmra.mrb[18].mxu0 %v32_v23  ;;  %408 = vmatmul.mubr.f32.gmra.mrb[18].mxu1 %v64_v24 }
  0x68   :  { %492 = vmatprep.mubr.msk.f32.mxu0 %vm117_vm0, %v35_v25  ;;  %508 = vmatprep.mubr.msk.f32.mxu1 %vm117_vm0, %v67_v26 }
  0x6b   :  { %333 = vmatmul.mubr.f32.gmra.mrb[20].mxu0 %v34_v27  ;;  %413 = vmatmul.mubr.f32.gmra.mrb[20].mxu1 %v66_v28 }
  0x6c   :  { %493 = vmatprep.mubr.msk.f32.mxu0 %vm117_vm0, %v37_v29  ;;  %509 = vmatprep.mubr.msk.f32.mxu1 %vm117_vm0, %v69_v30 }
  0x6f   :  { %338 = vmatmul.mubr.f32.gmra.mrb[22].mxu0 %v36_v31  ;;  %418 = vmatmul.mubr.f32.gmra.mrb[22].mxu1 %v68_v32 }
  0x70   :  { %494 = vmatprep.mubr.msk.f32.mxu0 %vm117_vm0, %v39_v33  ;;  %510 = vmatprep.mubr.msk.f32.mxu1 %vm117_vm0, %v71_v34 }
  0x73   :  { %343 = vmatmul.mubr.f32.gmra.mrb[24].mxu0 %v38_v35  ;;  %423 = vmatmul.mubr.f32.gmra.mrb[24].mxu1 %v70_v36 }
  0x74   :  { %495 = vmatprep.mubr.msk.f32.mxu0 %vm117_vm0, %v41_v37  ;;  %511 = vmatprep.mubr.msk.f32.mxu1 %vm117_vm0, %v73_v38 }
  0x77   :  { %348 = vmatmul.mubr.f32.gmra.mrb[26].mxu0 %v40_v39  ;;  %428 = vmatmul.mubr.f32.gmra.mrb[26].mxu1 %v72_v40 }
  0x78   :  { %496 = vmatprep.mubr.msk.f32.mxu0 %vm117_vm0, %v43_v41  ;;  %512 = vmatprep.mubr.msk.f32.mxu1 %vm117_vm0, %v75_v42 }
  0x7b   :  { %353 = vmatmul.mubr.f32.gmra.mrb[28].mxu0 %v42_v43  ;;  %433 = vmatmul.mubr.f32.gmra.mrb[28].mxu1 %v74_v44 }
  0x7c   :  { %497 = vmatprep.mubr.msk.f32.mxu0 %vm117_vm0, %v45_v45  ;;  %513 = vmatprep.mubr.msk.f32.mxu1 %vm117_vm0, %v77_v46 }
  0x7f   :  { %358 = vmatmul.mubr.f32.gmra.mrb[30].mxu0 %v44_v47  ;;  %438 = vmatmul.mubr.f32.gmra.mrb[30].mxu1 %v76_v48 }
 0x116   :  { %v284_v50 = vpop.f32.mrb[0].mxu0  ;;  %v364_v51 = vpop.f32.mrb[0].mxu1 }
 0x117   :  { %v285_v52 = vadd.f32 %v974_v49, %v284_v50  ;;  %v365_v53 = vadd.f32 %v974_v49, %v364_v51  ;;  %v286_v54 = vpop.f32.mrb[1].mxu0  ;;  %v366_v55 = vpop.f32.mrb[1].mxu1 }
 0x119   :  { %444 = vst.msk [vmem:[%s1139_s3] sm:$0xff] %vm443_vm4, %v285_v52  ;;  %460 = vst.msk [vmem:[%s1139_s3 + $0x80] sm:$0xff] %vm443_vm4, %v365_v53 }
 0x11a   :  { %v289_v56 = vpop.f32.mrb[2].mxu0  ;;  %v369_v57 = vpop.f32.mrb[2].mxu1 }
 0x11b   :  { %v290_v58 = vadd.f32 %v974_v49, %v289_v56  ;;  %v370_v59 = vadd.f32 %v974_v49, %v369_v57  ;;  %v291_v60 = vpop.f32.mrb[3].mxu0  ;;  %v371_v61 = vpop.f32.mrb[3].mxu1 }
 0x11d   :  { %445 = vst.msk [vmem:[%s1139_s3 + $0x8] sm:$0xff] %vm443_vm4, %v290_v58  ;;  %461 = vst.msk [vmem:[%s1139_s3 + $0x88] sm:$0xff] %vm443_vm4, %v370_v59 }
 0x11e   :  { %v294_v62 = vpop.f32.mrb[4].mxu0  ;;  %v374_v63 = vpop.f32.mrb[4].mxu1 }
 0x11f   :  { %v295_v0 = vadd.f32 %v974_v49, %v294_v62  ;;  %v375_v1 = vadd.f32 %v974_v49, %v374_v63  ;;  %v296_v2 = vpop.f32.mrb[5].mxu0  ;;  %v376_v3 = vpop.f32.mrb[5].mxu1 }
 0x121   :  { %446 = vst.msk [vmem:[%s1139_s3 + $0x10] sm:$0xff] %vm443_vm4, %v295_v0  ;;  %462 = vst.msk [vmem:[%s1139_s3 + $0x90] sm:$0xff] %vm443_vm4, %v375_v1 }
 0x122   :  { %v299_v4 = vpop.f32.mrb[6].mxu0  ;;  %v379_v5 = vpop.f32.mrb[6].mxu1 }
 0x123   :  { %v300_v6 = vadd.f32 %v974_v49, %v299_v4  ;;  %v380_v7 = vadd.f32 %v974_v49, %v379_v5  ;;  %v301_v8 = vpop.f32.mrb[7].mxu0  ;;  %v381_v9 = vpop.f32.mrb[7].mxu1 }
 0x125   :  { %447 = vst.msk [vmem:[%s1139_s3 + $0x18] sm:$0xff] %vm443_vm4, %v300_v6  ;;  %463 = vst.msk [vmem:[%s1139_s3 + $0x98] sm:$0xff] %vm443_vm4, %v380_v7 }
 0x126   :  { %v304_v10 = vpop.f32.mrb[8].mxu0  ;;  %v384_v11 = vpop.f32.mrb[8].mxu1 }
 0x127   :  { %v305_v12 = vadd.f32 %v974_v49, %v304_v10  ;;  %v385_v13 = vadd.f32 %v974_v49, %v384_v11  ;;  %v306_v14 = vpop.f32.mrb[9].mxu0  ;;  %v386_v15 = vpop.f32.mrb[9].mxu1 }
 0x129   :  { %448 = vst.msk [vmem:[%s1139_s3 + $0x20] sm:$0xff] %vm443_vm4, %v305_v12  ;;  %464 = vst.msk [vmem:[%s1139_s3 + $0xa0] sm:$0xff] %vm443_vm4, %v385_v13 }
 0x12a   :  { %v309_v16 = vpop.f32.mrb[10].mxu0  ;;  %v389_v17 = vpop.f32.mrb[10].mxu1 }
 0x12b   :  { %v310_v18 = vadd.f32 %v974_v49, %v309_v16  ;;  %v390_v19 = vadd.f32 %v974_v49, %v389_v17  ;;  %v311_v20 = vpop.f32.mrb[11].mxu0  ;;  %v391_v21 = vpop.f32.mrb[11].mxu1 }
 0x12d   :  { %449 = vst.msk [vmem:[%s1139_s3 + $0x28] sm:$0xff] %vm443_vm4, %v310_v18  ;;  %465 = vst.msk [vmem:[%s1139_s3 + $0xa8] sm:$0xff] %vm443_vm4, %v390_v19 }
 0x12e   :  { %v314_v22 = vpop.f32.mrb[12].mxu0  ;;  %v394_v23 = vpop.f32.mrb[12].mxu1 }
 0x12f   :  { %v315_v24 = vadd.f32 %v974_v49, %v314_v22  ;;  %v395_v25 = vadd.f32 %v974_v49, %v394_v23  ;;  %v316_v26 = vpop.f32.mrb[13].mxu0  ;;  %v396_v27 = vpop.f32.mrb[13].mxu1 }
 0x131   :  { %450 = vst.msk [vmem:[%s1139_s3 + $0x30] sm:$0xff] %vm443_vm4, %v315_v24  ;;  %466 = vst.msk [vmem:[%s1139_s3 + $0xb0] sm:$0xff] %vm443_vm4, %v395_v25 }
 0x132   :  { %v319_v28 = vpop.f32.mrb[14].mxu0  ;;  %v399_v29 = vpop.f32.mrb[14].mxu1 }
 0x133   :  { %v320_v30 = vadd.f32 %v974_v49, %v319_v28  ;;  %v400_v31 = vadd.f32 %v974_v49, %v399_v29  ;;  %v321_v32 = vpop.f32.mrb[15].mxu0  ;;  %v401_v33 = vpop.f32.mrb[15].mxu1 }
 0x135   :  { %451 = vst.msk [vmem:[%s1139_s3 + $0x38] sm:$0xff] %vm443_vm4, %v320_v30  ;;  %467 = vst.msk [vmem:[%s1139_s3 + $0xb8] sm:$0xff] %vm443_vm4, %v400_v31 }
 0x136   :  { %v324_v34 = vpop.f32.mrb[16].mxu0  ;;  %v404_v35 = vpop.f32.mrb[16].mxu1 }
 0x137   :  { %v325_v36 = vadd.f32 %v974_v49, %v324_v34  ;;  %v405_v37 = vadd.f32 %v974_v49, %v404_v35  ;;  %v326_v38 = vpop.f32.mrb[17].mxu0  ;;  %v406_v39 = vpop.f32.mrb[17].mxu1 }
 0x139   :  { %452 = vst.msk [vmem:[%s1139_s3 + $0x40] sm:$0xff] %vm443_vm4, %v325_v36  ;;  %468 = vst.msk [vmem:[%s1139_s3 + $0xc0] sm:$0xff] %vm443_vm4, %v405_v37 }
 0x13a   :  { %v329_v40 = vpop.f32.mrb[18].mxu0  ;;  %v409_v41 = vpop.f32.mrb[18].mxu1 }
 0x13b   :  { %v330_v42 = vadd.f32 %v974_v49, %v329_v40  ;;  %v410_v43 = vadd.f32 %v974_v49, %v409_v41  ;;  %v331_v44 = vpop.f32.mrb[19].mxu0  ;;  %v411_v45 = vpop.f32.mrb[19].mxu1 }
 0x13d   :  { %453 = vst.msk [vmem:[%s1139_s3 + $0x48] sm:$0xff] %vm443_vm4, %v330_v42  ;;  %469 = vst.msk [vmem:[%s1139_s3 + $0xc8] sm:$0xff] %vm443_vm4, %v410_v43 }
 0x13e   :  { %v334_v46 = vpop.f32.mrb[20].mxu0  ;;  %v414_v47 = vpop.f32.mrb[20].mxu1 }
 0x13f   :  { %v335_v48 = vadd.f32 %v974_v49, %v334_v46  ;;  %v415_v50 = vadd.f32 %v974_v49, %v414_v47  ;;  %v336_v51 = vpop.f32.mrb[21].mxu0  ;;  %v416_v52 = vpop.f32.mrb[21].mxu1 }
 0x141   :  { %454 = vst.msk [vmem:[%s1139_s3 + $0x50] sm:$0xff] %vm443_vm4, %v335_v48  ;;  %470 = vst.msk [vmem:[%s1139_s3 + $0xd0] sm:$0xff] %vm443_vm4, %v415_v50 }
 0x142   :  { %v339_v53 = vpop.f32.mrb[22].mxu0  ;;  %v419_v54 = vpop.f32.mrb[22].mxu1 }
 0x143   :  { %v340_v55 = vadd.f32 %v974_v49, %v339_v53  ;;  %v420_v56 = vadd.f32 %v974_v49, %v419_v54  ;;  %v341_v57 = vpop.f32.mrb[23].mxu0  ;;  %v421_v58 = vpop.f32.mrb[23].mxu1 }
 0x145   :  { %455 = vst.msk [vmem:[%s1139_s3 + $0x58] sm:$0xff] %vm443_vm4, %v340_v55  ;;  %471 = vst.msk [vmem:[%s1139_s3 + $0xd8] sm:$0xff] %vm443_vm4, %v420_v56 }
 0x146   :  { %v344_v59 = vpop.f32.mrb[24].mxu0  ;;  %v424_v60 = vpop.f32.mrb[24].mxu1 }
 0x147   :  { %v345_v61 = vadd.f32 %v974_v49, %v344_v59  ;;  %v425_v62 = vadd.f32 %v974_v49, %v424_v60  ;;  %v346_v63 = vpop.f32.mrb[25].mxu0  ;;  %v426_v0 = vpop.f32.mrb[25].mxu1 }
 0x149   :  { %456 = vst.msk [vmem:[%s1139_s3 + $0x60] sm:$0xff] %vm443_vm4, %v345_v61  ;;  %472 = vst.msk [vmem:[%s1139_s3 + $0xe0] sm:$0xff] %vm443_vm4, %v425_v62 }
 0x14a   :  { %v349_v1 = vpop.f32.mrb[26].mxu0  ;;  %v429_v2 = vpop.f32.mrb[26].mxu1 }
 0x14b   :  { %v350_v3 = vadd.f32 %v974_v49, %v349_v1  ;;  %v430_v4 = vadd.f32 %v974_v49, %v429_v2  ;;  %v351_v5 = vpop.f32.mrb[27].mxu0  ;;  %v431_v6 = vpop.f32.mrb[27].mxu1 }
 0x14d   :  { %457 = vst.msk [vmem:[%s1139_s3 + $0x68] sm:$0xff] %vm443_vm4, %v350_v3  ;;  %473 = vst.msk [vmem:[%s1139_s3 + $0xe8] sm:$0xff] %vm443_vm4, %v430_v4 }
 0x14e   :  { %v354_v7 = vpop.f32.mrb[28].mxu0  ;;  %v434_v8 = vpop.f32.mrb[28].mxu1 }
 0x14f   :  { %v355_v9 = vadd.f32 %v974_v49, %v354_v7  ;;  %v435_v10 = vadd.f32 %v974_v49, %v434_v8  ;;  %v356_v11 = vpop.f32.mrb[29].mxu0  ;;  %v436_v12 = vpop.f32.mrb[29].mxu1 }
 0x151   :  { %458 = vst.msk [vmem:[%s1139_s3 + $0x70] sm:$0xff] %vm443_vm4, %v355_v9  ;;  %474 = vst.msk [vmem:[%s1139_s3 + $0xf0] sm:$0xff] %vm443_vm4, %v435_v10 }
 0x152   :  { %v359_v13 = vpop.f32.mrb[30].mxu0  ;;  %v439_v14 = vpop.f32.mrb[30].mxu1 }
 0x153   :  { %v360_v15 = vadd.f32 %v974_v49, %v359_v13  ;;  %v440_v16 = vadd.f32 %v974_v49, %v439_v14  ;;  %v361_v17 = vpop.f32.mrb[31].mxu0  ;;  %v441_v18 = vpop.f32.mrb[31].mxu1 }
 0x155   :  { %459 = vst.msk [vmem:[%s1139_s3 + $0x78] sm:$0xff] %vm443_vm4, %v360_v15  ;;  %475 = vst.msk [vmem:[%s1139_s3 + $0xf8] sm:$0xff] %vm443_vm4, %v440_v16 }

// kernel: forward.20
= control target key start
LH: loop header
LB: loop body
LE: loop exit
PB: predicated region body
PF: predicated region fallthrough
CT: control target
= control target key end

     0   :  { %vm43_vm0 = vcmask 523264   ;;  %s119_s0 = inlined_call_operand.vmem [shape: f32[8,320], index: 0, kind: input, shape index: {}]   ;;  %s120_s1 = inlined_call_operand.vmem [shape: f32[8,320], index: 1, kind: input, shape index: {}]   ;;  %s121_s2 = inlined_call_operand.vmem [shape: f32[8,320], index: 2, kind: input, shape index: {}]   ;;  %s122_s3 = inlined_call_operand.vmem [shape: f32[8,320], index: 3, kind: input, shape index: {}]   ;;  %s123_s4 = inlined_call_operand.vmem [shape: f32[8,320], index: 4, kind: output, shape index: {}]  }
   0x1   :  { %v17_v0 = vld [vmem:[%s119_s0] sm:$0xff]  ;;  %v18_v5 = vld [vmem:[%s119_s0 + $0x8] sm:$0xff]  ;;  %v19_v11 = vld [vmem:[%s119_s0 + $0x10] sm:$0xff] }
   0x2   :  { %v20_v1 = vld [vmem:[%s120_s1] sm:$0xff]  ;;  %v21_v6 = vld [vmem:[%s120_s1 + $0x8] sm:$0xff]  ;;  %v22_v13 = vld [vmem:[%s120_s1 + $0x10] sm:$0xff] }
   0x3   :  { %v26_v2 = vld [vmem:[%s121_s2] sm:$0xff]  ;;  %v23_v3 = vmax.f32 %v17_v0, %v20_v1  ;;  %v24_v8 = vmax.f32 %v18_v5, %v21_v6  ;;  %v27_v9 = vld [vmem:[%s121_s2 + $0x8] sm:$0xff]  ;;  %v28_v14 = vld [vmem:[%s121_s2 + $0x10] sm:$0xff]  ;;  %v25_v17 = vmax.f32 %v19_v11, %v22_v13 }
   0x4   :  { %v29_v4 = vld [vmem:[%s122_s3] sm:$0xff]  ;;  %v30_v10 = vld [vmem:[%s122_s3 + $0x8] sm:$0xff]  ;;  %v31_v15 = vld [vmem:[%s122_s3 + $0x10] sm:$0xff] }
   0x5   :  { %v32_v7 = vmax.f32 %v26_v2, %v29_v4  ;;  %v33_v12 = vmax.f32 %v27_v9, %v30_v10  ;;  %v34_v18 = vmax.f32 %v28_v14, %v31_v15 }
   0x7   :  { %v35_v16 = vmax.f32 %v23_v3, %v32_v7  ;;  %v36_v19 = vmax.f32 %v24_v8, %v33_v12  ;;  %v37_v21 = vmax.f32 %v25_v17, %v34_v18 }
   0x9   :  { %v38_v20 = vmax.f32 %v35_v16, 0.0  ;;  %v39_v22 = vmax.f32 %v36_v19, 0.0  ;;  %v40_v23 = vmax.f32 %v37_v21, 0.0 }
   0xb   :  { %41 = vst [vmem:[%s123_s4] sm:$0xff] %v38_v20  ;;  %42 = vst [vmem:[%s123_s4 + $0x8] sm:$0xff] %v39_v22 }
   0xc   :  { %44 = vst.msk [vmem:[%s123_s4 + $0x10] sm:$0xff] %vm43_vm0, %v40_v23 }

// kernel: forward.21
= control target key start
LH: loop header
LB: loop body
LE: loop exit
PB: predicated region body
PF: predicated region fallthrough
CT: control target
= control target key end

     0   :  { %vm689_vm0 = vmmov 0   ;;  %vm341_vm1 = vcmask 1041408   ;;  %vm337_vm2 = vcmask 408576   ;;  %vm415_vm3 = vcmask 154624   ;;  %s1009_s1 = inlined_call_operand.vmem [shape: f32[640,50], index: 1, kind: input, shape index: {}]   ;;  %s1010_s0 = inlined_call_operand.vmem [shape: f32[8,640], index: 0, kind: input, shape index: {}]   ;;  %s1011_s3 = inlined_call_operand.vmem [shape: f32[50,19], index: 3, kind: input, shape index: {}]   ;;  %s1012_s2 = inlined_call_operand.vmem [shape: f32[1,50], index: 2, kind: input, shape index: {}]   ;;  %s1013_s4 = inlined_call_operand.vmem [shape: f32[1,19], index: 4, kind: input, shape index: {}]   ;;  %s1014_s5 = inlined_call_operand.vmem [shape: f32[8,19], index: 5, kind: output, shape index: {}]  }
   0x1   :  { %v41_v0 = vld [vmem:[%s1009_s1 + $0x80] sm:$0xff]  ;;  %v42_v1 = vld [vmem:[%s1009_s1 + $0x88] sm:$0xff]  ;;  %v43_v11 = vld [vmem:[%s1009_s1 + $0x90] sm:$0xff] }
   0x2   :  { %v25_v2 = vld [vmem:[%s1009_s1] sm:$0xff]  ;;  %v584_v3 = vpack.c.bf16 %v42_v1, %v41_v0  ;;  %v26_v4 = vld [vmem:[%s1009_s1 + $0x8] sm:$0xff]  ;;  %v44_v13 = vld [vmem:[%s1009_s1 + $0x98] sm:$0xff] }
   0x3   :  { %v73_v5 = vld [vmem:[%s1009_s1 + $0x180] sm:$0xff]  ;;  %v74_v6 = vld [vmem:[%s1009_s1 + $0x188] sm:$0xff]  ;;  %v586_v7 = vpack.c.bf16 %v26_v4, %v25_v2  ;;  %v27_v14 = vld [vmem:[%s1009_s1 + $0x10] sm:$0xff]  ;;  %v588_v16 = vpack.c.bf16 %v44_v13, %v43_v11 }
   0x4   :  { %v616_v8 = vpack.c.bf16 %v74_v6, %v73_v5  ;;  %v57_v9 = vld [vmem:[%s1009_s1 + $0x100] sm:$0xff]  ;;  %v58_v10 = vld [vmem:[%s1009_s1 + $0x108] sm:$0xff]  ;;  %585 = vmatprep.subr.bf16.mxu0 %v584_v3  ;;  %v28_v15 = vld [vmem:[%s1009_s1 + $0x18] sm:$0xff] }
   0x5   :  { %v618_v12 = vpack.c.bf16 %v58_v10, %v57_v9  ;;  %587 = vmatpush3.bf16.msra.mxu0 %v586_v7  ;;  %v590_v17 = vpack.c.bf16 %v28_v15, %v27_v14  ;;  %v75_v18 = vld [vmem:[%s1009_s1 + $0x190] sm:$0xff]  ;;  %v76_v19 = vld [vmem:[%s1009_s1 + $0x198] sm:$0xff]  ;;  %v45_v23 = vld [vmem:[%s1009_s1 + $0xa0] sm:$0xff] }
   0x6   :  { %617 = vmatprep.subr.bf16.mxu1 %v616_v8  ;;  %v59_v20 = vld [vmem:[%s1009_s1 + $0x110] sm:$0xff]  ;;  %v620_v21 = vpack.c.bf16 %v76_v19, %v75_v18  ;;  %v60_v22 = vld [vmem:[%s1009_s1 + $0x118] sm:$0xff]  ;;  %v46_v24 = vld [vmem:[%s1009_s1 + $0xa8] sm:$0xff]  ;;  %589 = vmatprep.subr.bf16.mxu0 %v588_v16 }
   0x7   :  { %619 = vmatpush3.bf16.msra.mxu1 %v618_v12  ;;  %v622_v25 = vpack.c.bf16 %v60_v22, %v59_v20  ;;  %v592_v26 = vpack.c.bf16 %v46_v24, %v45_v23  ;;  %v29_v27 = vld [vmem:[%s1009_s1 + $0x20] sm:$0xff]  ;;  %v30_v28 = vld [vmem:[%s1009_s1 + $0x28] sm:$0xff]  ;;  %v47_v35 = vld [vmem:[%s1009_s1 + $0xb0] sm:$0xff] }
   0x8   :  { %v77_v29 = vld [vmem:[%s1009_s1 + $0x1a0] sm:$0xff]  ;;  %621 = vmatprep.subr.bf16.mxu1 %v620_v21  ;;  %v78_v30 = vld [vmem:[%s1009_s1 + $0x1a8] sm:$0xff]  ;;  %v594_v33 = vpack.c.bf16 %v30_v28, %v29_v27  ;;  %v48_v36 = vld [vmem:[%s1009_s1 + $0xb8] sm:$0xff] }
   0x9   :  { %v61_v31 = vld [vmem:[%s1009_s1 + $0x120] sm:$0xff]  ;;  %v62_v32 = vld [vmem:[%s1009_s1 + $0x128] sm:$0xff]  ;;  %591 = vmatpush3.bf16.msra.mxu0 %v590_v17  ;;  %v624_v34 = vpack.c.bf16 %v78_v30, %v77_v29  ;;  %v31_v37 = vld [vmem:[%s1009_s1 + $0x30] sm:$0xff]  ;;  %v596_v39 = vpack.c.bf16 %v48_v36, %v47_v35 }
   0xa   :  { %593 = vmatprep.subr.bf16.mxu0 %v592_v26  ;;  %v626_v38 = vpack.c.bf16 %v62_v32, %v61_v31  ;;  %v32_v40 = vld [vmem:[%s1009_s1 + $0x38] sm:$0xff]  ;;  %v79_v41 = vld [vmem:[%s1009_s1 + $0x1b0] sm:$0xff]  ;;  %v49_v46 = vld [vmem:[%s1009_s1 + $0xc0] sm:$0xff] }
   0xb   :  { %623 = vmatpush3.bf16.msra.mxu1 %v622_v25  ;;  %v80_v42 = vld [vmem:[%s1009_s1 + $0x1b8] sm:$0xff]  ;;  %v63_v44 = vld [vmem:[%s1009_s1 + $0x130] sm:$0xff]  ;;  %v50_v47 = vld [vmem:[%s1009_s1 + $0xc8] sm:$0xff]  ;;  %v598_v48 = vpack.c.bf16 %v32_v40, %v31_v37 }
   0xc   :  { %625 = vmatprep.subr.bf16.mxu1 %v624_v34  ;;  %v628_v43 = vpack.c.bf16 %v80_v42, %v79_v41  ;;  %v64_v45 = vld [vmem:[%s1009_s1 + $0x138] sm:$0xff]  ;;  %v81_v49 = vld [vmem:[%s1009_s1 + $0x1c0] sm:$0xff]  ;;  %v82_v50 = vld [vmem:[%s1009_s1 + $0x1c8] sm:$0xff]  ;;  %v600_v52 = vpack.c.bf16 %v50_v47, %v49_v46 }
   0xd   :  { %595 = vmatpush3.bf16.msra.mxu0 %v594_v33  ;;  %v630_v51 = vpack.c.bf16 %v64_v45, %v63_v44  ;;  %v33_v53 = vld [vmem:[%s1009_s1 + $0x40] sm:$0xff]  ;;  %v34_v54 = vld [vmem:[%s1009_s1 + $0x48] sm:$0xff]  ;;  %v632_v56 = vpack.c.bf16 %v82_v50, %v81_v49  ;;  %v51_v58 = vld [vmem:[%s1009_s1 + $0xd0] sm:$0xff]  ;;  %v690_v45 = vmov 0.0  }
   0xe   :  { %597 = vmatprep.subr.bf16.mxu0 %v596_v39  ;;  %v65_v55 = vld [vmem:[%s1009_s1 + $0x140] sm:$0xff]  ;;  %v66_v57 = vld [vmem:[%s1009_s1 + $0x148] sm:$0xff]  ;;  %v52_v59 = vld [vmem:[%s1009_s1 + $0xd8] sm:$0xff]  ;;  %v602_v62 = vpack.c.bf16 %v34_v54, %v33_v53 }
   0xf   :  { %627 = vmatpush3.bf16.msra.mxu1 %v626_v38  ;;  %v83_v60 = vld [vmem:[%s1009_s1 + $0x1d0] sm:$0xff]  ;;  %v84_v61 = vld [vmem:[%s1009_s1 + $0x1d8] sm:$0xff]  ;;  %v634_v63 = vpack.c.bf16 %v66_v57, %v65_v55  ;;  %v604_v0 = vpack.c.bf16 %v52_v59, %v51_v58  ;;  %v53_v6 = vld [vmem:[%s1009_s1 + $0xe0] sm:$0xff]  ;;  %v688_v38 = vmov 0.0|0.0  }
  0x10   :  { %629 = vmatprep.subr.bf16.mxu1 %v628_v43  ;;  %v35_v1 = vld [vmem:[%s1009_s1 + $0x50] sm:$0xff]  ;;  %v36_v2 = vld [vmem:[%s1009_s1 + $0x58] sm:$0xff]  ;;  %v636_v4 = vpack.c.bf16 %v84_v61, %v83_v60  ;;  %v54_v7 = vld [vmem:[%s1009_s1 + $0xe8] sm:$0xff] }
  0x11   :  { %599 = vmatpush3.bf16.msra.mxu0 %v598_v48  ;;  %v67_v3 = vld [vmem:[%s1009_s1 + $0x150] sm:$0xff]  ;;  %v68_v5 = vld [vmem:[%s1009_s1 + $0x158] sm:$0xff]  ;;  %v85_v8 = vld [vmem:[%s1009_s1 + $0x1e0] sm:$0xff]  ;;  %v606_v10 = vpack.c.bf16 %v36_v2, %v35_v1  ;;  %v608_v14 = vpack.c.bf16 %v54_v7, %v53_v6 }
  0x12   :  { %601 = vmatprep.subr.bf16.mxu0 %v600_v52  ;;  %v86_v9 = vld [vmem:[%s1009_s1 + $0x1e8] sm:$0xff]  ;;  %v37_v11 = vld [vmem:[%s1009_s1 + $0x60] sm:$0xff]  ;;  %v638_v13 = vpack.c.bf16 %v68_v5, %v67_v3  ;;  %v55_v19 = vld [vmem:[%s1009_s1 + $0xf0] sm:$0xff] }
  0x13   :  { %631 = vmatpush3.bf16.msra.mxu1 %v630_v51  ;;  %v21_v12 = vld [vmem:[%s1010_s0 + $0x8] sm:$0xff]  ;;  %v69_v16 = vld [vmem:[%s1009_s1 + $0x160] sm:$0xff]  ;;  %v640_v18 = vpack.c.bf16 %v86_v9, %v85_v8  ;;  %v56_v20 = vld [vmem:[%s1009_s1 + $0xf8] sm:$0xff] }
  0x14   :  { %633 = vmatprep.subr.bf16.mxu1 %v632_v56  ;;  %v38_v15 = vld [vmem:[%s1009_s1 + $0x68] sm:$0xff]  ;;  %176 = vmatprep.mubr.f32.mxu0 %v21_v12  ;;  %v23_v21 = vld [vmem:[%s1010_s0 + $0x18] sm:$0xff]  ;;  %v87_v22 = vld [vmem:[%s1009_s1 + $0x1f0] sm:$0xff]  ;;  %v612_v26 = vpack.c.bf16 %v56_v20, %v55_v19 }
  0x15   :  { %603 = vmatpush3.bf16.msra.mxu0 %v602_v62  ;;  %v70_v17 = vld [vmem:[%s1009_s1 + $0x168] sm:$0xff]  ;;  %v88_v23 = vld [vmem:[%s1009_s1 + $0x1f8] sm:$0xff]  ;;  %246 = vmatprep.mubr.f32.mxu1 %v23_v21  ;;  %v610_v24 = vpack.c.bf16 %v38_v15, %v37_v11  ;;  %v39_v27 = vld [vmem:[%s1009_s1 + $0x70] sm:$0xff] }
  0x16   :  { %605 = vmatprep.subr.bf16.mxu0 %v604_v0  ;;  %v642_v25 = vpack.c.bf16 %v70_v17, %v69_v16  ;;  %v40_v28 = vld [vmem:[%s1009_s1 + $0x78] sm:$0xff]  ;;  %v644_v29 = vpack.c.bf16 %v88_v23, %v87_v22  ;;  %v71_v30 = vld [vmem:[%s1009_s1 + $0x170] sm:$0xff]  ;;  %v89_v34 = vld [vmem:[%s1009_s1 + $0x200] sm:$0xff] }
  0x17   :  { %635 = vmatpush3.bf16.msra.mxu1 %v634_v63  ;;  %v72_v31 = vld [vmem:[%s1009_s1 + $0x178] sm:$0xff]  ;;  %v614_v32 = vpack.c.bf16 %v40_v28, %v39_v27  ;;  %v90_v35 = vld [vmem:[%s1009_s1 + $0x208] sm:$0xff]  ;;  %v20_v36 = vld [vmem:[%s1010_s0] sm:$0xff] }
  0x18   :  { %637 = vmatprep.subr.bf16.mxu1 %v636_v4  ;;  %v646_v33 = vpack.c.bf16 %v72_v31, %v71_v30  ;;  %v649_v37 = vpack.c.bf16 %v90_v35, %v89_v34  ;;  %v22_v39 = vld [vmem:[%s1010_s0 + $0x10] sm:$0xff]  ;;  %v92_v41 = vld [vmem:[%s1009_s1 + $0x218] sm:$0xff]  ;;  %v93_v43 = vld [vmem:[%s1009_s1 + $0x220] sm:$0xff] }
  0x19   :  { %607 = vmatpush3.bf16.msra.mxu0 %v606_v10  ;;  %v91_v40 = vld [vmem:[%s1009_s1 + $0x210] sm:$0xff]  ;;  %v94_v44 = vld [vmem:[%s1009_s1 + $0x228] sm:$0xff]  ;;  %v96_v48 = vld [vmem:[%s1009_s1 + $0x238] sm:$0xff] }
  0x1a   :  { %609 = vmatprep.subr.bf16.mxu0 %v608_v14  ;;  %v652_v42 = vpack.c.bf16 %v92_v41, %v91_v40  ;;  %v655_v46 = vpack.c.bf16 %v94_v44, %v93_v43  ;;  %v95_v47 = vld [vmem:[%s1009_s1 + $0x230] sm:$0xff]  ;;  %v97_v50 = vld [vmem:[%s1009_s1 + $0x240] sm:$0xff]  ;;  %v98_v51 = vld [vmem:[%s1009_s1 + $0x248] sm:$0xff] }
  0x1b   :  { %639 = vmatpush3.bf16.msra.mxu1 %v638_v13  ;;  %v658_v49 = vpack.c.bf16 %v96_v48, %v95_v47  ;;  %v661_v52 = vpack.c.bf16 %v98_v51, %v97_v50  ;;  %v99_v53 = vld [vmem:[%s1009_s1 + $0x250] sm:$0xff]  ;;  %v100_v54 = vld [vmem:[%s1009_s1 + $0x258] sm:$0xff]  ;;  %v101_v56 = vld [vmem:[%s1009_s1 + $0x260] sm:$0xff] }
  0x1c   :  { %641 = vmatprep.subr.bf16.mxu1 %v640_v18  ;;  %v664_v55 = vpack.c.bf16 %v100_v54, %v99_v53  ;;  %v102_v57 = vld [vmem:[%s1009_s1 + $0x268] sm:$0xff]  ;;  %v103_v59 = vld [vmem:[%s1009_s1 + $0x270] sm:$0xff]  ;;  %v104_v60 = vld [vmem:[%s1009_s1 + $0x278] sm:$0xff] }
  0x1d   :  { %611 = vmatpush3.bf16.msra.mxu0 %v610_v24  ;;  %v667_v58 = vpack.c.bf16 %v102_v57, %v101_v56  ;;  %v670_v61 = vpack.c.bf16 %v104_v60, %v103_v59  ;;  %v24_v62 = vld [vmem:[%s1010_s0 + $0x20] sm:$0xff]  ;;  %v324_v0 = vld [vmem:[%s1011_s3 + $0x8] sm:$0xff]  ;;  %v325_v1 = vld [vmem:[%s1011_s3 + $0x10] sm:$0xff] }
  0x1e   :  { %613 = vmatprep.subr.bf16.mxu0 %v612_v26  ;;  %v323_v63 = vld [vmem:[%s1011_s3] sm:$0xff]  ;;  %v326_v3 = vld [vmem:[%s1011_s3 + $0x18] sm:$0xff]  ;;  %v328_v6 = vld [vmem:[%s1011_s3 + $0x28] sm:$0xff] }
  0x1f   :  { %643 = vmatpush3.bf16.msra.mxu1 %v642_v25  ;;  %v673_v2 = vpack.c.bf16 %v324_v0, %v323_v63  ;;  %v676_v4 = vpack.c.bf16 %v326_v3, %v325_v1  ;;  %v327_v5 = vld [vmem:[%s1011_s3 + $0x20] sm:$0xff]  ;;  %v329_v8 = vld [vmem:[%s1011_s3 + $0x30] sm:$0x3] }
  0x20   :  { %645 = vmatprep.subr.bf16.mxu1 %v644_v29  ;;  %v679_v7 = vpack.c.bf16 %v328_v6, %v327_v5  ;;  %v433_v10 = vld [vmem:[%s1012_s2] ss:$0 sm:$0xff] }
  0x21   :  { %615 = vmatpush3.bf16.msra.mxu0 %v614_v32  ;;  %v434_v22 = vld [vmem:[%s1013_s4] ss:$0 sm:$0xff] }
  0x22   :  { %648 = vmatprep.subr.bf16.mxu0 %v688_v38 }
  0x23   :  { %647 = vmatpush3.bf16.msra.mxu1 %v646_v33 }
  0x24   :  { %672 = vmatprep.subr.bf16.mxu1 %v688_v38  ;;  %177 = vmatmul.mubr.f32.vlgmr.msra.gmra.mrb[0].mxu0 %v20_v36 }
  0x25   :  { %650 = vmatpush3.bf16.msra.mxu0 %v649_v37  ;;  %564 = vmatprep.mubr.msk.f32.mxu0 %vm689_vm0, %v690_v45 }
  0x26   :  { %247 = vmatmul.mubr.f32.vlgmr.msra.gmra.mrb[0].mxu1 %v22_v39  ;;  %651 = vmatprep.subr.bf16.mxu0 %v688_v38 }
  0x27   :  { %581 = vmatprep.mubr.msk.f32.mxu1 %vm689_vm0, %v690_v45  ;;  %674 = vmatpush3.bf16.msra.mxu1 %v673_v2 }
  0x28   :  { %675 = vmatprep.subr.bf16.mxu1 %v688_v38 }
  0x29   :  { %653 = vmatpush3.bf16.msra.mxu0 %v652_v42 }
  0x2a   :  { %654 = vmatprep.subr.bf16.mxu0 %v688_v38 }
  0x2b   :  { %677 = vmatpush3.bf16.msra.mxu1 %v676_v4 }
  0x2c   :  { %678 = vmatprep.subr.bf16.mxu1 %v688_v38 }
  0x2d   :  { %656 = vmatpush3.bf16.msra.mxu0 %v655_v46 }
  0x2e   :  { %657 = vmatprep.subr.bf16.mxu0 %v688_v38 }
  0x2f   :  { %680 = vmatpush3.bf16.msra.mxu1 %v679_v7 }
  0x30   :  { %579 = vmatprep.subr.mxu1 %v690_v45 }
  0x31   :  { %659 = vmatpush3.bf16.msra.mxu0 %v658_v49 }
  0x32   :  { %660 = vmatprep.subr.bf16.mxu0 %v688_v38 }
  0x33   :  { %580 = vmatpush3.msk.msra.mxu1 %vm341_vm1, %v329_v8 }
  0x35   :  { %662 = vmatpush3.bf16.msra.mxu0 %v661_v52 }
  0x36   :  { %663 = vmatprep.subr.bf16.mxu0 %v688_v38 }
  0x39   :  { %665 = vmatpush3.bf16.msra.mxu0 %v664_v55 }
  0x3a   :  { %666 = vmatprep.subr.bf16.mxu0 %v688_v38 }
  0x3d   :  { %668 = vmatpush3.bf16.msra.mxu0 %v667_v58 }
  0x3e   :  { %669 = vmatprep.subr.bf16.mxu0 %v688_v38 }
  0x41   :  { %671 = vmatpush3.bf16.msra.mxu0 %v670_v61 }
  0x44   :  { %565 = vmatmul.mubr.f32.vlgmr.msra.gmra.mrb[2].mxu0 %v24_v62 }
  0xf7   :  { %v469_v9 = vpop.f32.mrb[0].mxu0 }
  0xf8   :  { %v470_v11 = vpop.f32.mrb[1].mxu0 }
  0xf9   :  { %v504_v12 = vpop.f32.mrb[0].mxu1  ;;  %v471_v13 = vadd.f32 %v470_v11, %v469_v9 }
  0xfa   :  { %v505_v14 = vpop.f32.mrb[1].mxu1 }
  0xfb   :  { %v506_v15 = vadd.f32 %v505_v14, %v504_v12  ;;  %v179_v16 = vadd.f32 %v471_v13, %v433_v10 }
  0xfd   :  { %v249_v17 = vadd.f32 %v506_v15, %v179_v16 }
 0x117   :  { %v318_v18 = vpop.f32.mrb[2].mxu0 }
 0x118   :  { %v319_v19 = vadd.f32 %v318_v18, %v249_v17  ;;  %v566_v20 = vpop.f32.mrb[3].mxu0 }
 0x11a   :  { %v322_v21 = vmax.f32 %v319_v19, 0.0 }
 0x11c   :  { %582 = vmatmul.mubr.msk.f32.vlgmr.msra.gmra.mrb[2].mxu1 %vm337_vm2, %v322_v21 }
 0x1ef   :  { %v411_v23 = vpop.f32.mrb[2].mxu1 }
 0x1f0   :  { %v412_v24 = vadd.f32 %v434_v22, %v411_v23  ;;  %v583_v25 = vpop.f32.mrb[3].mxu1 }
 0x1f2   :  { %v416_v26 = vsel %vm415_vm3, %v412_v24, -inf }
 0x1f3   :  { %417 = vmax.xlane.f32.xlu0 %v416_v26 }
 0x280   :  { %v418_v27 = vpop.xlane.xlu0 %417 }
 0x281   :  { %v419_v28 = vsub.f32 %v412_v24, %v418_v27 }
 0x283   :  { %v420_v29 = vmul.f32 1.442695, %v419_v28 }
 0x285   :  { %684 = vpow2.f32 %v420_v29 }
 0x28f   :  { %v685_v30 = vpop.eup %684 }
 0x290   :  { %v422_v31 = vsel %vm415_vm3, %v685_v30, 0.0 }
 0x291   :  { %423 = vadd.xlane.f32.xlu0 %v422_v31 }
 0x31e   :  { %v424_v32 = vpop.xlane.xlu0 %423 }
 0x31f   :  { %686 = vlog2.f32 %v424_v32 }
 0x329   :  { %v687_v33 = vpop.eup %686 }
 0x32a   :  { %v426_v34 = vmul.f32 0.6931472, %v687_v33 }
 0x32c   :  { %v427_v35 = vsub.f32 %v419_v28, %v426_v34 }
 0x32e   :  { %428 = vst.msk [vmem:[%s1014_s5] sm:$0xff] %vm415_vm3, %v427_v35 }

</bundles_post_ra>
